<compile_context>
chip_gen: v6e
topology: v6e:2x2x1
jax: 0.10.0
libtpu: 0.0.40
codegen_flags: <defaults>
</compile_context>

<pallas_src>
import numpy as np

import jax
import jax.numpy as jnp
from jax.experimental import pallas as pl
from jax.experimental.pallas import tpu as pltpu


# -------------------------------------------------------------------------
# Per-generation VMEM budget and tile caps
# -------------------------------------------------------------------------
def _tpu_budget():
    try:
        cap = pltpu.get_tpu_info().vmem_capacity_bytes
    except Exception:
        cap = 64 * 1024 * 1024
    vmem_limit = int(min(cap - 16 * 1024 * 1024, 100 * 1024 * 1024))
    if cap >= 100 * 1024 * 1024:      # v5e / v6e: 128 MiB physical VMEM
        tn_cap, thw_cap = 2048, 8192
    else:                             # v7x: 64 MiB physical VMEM
        tn_cap, thw_cap = 1024, 4096
    return vmem_limit, tn_cap, thw_cap


_VMEM_LIMIT, _TN_CAP, _THW_CAP = _tpu_budget()


def _pick_tile(n, max_tile, quantum):
    """Largest tile <= max_tile that is a multiple of `quantum` and divides n.
    Callers pass n already padded to a multiple of `quantum` on the lane axis,
    so the full-dimension fallback only triggers for small sublane dims (legal:
    full array dims are always a valid block)."""
    if n <= max_tile:
        return n
    t = max_tile - max_tile % quantum
    while t >= quantum:
        if n % t == 0:
            return t
        t -= quantum
    return n


# -------------------------------------------------------------------------
# Kernel 1: conv-as-GEMM with fused bias + InstanceNorm partial statistics
# -------------------------------------------------------------------------
def _conv_in_stats_kernel(w_ref, p_ref, b_ref, o_ref, s1_ref, s2_ref):
    # Full-K GEMM on the MXU, f32 accumulation; weights are VMEM-resident
    # (constant index_map), so only the patch tile streams from HBM.
    acc = jnp.dot(w_ref[...], p_ref[0], preferred_element_type=jnp.float32)

    # Per-(b, n-tile) partial InstanceNorm stats of the *pre-bias* conv result:
    # zero-padded tail columns contribute exactly 0 (no masking needed) and the
    # bias is re-added to the mean on the host side, which also keeps the
    # E[x^2]-E[x]^2 variance free of the bias-offset cancellation.
    s1_ref[0, 0] = jnp.sum(acc, axis=1, keepdims=True)
    s2_ref[0, 0] = jnp.sum(acc * acc, axis=1, keepdims=True)

    o_ref[0] = (acc + b_ref[...]).astype(o_ref.dtype)


def conv_gemm_stats(w2, patches, bias_col, out_dtype):
    """w2: (Cout, K) bf16, patches: (B, K, Npad) bf16, bias_col: (Cout, 1) f32
    -> (out (B, Cout, Npad), sum (B, num_n, Cout, 1), sumsq (B, num_n, Cout, 1))."""
    cout, K = w2.shape
    B, _, Np = patches.shape

    tn = _pick_tile(Np, _TN_CAP, 128)     # lane-dense output tiles
    num_n = Np // tn

    stat_spec = pl.BlockSpec((1, 1, cout, 1), lambda b, n: (b, n, 0, 0))

    return pl.pallas_call(
        _conv_in_stats_kernel,
        out_shape=(
            jax.ShapeDtypeStruct((B, cout, Np), out_dtype),
            jax.ShapeDtypeStruct((B, num_n, cout, 1), jnp.float32),
            jax.ShapeDtypeStruct((B, num_n, cout, 1), jnp.float32),
        ),
        grid=(B, num_n),
        in_specs=[
            pl.BlockSpec((cout, K), lambda b, n: (0, 0)),   # weights: fetched once
            pl.BlockSpec((1, K, tn), lambda b, n: (b, 0, n)),
            pl.BlockSpec((cout, 1), lambda b, n: (0, 0)),
        ],
        out_specs=(
            pl.BlockSpec((1, cout, tn), lambda b, n: (b, 0, n)),
            stat_spec,
            stat_spec,
        ),
        compiler_params=pltpu.CompilerParams(
            dimension_semantics=("parallel", "parallel"),
            vmem_limit_bytes=_VMEM_LIMIT,
        ),
    )(w2, patches, bias_col)


# -------------------------------------------------------------------------
# Kernel 2: InstanceNorm apply (precomputed mean / inv-std, fused ReLU/residual)
# -------------------------------------------------------------------------
def _make_in_apply_kernel(relu, has_residual):
    def kernel(x_ref, mu_ref, inv_ref, *rest):
        if has_residual:
            r_ref, o_ref = rest
        else:
            (o_ref,) = rest
        y = (x_ref[...].astype(jnp.float32) - mu_ref[...]) * inv_ref[...]
        if relu:
            y = jnp.maximum(y, 0.0)
        if has_residual:
            y = y + r_ref[...].astype(jnp.float32)
        o_ref[...] = y.astype(o_ref.dtype)

    return kernel


def instance_norm_apply(conv_out, s1, s2, bias, hw_valid, relu, residual):
    """conv_out: (B, C, Npad) bf16. s1/s2: (B, num_n, C, 1) f32 partial sums of
    the pre-bias conv output.  Returns (B, C, Npad) bf16 normalized output."""
    B, C, Np = conv_out.shape
    inv_n = 1.0 / float(hw_valid)

    # Tiny per-(b,c) reductions + rsqrt in plain JAX (done once, not per tile).
    e1 = jnp.sum(s1, axis=1)[..., 0] * inv_n            # E[acc]      (B, C)
    e2 = jnp.sum(s2, axis=1)[..., 0] * inv_n            # E[acc^2]
    mean = e1 + bias[None, :]                           # bias folded back in
    var = jnp.maximum(e2 - e1 * e1, 0.0)                # shift-invariant
    inv_std = jax.lax.rsqrt(var + 1e-5)                 # nn.InstanceNorm2d eps

    BC = B * C
    x2 = conv_out.reshape(BC, Np)
    mu2 = mean.reshape(BC, 1).astype(jnp.float32)
    is2 = inv_std.reshape(BC, 1).astype(jnp.float32)

    tbc = _pick_tile(BC, 256, 16)        # 16: bf16 sublane packing
    thw = _pick_tile(Np, _THW_CAP, 128)
    n_bc, n_hw = BC // tbc, Np // thw

    x_spec = pl.BlockSpec((tbc, thw), lambda i, j: (i, j))
    s_spec = pl.BlockSpec((tbc, 1), lambda i, j: (i, 0))

    args = [x2, mu2, is2]
    in_specs = [x_spec, s_spec, s_spec]
    if residual is not None:
        r2 = residual.astype(jnp.bfloat16).reshape(BC, -1)
        if r2.shape[1] != Np:
            r2 = jnp.pad(r2, ((0, 0), (0, Np - r2.shape[1])))
        args.append(r2)
        in_specs.append(x_spec)

    out = pl.pallas_call(
        _make_in_apply_kernel(relu, residual is not None),
        out_shape=jax.ShapeDtypeStruct((BC, Np), jnp.bfloat16),
        grid=(n_bc, n_hw),
        in_specs=in_specs,
        out_specs=x_spec,
        compiler_params=pltpu.CompilerParams(
            dimension_semantics=("parallel", "parallel"),
            vmem_limit_bytes=_VMEM_LIMIT,
        ),
    )(*args)
    return out.reshape(B, C, Np)


# -------------------------------------------------------------------------
# Fused (upsample + ReflectionPad + im2col) patch extraction -- JAX glue
# -------------------------------------------------------------------------
def _reflect(idx, n):
    idx = np.where(idx < 0, -idx, idx)
    idx = np.where(idx >= n, 2 * n - 2 - idx, idx)
    return idx


def _src_indices(out_len, k, stride, pad, in_len, up):
    # Source index into the ORIGINAL (un-upsampled, un-padded) tensor for each
    # (output position, kernel offset), folding nearest-x`up` upsample and
    # reflection padding into the index map.
    q = np.arange(out_len)[:, None] * stride + np.arange(k)[None, :] - pad
    q = _reflect(q, in_len * up)
    return (q // up).astype(np.int32)        # (out_len, k)


def _im2col(x, k, stride, up):
    """x: (B, Cin, H, W) -> patches (B, Cin*k*k, Npad) bf16 (tail zero-padded
    to a multiple of 128), plus Ho, Wo.  No padded or upsampled tensor is ever
    materialized in HBM."""
    B, C, H, W = x.shape
    p = k // 2
    Ho = (H * up + 2 * p - k) // stride + 1
    Wo = (W * up + 2 * p - k) // stride + 1

    hidx = _src_indices(Ho, k, stride, p, H, up)   # (Ho, k)
    widx = _src_indices(Wo, k, stride, p, W, up)   # (Wo, k)

    xb = x.astype(jnp.bfloat16)
    xg = jnp.take(xb, jnp.asarray(hidx.T.reshape(-1)), axis=2)   # (B,C,k*Ho,W)
    xg = jnp.take(xg, jnp.asarray(widx.T.reshape(-1)), axis=3)   # (B,C,k*Ho,k*Wo)
    xg = xg.reshape(B, C, k, Ho, k, Wo).transpose(0, 1, 2, 4, 3, 5)
    patches = xg.reshape(B, C * k * k, Ho * Wo)    # K order = (ci, kh, kw)

    N = Ho * Wo
    Np = -(-N // 128) * 128
    if Np != N:
        patches = jnp.pad(patches, ((0, 0), (0, 0), (0, Np - N)))
    return patches, Ho, Wo


# -------------------------------------------------------------------------
# One ConvLayer (= optional upsample + reflect-pad + conv [+ IN] [+ ReLU])
# -------------------------------------------------------------------------
def conv_layer(x, w, b, *, stride=1, upsample=1, instance_norm=True,
               relu=True, residual=None):
    cout, cin, k, _ = w.shape
    B = x.shape[0]

    patches, Ho, Wo = _im2col(x, k, stride, upsample)
    N = Ho * Wo

    w2 = w.reshape(cout, cin * k * k).astype(jnp.bfloat16)
    bcol = b.reshape(cout, 1).astype(jnp.float32)

    out_dtype = jnp.bfloat16 if instance_norm else jnp.float32
    conv_out, s1, s2 = conv_gemm_stats(w2, patches, bcol, out_dtype)

    if not instance_norm:
        y = conv_out[:, :, :N].reshape(B, cout, Ho, Wo)
        if relu:
            y = jnp.maximum(y, 0.0)
        return y

    y = instance_norm_apply(conv_out, s1, s2, b.astype(jnp.float32),
                            N, relu, residual)
    return y[:, :, :N].reshape(B, cout, Ho, Wo)


# -------------------------------------------------------------------------
# TransformNet forward (NCHW in, NCHW out)
# -------------------------------------------------------------------------
def transform_net_forward(x, params):
    it = iter(params)

    # downsampling
    w, b = next(it)
    x = conv_layer(x, w, b, stride=1)                       # 9x9
    w, b = next(it)
    x = conv_layer(x, w, b, stride=2)
    w, b = next(it)
    x = conv_layer(x, w, b, stride=2)

    # 5 residual blocks: x = IN(conv2(relu(IN(conv1(x))))) + x
    for _ in range(5):
        w1, b1 = next(it)
        w2, b2 = next(it)
        y = conv_layer(x, w1, b1, stride=1)
        x = conv_layer(y, w2, b2, stride=1, relu=False, residual=x)

    # upsampling
    w, b = next(it)
    x = conv_layer(x, w, b, upsample=2)
    w, b = next(it)
    x = conv_layer(x, w, b, upsample=2)
    w, b = next(it)
    x = conv_layer(x, w, b, instance_norm=False, relu=False)   # 9x9, no IN/ReLU
    return x


# -------------------------------------------------------------------------
# Deterministic parameter construction (synthetic init, no checkpoint load)
# -------------------------------------------------------------------------
def init_params(key, base=8):
    conv_defs = [
        (3, base, 9),
        (base, 2 * base, 3),
        (2 * base, 4 * base, 3),
    ]
    for _ in range(5):
        conv_defs.append((4 * base, 4 * base, 3))
        conv_defs.append((4 * base, 4 * base, 3))
    conv_defs += [
        (4 * base, 2 * base, 3),
        (2 * base, base, 3),
        (base, 3, 9),
    ]

    params = []
    keys = jax.random.split(key, len(conv_defs))
    for (cin, cout, k), kk in zip(conv_defs, keys):
        wk, bk = jax.random.split(kk)
        fan_in = cin * k * k
        w = jax.random.normal(wk, (cout, cin, k, k), jnp.float32) / jnp.sqrt(fan_in)
        b = 0.01 * jax.random.normal(bk, (cout,), jnp.float32)
        params.append((w, b))
    return params


# -------------------------------------------------------------------------
if __name__ == "__main__":
    base = 8                      # small "base" width for a quick synthetic run
    key = jax.random.PRNGKey(0)
    xkey, pkey = jax.random.split(key)

    x = jax.random.normal(xkey, (2, 3, 16, 16), jnp.float32)   # NCHW like PyTorch
    params = init_params(pkey, base=base)

    fwd = jax.jit(transform_net_forward)
    y = fwd(x, params)
    jax.block_until_ready(y)

    assert y.shape == (2, 3, 16, 16), y.shape
    assert bool(jnp.all(jnp.isfinite(y)))
    print("KERNEL_OK")
</pallas_src>

<mosaic_0001>
module attributes {stable_mosaic.version = 11 : i64} {
  func.func @_conv_in_stats_kernel(%arg0: i32, %arg1: i32, %arg2: memref<8x243xbf16, #tpu.memory_space<vmem>>, %arg3: memref<1x243x256xbf16, #tpu.memory_space<vmem>>, %arg4: memref<8x1xf32, #tpu.memory_space<vmem>>, %arg5: memref<1x8x256xbf16, #tpu.memory_space<vmem>>, %arg6: memref<1x1x8x1xf32, #tpu.memory_space<vmem>>, %arg7: memref<1x1x8x1xf32, #tpu.memory_space<vmem>>) attributes {dimension_semantics = [#tpu.dimension_semantics<parallel>, #tpu.dimension_semantics<parallel>], iteration_bounds = array<i64: 2, 1>, scalar_prefetch = 0 : i64, scratch_operands = 0 : i64, tpu.core_type = #tpu.core_type<tc>, window_params = [{pipeline_mode = #tpu.pipeline_mode<synchronous>, transform_indices = @transform_0, window_bounds = array<i64: 8, 243>}, {transform_indices = @transform_1, window_bounds = array<i64: 1, 243, 256>}, {pipeline_mode = #tpu.pipeline_mode<synchronous>, transform_indices = @transform_2, window_bounds = array<i64: 8, 1>}, {transform_indices = @transform_3, window_bounds = array<i64: 1, 8, 256>}, {transform_indices = @transform_4, window_bounds = array<i64: 1, 1, 8, 1>}, {transform_indices = @transform_5, window_bounds = array<i64: 1, 1, 8, 1>}]} {
    %c0 = arith.constant 0 : index
    %c0_0 = arith.constant 0 : index
    %0 = vector.load %arg2[%c0, %c0_0] : memref<8x243xbf16, #tpu.memory_space<vmem>>, vector<8x243xbf16>
    %c0_1 = arith.constant 0 : index
    %c0_2 = arith.constant 0 : index
    %c0_3 = arith.constant 0 : index
    %1 = vector.load %arg3[%c0_1, %c0_2, %c0_3] : memref<1x243x256xbf16, #tpu.memory_space<vmem>>, vector<1x243x256xbf16>
    %2 = vector.shape_cast %1 : vector<1x243x256xbf16> to vector<243x256xbf16>
    %cst = arith.constant dense<0.000000e+00> : vector<8x256xf32>
    %3 = tpu.matmul %0, %2, %cst {dimension_numbers = #tpu.dot_dimension_numbers<[1], [0], [0], [1], [0, 0, 1, 1], [], []>} : vector<8x243xbf16>, vector<243x256xbf16>, vector<8x256xf32> -> vector<8x256xf32>
    %cst_4 = arith.constant dense<0.000000e+00> : vector<8xf32>
    %4 = vector.multi_reduction <add>, %3, %cst_4 [1] : vector<8x256xf32> to vector<8xf32>
    %5 = vector.shape_cast %4 : vector<8xf32> to vector<8x1xf32>
    %c0_5 = arith.constant 0 : index
    %c0_6 = arith.constant 0 : index
    %c0_7 = arith.constant 0 : index
    %c0_8 = arith.constant 0 : index
    %6 = vector.load %arg6[%c0_5, %c0_6, %c0_7, %c0_8] : memref<1x1x8x1xf32, #tpu.memory_space<vmem>>, vector<1x1x8x1xf32>
    %7 = vector.shape_cast %6 : vector<1x1x8x1xf32> to vector<8x1xf32>
    %8 = vector.shape_cast %5 : vector<8x1xf32> to vector<1x1x8x1xf32>
    tpu.vector_store %arg6[%c0_5, %c0_6, %c0_7, %c0_8], %8 {strides = array<i32>} : memref<1x1x8x1xf32, #tpu.memory_space<vmem>>, vector<1x1x8x1xf32>,
    %9 = arith.mulf %3, %3 : vector<8x256xf32>
    %cst_9 = arith.constant dense<0.000000e+00> : vector<8xf32>
    %10 = vector.multi_reduction <add>, %9, %cst_9 [1] : vector<8x256xf32> to vector<8xf32>
    %11 = vector.shape_cast %10 : vector<8xf32> to vector<8x1xf32>
    %c0_10 = arith.constant 0 : index
    %c0_11 = arith.constant 0 : index
    %c0_12 = arith.constant 0 : index
    %c0_13 = arith.constant 0 : index
    %12 = vector.load %arg7[%c0_10, %c0_11, %c0_12, %c0_13] : memref<1x1x8x1xf32, #tpu.memory_space<vmem>>, vector<1x1x8x1xf32>
    %13 = vector.shape_cast %12 : vector<1x1x8x1xf32> to vector<8x1xf32>
    %14 = vector.shape_cast %11 : vector<8x1xf32> to vector<1x1x8x1xf32>
    tpu.vector_store %arg7[%c0_10, %c0_11, %c0_12, %c0_13], %14 {strides = array<i32>} : memref<1x1x8x1xf32, #tpu.memory_space<vmem>>, vector<1x1x8x1xf32>,
    %c0_14 = arith.constant 0 : index
    %c0_15 = arith.constant 0 : index
    %15 = vector.load %arg4[%c0_14, %c0_15] : memref<8x1xf32, #tpu.memory_space<vmem>>, vector<8x1xf32>
    %16 = vector.broadcast %15 : vector<8x1xf32> to vector<8x256xf32>
    %17 = arith.addf %3, %16 : vector<8x256xf32>
    %18 = arith.truncf %17 : vector<8x256xf32> to vector<8x256xbf16>
    %c0_16 = arith.constant 0 : index
    %c0_17 = arith.constant 0 : index
    %c0_18 = arith.constant 0 : index
    %19 = vector.load %arg5[%c0_16, %c0_17, %c0_18] : memref<1x8x256xbf16, #tpu.memory_space<vmem>>, vector<1x8x256xbf16>
    %20 = vector.shape_cast %19 : vector<1x8x256xbf16> to vector<8x256xbf16>
    %21 = vector.shape_cast %18 : vector<8x256xbf16> to vector<1x8x256xbf16>
    tpu.vector_store %arg5[%c0_16, %c0_17, %c0_18], %21 {strides = array<i32>} : memref<1x8x256xbf16, #tpu.memory_space<vmem>>, vector<1x8x256xbf16>,
    return
  }
  func.func @transform_0(%arg0: i32, %arg1: i32) -> (i32, i32) {
    %c0_i32 = arith.constant 0 : i32
    %c0_i32_0 = arith.constant 0 : i32
    %c0_i32_1 = arith.constant 0 : i32
    return %c0_i32, %c0_i32_0 : i32, i32
  }
  func.func @transform_1(%arg0: i32, %arg1: i32) -> (i32, i32, i32) {
    %c0_i32 = arith.constant 0 : i32
    %c0_i32_0 = arith.constant 0 : i32
    return %arg0, %c0_i32, %arg1 : i32, i32, i32
  }
  func.func @transform_2(%arg0: i32, %arg1: i32) -> (i32, i32) {
    %c0_i32 = arith.constant 0 : i32
    %c0_i32_0 = arith.constant 0 : i32
    %c0_i32_1 = arith.constant 0 : i32
    return %c0_i32, %c0_i32_0 : i32, i32
  }
  func.func @transform_3(%arg0: i32, %arg1: i32) -> (i32, i32, i32) {
    %c0_i32 = arith.constant 0 : i32
    %c0_i32_0 = arith.constant 0 : i32
    return %arg0, %c0_i32, %arg1 : i32, i32, i32
  }
  func.func @transform_4(%arg0: i32, %arg1: i32) -> (i32, i32, i32, i32) {
    %c0_i32 = arith.constant 0 : i32
    %c0_i32_0 = arith.constant 0 : i32
    %c0_i32_1 = arith.constant 0 : i32
    return %arg0, %arg1, %c0_i32, %c0_i32_0 : i32, i32, i32, i32
  }
  func.func @transform_5(%arg0: i32, %arg1: i32) -> (i32, i32, i32, i32) {
    %c0_i32 = arith.constant 0 : i32
    %c0_i32_0 = arith.constant 0 : i32
    %c0_i32_1 = arith.constant 0 : i32
    return %arg0, %arg1, %c0_i32, %c0_i32_0 : i32, i32, i32, i32
  }
}

module attributes {stable_mosaic.version = 11 : i64} {
  func.func @kernel(%arg0: i32, %arg1: i32, %arg2: memref<16x256xbf16, #tpu.memory_space<vmem>>, %arg3: memref<16x1xf32, #tpu.memory_space<vmem>>, %arg4: memref<16x1xf32, #tpu.memory_space<vmem>>, %arg5: memref<16x256xbf16, #tpu.memory_space<vmem>>) attributes {dimension_semantics = [#tpu.dimension_semantics<parallel>, #tpu.dimension_semantics<parallel>], iteration_bounds = array<i64: 1, 1>, scalar_prefetch = 0 : i64, scratch_operands = 0 : i64, tpu.core_type = #tpu.core_type<tc>, window_params = [{transform_indices = @transform_0, window_bounds = array<i64: 16, 256>}, {transform_indices = @transform_1, window_bounds = array<i64: 16, 1>}, {transform_indices = @transform_2, window_bounds = array<i64: 16, 1>}, {transform_indices = @transform_3, window_bounds = array<i64: 16, 256>}]} {
    %c0 = arith.constant 0 : index
    %c0_0 = arith.constant 0 : index
    %0 = vector.load %arg2[%c0, %c0_0] : memref<16x256xbf16, #tpu.memory_space<vmem>>, vector<16x256xbf16>
    %1 = arith.extf %0 : vector<16x256xbf16> to vector<16x256xf32>
    %c0_1 = arith.constant 0 : index
    %c0_2 = arith.constant 0 : index
    %2 = vector.load %arg3[%c0_1, %c0_2] : memref<16x1xf32, #tpu.memory_space<vmem>>, vector<16x1xf32>
    %3 = vector.broadcast %2 : vector<16x1xf32> to vector<16x256xf32>
    %4 = arith.subf %1, %3 : vector<16x256xf32>
    %c0_3 = arith.constant 0 : index
    %c0_4 = arith.constant 0 : index
    %5 = vector.load %arg4[%c0_3, %c0_4] : memref<16x1xf32, #tpu.memory_space<vmem>>, vector<16x1xf32>
    %6 = vector.broadcast %5 : vector<16x1xf32> to vector<16x256xf32>
    %7 = arith.mulf %4, %6 : vector<16x256xf32>
    %cst = arith.constant 0.000000e+00 : f32
    %8 = vector.broadcast %cst : f32 to vector<16x256xf32>
    %9 = arith.maximumf %7, %8 : vector<16x256xf32>
    %10 = arith.truncf %9 : vector<16x256xf32> to vector<16x256xbf16>
    %c0_5 = arith.constant 0 : index
    %c0_6 = arith.constant 0 : index
    %11 = vector.load %arg5[%c0_5, %c0_6] : memref<16x256xbf16, #tpu.memory_space<vmem>>, vector<16x256xbf16>
    tpu.vector_store %arg5[%c0_5, %c0_6], %10 {strides = array<i32>} : memref<16x256xbf16, #tpu.memory_space<vmem>>, vector<16x256xbf16>,
    return
  }
  func.func @transform_0(%arg0: i32, %arg1: i32) -> (i32, i32) {
    %c0_i32 = arith.constant 0 : i32
    return %arg0, %arg1 : i32, i32
  }
  func.func @transform_1(%arg0: i32, %arg1: i32) -> (i32, i32) {
    %c0_i32 = arith.constant 0 : i32
    %c0_i32_0 = arith.constant 0 : i32
    return %arg0, %c0_i32 : i32, i32
  }
  func.func @transform_2(%arg0: i32, %arg1: i32) -> (i32, i32) {
    %c0_i32 = arith.constant 0 : i32
    %c0_i32_0 = arith.constant 0 : i32
    return %arg0, %c0_i32 : i32, i32
  }
  func.func @transform_3(%arg0: i32, %arg1: i32) -> (i32, i32) {
    %c0_i32 = arith.constant 0 : i32
    return %arg0, %arg1 : i32, i32
  }
}

module attributes {stable_mosaic.version = 11 : i64} {
  func.func @_conv_in_stats_kernel(%arg0: i32, %arg1: i32, %arg2: memref<16x72xbf16, #tpu.memory_space<vmem>>, %arg3: memref<1x72x128xbf16, #tpu.memory_space<vmem>>, %arg4: memref<16x1xf32, #tpu.memory_space<vmem>>, %arg5: memref<1x16x128xbf16, #tpu.memory_space<vmem>>, %arg6: memref<1x1x16x1xf32, #tpu.memory_space<vmem>>, %arg7: memref<1x1x16x1xf32, #tpu.memory_space<vmem>>) attributes {dimension_semantics = [#tpu.dimension_semantics<parallel>, #tpu.dimension_semantics<parallel>], iteration_bounds = array<i64: 2, 1>, scalar_prefetch = 0 : i64, scratch_operands = 0 : i64, tpu.core_type = #tpu.core_type<tc>, window_params = [{pipeline_mode = #tpu.pipeline_mode<synchronous>, transform_indices = @transform_0, window_bounds = array<i64: 16, 72>}, {transform_indices = @transform_1, window_bounds = array<i64: 1, 72, 128>}, {pipeline_mode = #tpu.pipeline_mode<synchronous>, transform_indices = @transform_2, window_bounds = array<i64: 16, 1>}, {transform_indices = @transform_3, window_bounds = array<i64: 1, 16, 128>}, {transform_indices = @transform_4, window_bounds = array<i64: 1, 1, 16, 1>}, {transform_indices = @transform_5, window_bounds = array<i64: 1, 1, 16, 1>}]} {
    %c0 = arith.constant 0 : index
    %c0_0 = arith.constant 0 : index
    %0 = vector.load %arg2[%c0, %c0_0] : memref<16x72xbf16, #tpu.memory_space<vmem>>, vector<16x72xbf16>
    %c0_1 = arith.constant 0 : index
    %c0_2 = arith.constant 0 : index
    %c0_3 = arith.constant 0 : index
    %1 = vector.load %arg3[%c0_1, %c0_2, %c0_3] : memref<1x72x128xbf16, #tpu.memory_space<vmem>>, vector<1x72x128xbf16>
    %2 = vector.shape_cast %1 : vector<1x72x128xbf16> to vector<72x128xbf16>
    %cst = arith.constant dense<0.000000e+00> : vector<16x128xf32>
    %3 = tpu.matmul %0, %2, %cst {dimension_numbers = #tpu.dot_dimension_numbers<[1], [0], [0], [1], [0, 0, 1, 1], [], []>} : vector<16x72xbf16>, vector<72x128xbf16>, vector<16x128xf32> -> vector<16x128xf32>
    %cst_4 = arith.constant dense<0.000000e+00> : vector<16xf32>
    %4 = vector.multi_reduction <add>, %3, %cst_4 [1] : vector<16x128xf32> to vector<16xf32>
    %5 = vector.shape_cast %4 : vector<16xf32> to vector<16x1xf32>
    %c0_5 = arith.constant 0 : index
    %c0_6 = arith.constant 0 : index
    %c0_7 = arith.constant 0 : index
    %c0_8 = arith.constant 0 : index
    %6 = vector.load %arg6[%c0_5, %c0_6, %c0_7, %c0_8] : memref<1x1x16x1xf32, #tpu.memory_space<vmem>>, vector<1x1x16x1xf32>
    %7 = vector.shape_cast %6 : vector<1x1x16x1xf32> to vector<16x1xf32>
    %8 = vector.shape_cast %5 : vector<16x1xf32> to vector<1x1x16x1xf32>
    tpu.vector_store %arg6[%c0_5, %c0_6, %c0_7, %c0_8], %8 {strides = array<i32>} : memref<1x1x16x1xf32, #tpu.memory_space<vmem>>, vector<1x1x16x1xf32>,
    %9 = arith.mulf %3, %3 : vector<16x128xf32>
    %cst_9 = arith.constant dense<0.000000e+00> : vector<16xf32>
    %10 = vector.multi_reduction <add>, %9, %cst_9 [1] : vector<16x128xf32> to vector<16xf32>
    %11 = vector.shape_cast %10 : vector<16xf32> to vector<16x1xf32>
    %c0_10 = arith.constant 0 : index
    %c0_11 = arith.constant 0 : index
    %c0_12 = arith.constant 0 : index
    %c0_13 = arith.constant 0 : index
    %12 = vector.load %arg7[%c0_10, %c0_11, %c0_12, %c0_13] : memref<1x1x16x1xf32, #tpu.memory_space<vmem>>, vector<1x1x16x1xf32>
    %13 = vector.shape_cast %12 : vector<1x1x16x1xf32> to vector<16x1xf32>
    %14 = vector.shape_cast %11 : vector<16x1xf32> to vector<1x1x16x1xf32>
    tpu.vector_store %arg7[%c0_10, %c0_11, %c0_12, %c0_13], %14 {strides = array<i32>} : memref<1x1x16x1xf32, #tpu.memory_space<vmem>>, vector<1x1x16x1xf32>,
    %c0_14 = arith.constant 0 : index
    %c0_15 = arith.constant 0 : index
    %15 = vector.load %arg4[%c0_14, %c0_15] : memref<16x1xf32, #tpu.memory_space<vmem>>, vector<16x1xf32>
    %16 = vector.broadcast %15 : vector<16x1xf32> to vector<16x128xf32>
    %17 = arith.addf %3, %16 : vector<16x128xf32>
    %18 = arith.truncf %17 : vector<16x128xf32> to vector<16x128xbf16>
    %c0_16 = arith.constant 0 : index
    %c0_17 = arith.constant 0 : index
    %c0_18 = arith.constant 0 : index
    %19 = vector.load %arg5[%c0_16, %c0_17, %c0_18] : memref<1x16x128xbf16, #tpu.memory_space<vmem>>, vector<1x16x128xbf16>
    %20 = vector.shape_cast %19 : vector<1x16x128xbf16> to vector<16x128xbf16>
    %21 = vector.shape_cast %18 : vector<16x128xbf16> to vector<1x16x128xbf16>
    tpu.vector_store %arg5[%c0_16, %c0_17, %c0_18], %21 {strides = array<i32>} : memref<1x16x128xbf16, #tpu.memory_space<vmem>>, vector<1x16x128xbf16>,
    return
  }
  func.func @transform_0(%arg0: i32, %arg1: i32) -> (i32, i32) {
    %c0_i32 = arith.constant 0 : i32
    %c0_i32_0 = arith.constant 0 : i32
    %c0_i32_1 = arith.constant 0 : i32
    return %c0_i32, %c0_i32_0 : i32, i32
  }
  func.func @transform_1(%arg0: i32, %arg1: i32) -> (i32, i32, i32) {
    %c0_i32 = arith.constant 0 : i32
    %c0_i32_0 = arith.constant 0 : i32
    return %arg0, %c0_i32, %arg1 : i32, i32, i32
  }
  func.func @transform_2(%arg0: i32, %arg1: i32) -> (i32, i32) {
    %c0_i32 = arith.constant 0 : i32
    %c0_i32_0 = arith.constant 0 : i32
    %c0_i32_1 = arith.constant 0 : i32
    return %c0_i32, %c0_i32_0 : i32, i32
  }
  func.func @transform_3(%arg0: i32, %arg1: i32) -> (i32, i32, i32) {
    %c0_i32 = arith.constant 0 : i32
    %c0_i32_0 = arith.constant 0 : i32
    return %arg0, %c0_i32, %arg1 : i32, i32, i32
  }
  func.func @transform_4(%arg0: i32, %arg1: i32) -> (i32, i32, i32, i32) {
    %c0_i32 = arith.constant 0 : i32
    %c0_i32_0 = arith.constant 0 : i32
    %c0_i32_1 = arith.constant 0 : i32
    return %arg0, %arg1, %c0_i32, %c0_i32_0 : i32, i32, i32, i32
  }
  func.func @transform_5(%arg0: i32, %arg1: i32) -> (i32, i32, i32, i32) {
    %c0_i32 = arith.constant 0 : i32
    %c0_i32_0 = arith.constant 0 : i32
    %c0_i32_1 = arith.constant 0 : i32
    return %arg0, %arg1, %c0_i32, %c0_i32_0 : i32, i32, i32, i32
  }
}

module attributes {stable_mosaic.version = 11 : i64} {
  func.func @kernel(%arg0: i32, %arg1: i32, %arg2: memref<32x128xbf16, #tpu.memory_space<vmem>>, %arg3: memref<32x1xf32, #tpu.memory_space<vmem>>, %arg4: memref<32x1xf32, #tpu.memory_space<vmem>>, %arg5: memref<32x128xbf16, #tpu.memory_space<vmem>>) attributes {dimension_semantics = [#tpu.dimension_semantics<parallel>, #tpu.dimension_semantics<parallel>], iteration_bounds = array<i64: 1, 1>, scalar_prefetch = 0 : i64, scratch_operands = 0 : i64, tpu.core_type = #tpu.core_type<tc>, window_params = [{transform_indices = @transform_0, window_bounds = array<i64: 32, 128>}, {transform_indices = @transform_1, window_bounds = array<i64: 32, 1>}, {transform_indices = @transform_2, window_bounds = array<i64: 32, 1>}, {transform_indices = @transform_3, window_bounds = array<i64: 32, 128>}]} {
    %c0 = arith.constant 0 : index
    %c0_0 = arith.constant 0 : index
    %0 = vector.load %arg2[%c0, %c0_0] : memref<32x128xbf16, #tpu.memory_space<vmem>>, vector<32x128xbf16>
    %1 = arith.extf %0 : vector<32x128xbf16> to vector<32x128xf32>
    %c0_1 = arith.constant 0 : index
    %c0_2 = arith.constant 0 : index
    %2 = vector.load %arg3[%c0_1, %c0_2] : memref<32x1xf32, #tpu.memory_space<vmem>>, vector<32x1xf32>
    %3 = vector.broadcast %2 : vector<32x1xf32> to vector<32x128xf32>
    %4 = arith.subf %1, %3 : vector<32x128xf32>
    %c0_3 = arith.constant 0 : index
    %c0_4 = arith.constant 0 : index
    %5 = vector.load %arg4[%c0_3, %c0_4] : memref<32x1xf32, #tpu.memory_space<vmem>>, vector<32x1xf32>
    %6 = vector.broadcast %5 : vector<32x1xf32> to vector<32x128xf32>
    %7 = arith.mulf %4, %6 : vector<32x128xf32>
    %cst = arith.constant 0.000000e+00 : f32
    %8 = vector.broadcast %cst : f32 to vector<32x128xf32>
    %9 = arith.maximumf %7, %8 : vector<32x128xf32>
    %10 = arith.truncf %9 : vector<32x128xf32> to vector<32x128xbf16>
    %c0_5 = arith.constant 0 : index
    %c0_6 = arith.constant 0 : index
    %11 = vector.load %arg5[%c0_5, %c0_6] : memref<32x128xbf16, #tpu.memory_space<vmem>>, vector<32x128xbf16>
    tpu.vector_store %arg5[%c0_5, %c0_6], %10 {strides = array<i32>} : memref<32x128xbf16, #tpu.memory_space<vmem>>, vector<32x128xbf16>,
    return
  }
  func.func @transform_0(%arg0: i32, %arg1: i32) -> (i32, i32) {
    %c0_i32 = arith.constant 0 : i32
    return %arg0, %arg1 : i32, i32
  }
  func.func @transform_1(%arg0: i32, %arg1: i32) -> (i32, i32) {
    %c0_i32 = arith.constant 0 : i32
    %c0_i32_0 = arith.constant 0 : i32
    return %arg0, %c0_i32 : i32, i32
  }
  func.func @transform_2(%arg0: i32, %arg1: i32) -> (i32, i32) {
    %c0_i32 = arith.constant 0 : i32
    %c0_i32_0 = arith.constant 0 : i32
    return %arg0, %c0_i32 : i32, i32
  }
  func.func @transform_3(%arg0: i32, %arg1: i32) -> (i32, i32) {
    %c0_i32 = arith.constant 0 : i32
    return %arg0, %arg1 : i32, i32
  }
}

module attributes {stable_mosaic.version = 11 : i64} {
  func.func @_conv_in_stats_kernel(%arg0: i32, %arg1: i32, %arg2: memref<32x144xbf16, #tpu.memory_space<vmem>>, %arg3: memref<1x144x128xbf16, #tpu.memory_space<vmem>>, %arg4: memref<32x1xf32, #tpu.memory_space<vmem>>, %arg5: memref<1x32x128xbf16, #tpu.memory_space<vmem>>, %arg6: memref<1x1x32x1xf32, #tpu.memory_space<vmem>>, %arg7: memref<1x1x32x1xf32, #tpu.memory_space<vmem>>) attributes {dimension_semantics = [#tpu.dimension_semantics<parallel>, #tpu.dimension_semantics<parallel>], iteration_bounds = array<i64: 2, 1>, scalar_prefetch = 0 : i64, scratch_operands = 0 : i64, tpu.core_type = #tpu.core_type<tc>, window_params = [{pipeline_mode = #tpu.pipeline_mode<synchronous>, transform_indices = @transform_0, window_bounds = array<i64: 32, 144>}, {transform_indices = @transform_1, window_bounds = array<i64: 1, 144, 128>}, {pipeline_mode = #tpu.pipeline_mode<synchronous>, transform_indices = @transform_2, window_bounds = array<i64: 32, 1>}, {transform_indices = @transform_3, window_bounds = array<i64: 1, 32, 128>}, {transform_indices = @transform_4, window_bounds = array<i64: 1, 1, 32, 1>}, {transform_indices = @transform_5, window_bounds = array<i64: 1, 1, 32, 1>}]} {
    %c0 = arith.constant 0 : index
    %c0_0 = arith.constant 0 : index
    %0 = vector.load %arg2[%c0, %c0_0] : memref<32x144xbf16, #tpu.memory_space<vmem>>, vector<32x144xbf16>
    %c0_1 = arith.constant 0 : index
    %c0_2 = arith.constant 0 : index
    %c0_3 = arith.constant 0 : index
    %1 = vector.load %arg3[%c0_1, %c0_2, %c0_3] : memref<1x144x128xbf16, #tpu.memory_space<vmem>>, vector<1x144x128xbf16>
    %2 = vector.shape_cast %1 : vector<1x144x128xbf16> to vector<144x128xbf16>
    %cst = arith.constant dense<0.000000e+00> : vector<32x128xf32>
    %3 = tpu.matmul %0, %2, %cst {dimension_numbers = #tpu.dot_dimension_numbers<[1], [0], [0], [1], [0, 0, 1, 1], [], []>} : vector<32x144xbf16>, vector<144x128xbf16>, vector<32x128xf32> -> vector<32x128xf32>
    %cst_4 = arith.constant dense<0.000000e+00> : vector<32xf32>
    %4 = vector.multi_reduction <add>, %3, %cst_4 [1] : vector<32x128xf32> to vector<32xf32>
    %5 = vector.shape_cast %4 : vector<32xf32> to vector<32x1xf32>
    %c0_5 = arith.constant 0 : index
    %c0_6 = arith.constant 0 : index
    %c0_7 = arith.constant 0 : index
    %c0_8 = arith.constant 0 : index
    %6 = vector.load %arg6[%c0_5, %c0_6, %c0_7, %c0_8] : memref<1x1x32x1xf32, #tpu.memory_space<vmem>>, vector<1x1x32x1xf32>
    %7 = vector.shape_cast %6 : vector<1x1x32x1xf32> to vector<32x1xf32>
    %8 = vector.shape_cast %5 : vector<32x1xf32> to vector<1x1x32x1xf32>
    tpu.vector_store %arg6[%c0_5, %c0_6, %c0_7, %c0_8], %8 {strides = array<i32>} : memref<1x1x32x1xf32, #tpu.memory_space<vmem>>, vector<1x1x32x1xf32>,
    %9 = arith.mulf %3, %3 : vector<32x128xf32>
    %cst_9 = arith.constant dense<0.000000e+00> : vector<32xf32>
    %10 = vector.multi_reduction <add>, %9, %cst_9 [1] : vector<32x128xf32> to vector<32xf32>
    %11 = vector.shape_cast %10 : vector<32xf32> to vector<32x1xf32>
    %c0_10 = arith.constant 0 : index
    %c0_11 = arith.constant 0 : index
    %c0_12 = arith.constant 0 : index
    %c0_13 = arith.constant 0 : index
    %12 = vector.load %arg7[%c0_10, %c0_11, %c0_12, %c0_13] : memref<1x1x32x1xf32, #tpu.memory_space<vmem>>, vector<1x1x32x1xf32>
    %13 = vector.shape_cast %12 : vector<1x1x32x1xf32> to vector<32x1xf32>
    %14 = vector.shape_cast %11 : vector<32x1xf32> to vector<1x1x32x1xf32>
    tpu.vector_store %arg7[%c0_10, %c0_11, %c0_12, %c0_13], %14 {strides = array<i32>} : memref<1x1x32x1xf32, #tpu.memory_space<vmem>>, vector<1x1x32x1xf32>,
    %c0_14 = arith.constant 0 : index
    %c0_15 = arith.constant 0 : index
    %15 = vector.load %arg4[%c0_14, %c0_15] : memref<32x1xf32, #tpu.memory_space<vmem>>, vector<32x1xf32>
    %16 = vector.broadcast %15 : vector<32x1xf32> to vector<32x128xf32>
    %17 = arith.addf %3, %16 : vector<32x128xf32>
    %18 = arith.truncf %17 : vector<32x128xf32> to vector<32x128xbf16>
    %c0_16 = arith.constant 0 : index
    %c0_17 = arith.constant 0 : index
    %c0_18 = arith.constant 0 : index
    %19 = vector.load %arg5[%c0_16, %c0_17, %c0_18] : memref<1x32x128xbf16, #tpu.memory_space<vmem>>, vector<1x32x128xbf16>
    %20 = vector.shape_cast %19 : vector<1x32x128xbf16> to vector<32x128xbf16>
    %21 = vector.shape_cast %18 : vector<32x128xbf16> to vector<1x32x128xbf16>
    tpu.vector_store %arg5[%c0_16, %c0_17, %c0_18], %21 {strides = array<i32>} : memref<1x32x128xbf16, #tpu.memory_space<vmem>>, vector<1x32x128xbf16>,
    return
  }
  func.func @transform_0(%arg0: i32, %arg1: i32) -> (i32, i32) {
    %c0_i32 = arith.constant 0 : i32
    %c0_i32_0 = arith.constant 0 : i32
    %c0_i32_1 = arith.constant 0 : i32
    return %c0_i32, %c0_i32_0 : i32, i32
  }
  func.func @transform_1(%arg0: i32, %arg1: i32) -> (i32, i32, i32) {
    %c0_i32 = arith.constant 0 : i32
    %c0_i32_0 = arith.constant 0 : i32
    return %arg0, %c0_i32, %arg1 : i32, i32, i32
  }
  func.func @transform_2(%arg0: i32, %arg1: i32) -> (i32, i32) {
    %c0_i32 = arith.constant 0 : i32
    %c0_i32_0 = arith.constant 0 : i32
    %c0_i32_1 = arith.constant 0 : i32
    return %c0_i32, %c0_i32_0 : i32, i32
  }
  func.func @transform_3(%arg0: i32, %arg1: i32) -> (i32, i32, i32) {
    %c0_i32 = arith.constant 0 : i32
    %c0_i32_0 = arith.constant 0 : i32
    return %arg0, %c0_i32, %arg1 : i32, i32, i32
  }
  func.func @transform_4(%arg0: i32, %arg1: i32) -> (i32, i32, i32, i32) {
    %c0_i32 = arith.constant 0 : i32
    %c0_i32_0 = arith.constant 0 : i32
    %c0_i32_1 = arith.constant 0 : i32
    return %arg0, %arg1, %c0_i32, %c0_i32_0 : i32, i32, i32, i32
  }
  func.func @transform_5(%arg0: i32, %arg1: i32) -> (i32, i32, i32, i32) {
    %c0_i32 = arith.constant 0 : i32
    %c0_i32_0 = arith.constant 0 : i32
    %c0_i32_1 = arith.constant 0 : i32
    return %arg0, %arg1, %c0_i32, %c0_i32_0 : i32, i32, i32, i32
  }
}

module attributes {stable_mosaic.version = 11 : i64} {
  func.func @kernel(%arg0: i32, %arg1: i32, %arg2: memref<64x128xbf16, #tpu.memory_space<vmem>>, %arg3: memref<64x1xf32, #tpu.memory_space<vmem>>, %arg4: memref<64x1xf32, #tpu.memory_space<vmem>>, %arg5: memref<64x128xbf16, #tpu.memory_space<vmem>>) attributes {dimension_semantics = [#tpu.dimension_semantics<parallel>, #tpu.dimension_semantics<parallel>], iteration_bounds = array<i64: 1, 1>, scalar_prefetch = 0 : i64, scratch_operands = 0 : i64, tpu.core_type = #tpu.core_type<tc>, window_params = [{transform_indices = @transform_0, window_bounds = array<i64: 64, 128>}, {transform_indices = @transform_1, window_bounds = array<i64: 64, 1>}, {transform_indices = @transform_2, window_bounds = array<i64: 64, 1>}, {transform_indices = @transform_3, window_bounds = array<i64: 64, 128>}]} {
    %c0 = arith.constant 0 : index
    %c0_0 = arith.constant 0 : index
    %0 = vector.load %arg2[%c0, %c0_0] : memref<64x128xbf16, #tpu.memory_space<vmem>>, vector<64x128xbf16>
    %1 = arith.extf %0 : vector<64x128xbf16> to vector<64x128xf32>
    %c0_1 = arith.constant 0 : index
    %c0_2 = arith.constant 0 : index
    %2 = vector.load %arg3[%c0_1, %c0_2] : memref<64x1xf32, #tpu.memory_space<vmem>>, vector<64x1xf32>
    %3 = vector.broadcast %2 : vector<64x1xf32> to vector<64x128xf32>
    %4 = arith.subf %1, %3 : vector<64x128xf32>
    %c0_3 = arith.constant 0 : index
    %c0_4 = arith.constant 0 : index
    %5 = vector.load %arg4[%c0_3, %c0_4] : memref<64x1xf32, #tpu.memory_space<vmem>>, vector<64x1xf32>
    %6 = vector.broadcast %5 : vector<64x1xf32> to vector<64x128xf32>
    %7 = arith.mulf %4, %6 : vector<64x128xf32>
    %cst = arith.constant 0.000000e+00 : f32
    %8 = vector.broadcast %cst : f32 to vector<64x128xf32>
    %9 = arith.maximumf %7, %8 : vector<64x128xf32>
    %10 = arith.truncf %9 : vector<64x128xf32> to vector<64x128xbf16>
    %c0_5 = arith.constant 0 : index
    %c0_6 = arith.constant 0 : index
    %11 = vector.load %arg5[%c0_5, %c0_6] : memref<64x128xbf16, #tpu.memory_space<vmem>>, vector<64x128xbf16>
    tpu.vector_store %arg5[%c0_5, %c0_6], %10 {strides = array<i32>} : memref<64x128xbf16, #tpu.memory_space<vmem>>, vector<64x128xbf16>,
    return
  }
  func.func @transform_0(%arg0: i32, %arg1: i32) -> (i32, i32) {
    %c0_i32 = arith.constant 0 : i32
    return %arg0, %arg1 : i32, i32
  }
  func.func @transform_1(%arg0: i32, %arg1: i32) -> (i32, i32) {
    %c0_i32 = arith.constant 0 : i32
    %c0_i32_0 = arith.constant 0 : i32
    return %arg0, %c0_i32 : i32, i32
  }
  func.func @transform_2(%arg0: i32, %arg1: i32) -> (i32, i32) {
    %c0_i32 = arith.constant 0 : i32
    %c0_i32_0 = arith.constant 0 : i32
    return %arg0, %c0_i32 : i32, i32
  }
  func.func @transform_3(%arg0: i32, %arg1: i32) -> (i32, i32) {
    %c0_i32 = arith.constant 0 : i32
    return %arg0, %arg1 : i32, i32
  }
}

module attributes {stable_mosaic.version = 11 : i64} {
  func.func @_conv_in_stats_kernel(%arg0: i32, %arg1: i32, %arg2: memref<32x288xbf16, #tpu.memory_space<vmem>>, %arg3: memref<1x288x128xbf16, #tpu.memory_space<vmem>>, %arg4: memref<32x1xf32, #tpu.memory_space<vmem>>, %arg5: memref<1x32x128xbf16, #tpu.memory_space<vmem>>, %arg6: memref<1x1x32x1xf32, #tpu.memory_space<vmem>>, %arg7: memref<1x1x32x1xf32, #tpu.memory_space<vmem>>) attributes {dimension_semantics = [#tpu.dimension_semantics<parallel>, #tpu.dimension_semantics<parallel>], iteration_bounds = array<i64: 2, 1>, scalar_prefetch = 0 : i64, scratch_operands = 0 : i64, tpu.core_type = #tpu.core_type<tc>, window_params = [{pipeline_mode = #tpu.pipeline_mode<synchronous>, transform_indices = @transform_0, window_bounds = array<i64: 32, 288>}, {transform_indices = @transform_1, window_bounds = array<i64: 1, 288, 128>}, {pipeline_mode = #tpu.pipeline_mode<synchronous>, transform_indices = @transform_2, window_bounds = array<i64: 32, 1>}, {transform_indices = @transform_3, window_bounds = array<i64: 1, 32, 128>}, {transform_indices = @transform_4, window_bounds = array<i64: 1, 1, 32, 1>}, {transform_indices = @transform_5, window_bounds = array<i64: 1, 1, 32, 1>}]} {
    %c0 = arith.constant 0 : index
    %c0_0 = arith.constant 0 : index
    %0 = vector.load %arg2[%c0, %c0_0] : memref<32x288xbf16, #tpu.memory_space<vmem>>, vector<32x288xbf16>
    %c0_1 = arith.constant 0 : index
    %c0_2 = arith.constant 0 : index
    %c0_3 = arith.constant 0 : index
    %1 = vector.load %arg3[%c0_1, %c0_2, %c0_3] : memref<1x288x128xbf16, #tpu.memory_space<vmem>>, vector<1x288x128xbf16>
    %2 = vector.shape_cast %1 : vector<1x288x128xbf16> to vector<288x128xbf16>
    %cst = arith.constant dense<0.000000e+00> : vector<32x128xf32>
    %3 = tpu.matmul %0, %2, %cst {dimension_numbers = #tpu.dot_dimension_numbers<[1], [0], [0], [1], [0, 0, 1, 1], [], []>} : vector<32x288xbf16>, vector<288x128xbf16>, vector<32x128xf32> -> vector<32x128xf32>
    %cst_4 = arith.constant dense<0.000000e+00> : vector<32xf32>
    %4 = vector.multi_reduction <add>, %3, %cst_4 [1] : vector<32x128xf32> to vector<32xf32>
    %5 = vector.shape_cast %4 : vector<32xf32> to vector<32x1xf32>
    %c0_5 = arith.constant 0 : index
    %c0_6 = arith.constant 0 : index
    %c0_7 = arith.constant 0 : index
    %c0_8 = arith.constant 0 : index
    %6 = vector.load %arg6[%c0_5, %c0_6, %c0_7, %c0_8] : memref<1x1x32x1xf32, #tpu.memory_space<vmem>>, vector<1x1x32x1xf32>
    %7 = vector.shape_cast %6 : vector<1x1x32x1xf32> to vector<32x1xf32>
    %8 = vector.shape_cast %5 : vector<32x1xf32> to vector<1x1x32x1xf32>
    tpu.vector_store %arg6[%c0_5, %c0_6, %c0_7, %c0_8], %8 {strides = array<i32>} : memref<1x1x32x1xf32, #tpu.memory_space<vmem>>, vector<1x1x32x1xf32>,
    %9 = arith.mulf %3, %3 : vector<32x128xf32>
    %cst_9 = arith.constant dense<0.000000e+00> : vector<32xf32>
    %10 = vector.multi_reduction <add>, %9, %cst_9 [1] : vector<32x128xf32> to vector<32xf32>
    %11 = vector.shape_cast %10 : vector<32xf32> to vector<32x1xf32>
    %c0_10 = arith.constant 0 : index
    %c0_11 = arith.constant 0 : index
    %c0_12 = arith.constant 0 : index
    %c0_13 = arith.constant 0 : index
    %12 = vector.load %arg7[%c0_10, %c0_11, %c0_12, %c0_13] : memref<1x1x32x1xf32, #tpu.memory_space<vmem>>, vector<1x1x32x1xf32>
    %13 = vector.shape_cast %12 : vector<1x1x32x1xf32> to vector<32x1xf32>
    %14 = vector.shape_cast %11 : vector<32x1xf32> to vector<1x1x32x1xf32>
    tpu.vector_store %arg7[%c0_10, %c0_11, %c0_12, %c0_13], %14 {strides = array<i32>} : memref<1x1x32x1xf32, #tpu.memory_space<vmem>>, vector<1x1x32x1xf32>,
    %c0_14 = arith.constant 0 : index
    %c0_15 = arith.constant 0 : index
    %15 = vector.load %arg4[%c0_14, %c0_15] : memref<32x1xf32, #tpu.memory_space<vmem>>, vector<32x1xf32>
    %16 = vector.broadcast %15 : vector<32x1xf32> to vector<32x128xf32>
    %17 = arith.addf %3, %16 : vector<32x128xf32>
    %18 = arith.truncf %17 : vector<32x128xf32> to vector<32x128xbf16>
    %c0_16 = arith.constant 0 : index
    %c0_17 = arith.constant 0 : index
    %c0_18 = arith.constant 0 : index
    %19 = vector.load %arg5[%c0_16, %c0_17, %c0_18] : memref<1x32x128xbf16, #tpu.memory_space<vmem>>, vector<1x32x128xbf16>
    %20 = vector.shape_cast %19 : vector<1x32x128xbf16> to vector<32x128xbf16>
    %21 = vector.shape_cast %18 : vector<32x128xbf16> to vector<1x32x128xbf16>
    tpu.vector_store %arg5[%c0_16, %c0_17, %c0_18], %21 {strides = array<i32>} : memref<1x32x128xbf16, #tpu.memory_space<vmem>>, vector<1x32x128xbf16>,
    return
  }
  func.func @transform_0(%arg0: i32, %arg1: i32) -> (i32, i32) {
    %c0_i32 = arith.constant 0 : i32
    %c0_i32_0 = arith.constant 0 : i32
    %c0_i32_1 = arith.constant 0 : i32
    return %c0_i32, %c0_i32_0 : i32, i32
  }
  func.func @transform_1(%arg0: i32, %arg1: i32) -> (i32, i32, i32) {
    %c0_i32 = arith.constant 0 : i32
    %c0_i32_0 = arith.constant 0 : i32
    return %arg0, %c0_i32, %arg1 : i32, i32, i32
  }
  func.func @transform_2(%arg0: i32, %arg1: i32) -> (i32, i32) {
    %c0_i32 = arith.constant 0 : i32
    %c0_i32_0 = arith.constant 0 : i32
    %c0_i32_1 = arith.constant 0 : i32
    return %c0_i32, %c0_i32_0 : i32, i32
  }
  func.func @transform_3(%arg0: i32, %arg1: i32) -> (i32, i32, i32) {
    %c0_i32 = arith.constant 0 : i32
    %c0_i32_0 = arith.constant 0 : i32
    return %arg0, %c0_i32, %arg1 : i32, i32, i32
  }
  func.func @transform_4(%arg0: i32, %arg1: i32) -> (i32, i32, i32, i32) {
    %c0_i32 = arith.constant 0 : i32
    %c0_i32_0 = arith.constant 0 : i32
    %c0_i32_1 = arith.constant 0 : i32
    return %arg0, %arg1, %c0_i32, %c0_i32_0 : i32, i32, i32, i32
  }
  func.func @transform_5(%arg0: i32, %arg1: i32) -> (i32, i32, i32, i32) {
    %c0_i32 = arith.constant 0 : i32
    %c0_i32_0 = arith.constant 0 : i32
    %c0_i32_1 = arith.constant 0 : i32
    return %arg0, %arg1, %c0_i32, %c0_i32_0 : i32, i32, i32, i32
  }
}

module attributes {stable_mosaic.version = 11 : i64} {
  func.func @kernel(%arg0: i32, %arg1: i32, %arg2: memref<64x128xbf16, #tpu.memory_space<vmem>>, %arg3: memref<64x1xf32, #tpu.memory_space<vmem>>, %arg4: memref<64x1xf32, #tpu.memory_space<vmem>>, %arg5: memref<64x128xbf16, #tpu.memory_space<vmem>>, %arg6: memref<64x128xbf16, #tpu.memory_space<vmem>>) attributes {dimension_semantics = [#tpu.dimension_semantics<parallel>, #tpu.dimension_semantics<parallel>], iteration_bounds = array<i64: 1, 1>, scalar_prefetch = 0 : i64, scratch_operands = 0 : i64, tpu.core_type = #tpu.core_type<tc>, window_params = [{transform_indices = @transform_0, window_bounds = array<i64: 64, 128>}, {transform_indices = @transform_1, window_bounds = array<i64: 64, 1>}, {transform_indices = @transform_2, window_bounds = array<i64: 64, 1>}, {transform_indices = @transform_3, window_bounds = array<i64: 64, 128>}, {transform_indices = @transform_4, window_bounds = array<i64: 64, 128>}]} {
    %c0 = arith.constant 0 : index
    %c0_0 = arith.constant 0 : index
    %0 = vector.load %arg2[%c0, %c0_0] : memref<64x128xbf16, #tpu.memory_space<vmem>>, vector<64x128xbf16>
    %1 = arith.extf %0 : vector<64x128xbf16> to vector<64x128xf32>
    %c0_1 = arith.constant 0 : index
    %c0_2 = arith.constant 0 : index
    %2 = vector.load %arg3[%c0_1, %c0_2] : memref<64x1xf32, #tpu.memory_space<vmem>>, vector<64x1xf32>
    %3 = vector.broadcast %2 : vector<64x1xf32> to vector<64x128xf32>
    %4 = arith.subf %1, %3 : vector<64x128xf32>
    %c0_3 = arith.constant 0 : index
    %c0_4 = arith.constant 0 : index
    %5 = vector.load %arg4[%c0_3, %c0_4] : memref<64x1xf32, #tpu.memory_space<vmem>>, vector<64x1xf32>
    %6 = vector.broadcast %5 : vector<64x1xf32> to vector<64x128xf32>
    %7 = arith.mulf %4, %6 : vector<64x128xf32>
    %c0_5 = arith.constant 0 : index
    %c0_6 = arith.constant 0 : index
    %8 = vector.load %arg5[%c0_5, %c0_6] : memref<64x128xbf16, #tpu.memory_space<vmem>>, vector<64x128xbf16>
    %9 = arith.extf %8 : vector<64x128xbf16> to vector<64x128xf32>
    %10 = arith.addf %7, %9 : vector<64x128xf32>
    %11 = arith.truncf %10 : vector<64x128xf32> to vector<64x128xbf16>
    %c0_7 = arith.constant 0 : index
    %c0_8 = arith.constant 0 : index
    %12 = vector.load %arg6[%c0_7, %c0_8] : memref<64x128xbf16, #tpu.memory_space<vmem>>, vector<64x128xbf16>
    tpu.vector_store %arg6[%c0_7, %c0_8], %11 {strides = array<i32>} : memref<64x128xbf16, #tpu.memory_space<vmem>>, vector<64x128xbf16>,
    return
  }
  func.func @transform_0(%arg0: i32, %arg1: i32) -> (i32, i32) {
    %c0_i32 = arith.constant 0 : i32
    return %arg0, %arg1 : i32, i32
  }
  func.func @transform_1(%arg0: i32, %arg1: i32) -> (i32, i32) {
    %c0_i32 = arith.constant 0 : i32
    %c0_i32_0 = arith.constant 0 : i32
    return %arg0, %c0_i32 : i32, i32
  }
  func.func @transform_2(%arg0: i32, %arg1: i32) -> (i32, i32) {
    %c0_i32 = arith.constant 0 : i32
    %c0_i32_0 = arith.constant 0 : i32
    return %arg0, %c0_i32 : i32, i32
  }
  func.func @transform_3(%arg0: i32, %arg1: i32) -> (i32, i32) {
    %c0_i32 = arith.constant 0 : i32
    return %arg0, %arg1 : i32, i32
  }
  func.func @transform_4(%arg0: i32, %arg1: i32) -> (i32, i32) {
    %c0_i32 = arith.constant 0 : i32
    return %arg0, %arg1 : i32, i32
  }
}

module attributes {stable_mosaic.version = 11 : i64} {
  func.func @_conv_in_stats_kernel(%arg0: i32, %arg1: i32, %arg2: memref<16x288xbf16, #tpu.memory_space<vmem>>, %arg3: memref<1x288x128xbf16, #tpu.memory_space<vmem>>, %arg4: memref<16x1xf32, #tpu.memory_space<vmem>>, %arg5: memref<1x16x128xbf16, #tpu.memory_space<vmem>>, %arg6: memref<1x1x16x1xf32, #tpu.memory_space<vmem>>, %arg7: memref<1x1x16x1xf32, #tpu.memory_space<vmem>>) attributes {dimension_semantics = [#tpu.dimension_semantics<parallel>, #tpu.dimension_semantics<parallel>], iteration_bounds = array<i64: 2, 1>, scalar_prefetch = 0 : i64, scratch_operands = 0 : i64, tpu.core_type = #tpu.core_type<tc>, window_params = [{pipeline_mode = #tpu.pipeline_mode<synchronous>, transform_indices = @transform_0, window_bounds = array<i64: 16, 288>}, {transform_indices = @transform_1, window_bounds = array<i64: 1, 288, 128>}, {pipeline_mode = #tpu.pipeline_mode<synchronous>, transform_indices = @transform_2, window_bounds = array<i64: 16, 1>}, {transform_indices = @transform_3, window_bounds = array<i64: 1, 16, 128>}, {transform_indices = @transform_4, window_bounds = array<i64: 1, 1, 16, 1>}, {transform_indices = @transform_5, window_bounds = array<i64: 1, 1, 16, 1>}]} {
    %c0 = arith.constant 0 : index
    %c0_0 = arith.constant 0 : index
    %0 = vector.load %arg2[%c0, %c0_0] : memref<16x288xbf16, #tpu.memory_space<vmem>>, vector<16x288xbf16>
    %c0_1 = arith.constant 0 : index
    %c0_2 = arith.constant 0 : index
    %c0_3 = arith.constant 0 : index
    %1 = vector.load %arg3[%c0_1, %c0_2, %c0_3] : memref<1x288x128xbf16, #tpu.memory_space<vmem>>, vector<1x288x128xbf16>
    %2 = vector.shape_cast %1 : vector<1x288x128xbf16> to vector<288x128xbf16>
    %cst = arith.constant dense<0.000000e+00> : vector<16x128xf32>
    %3 = tpu.matmul %0, %2, %cst {dimension_numbers = #tpu.dot_dimension_numbers<[1], [0], [0], [1], [0, 0, 1, 1], [], []>} : vector<16x288xbf16>, vector<288x128xbf16>, vector<16x128xf32> -> vector<16x128xf32>
    %cst_4 = arith.constant dense<0.000000e+00> : vector<16xf32>
    %4 = vector.multi_reduction <add>, %3, %cst_4 [1] : vector<16x128xf32> to vector<16xf32>
    %5 = vector.shape_cast %4 : vector<16xf32> to vector<16x1xf32>
    %c0_5 = arith.constant 0 : index
    %c0_6 = arith.constant 0 : index
    %c0_7 = arith.constant 0 : index
    %c0_8 = arith.constant 0 : index
    %6 = vector.load %arg6[%c0_5, %c0_6, %c0_7, %c0_8] : memref<1x1x16x1xf32, #tpu.memory_space<vmem>>, vector<1x1x16x1xf32>
    %7 = vector.shape_cast %6 : vector<1x1x16x1xf32> to vector<16x1xf32>
    %8 = vector.shape_cast %5 : vector<16x1xf32> to vector<1x1x16x1xf32>
    tpu.vector_store %arg6[%c0_5, %c0_6, %c0_7, %c0_8], %8 {strides = array<i32>} : memref<1x1x16x1xf32, #tpu.memory_space<vmem>>, vector<1x1x16x1xf32>,
    %9 = arith.mulf %3, %3 : vector<16x128xf32>
    %cst_9 = arith.constant dense<0.000000e+00> : vector<16xf32>
    %10 = vector.multi_reduction <add>, %9, %cst_9 [1] : vector<16x128xf32> to vector<16xf32>
    %11 = vector.shape_cast %10 : vector<16xf32> to vector<16x1xf32>
    %c0_10 = arith.constant 0 : index
    %c0_11 = arith.constant 0 : index
    %c0_12 = arith.constant 0 : index
    %c0_13 = arith.constant 0 : index
    %12 = vector.load %arg7[%c0_10, %c0_11, %c0_12, %c0_13] : memref<1x1x16x1xf32, #tpu.memory_space<vmem>>, vector<1x1x16x1xf32>
    %13 = vector.shape_cast %12 : vector<1x1x16x1xf32> to vector<16x1xf32>
    %14 = vector.shape_cast %11 : vector<16x1xf32> to vector<1x1x16x1xf32>
    tpu.vector_store %arg7[%c0_10, %c0_11, %c0_12, %c0_13], %14 {strides = array<i32>} : memref<1x1x16x1xf32, #tpu.memory_space<vmem>>, vector<1x1x16x1xf32>,
    %c0_14 = arith.constant 0 : index
    %c0_15 = arith.constant 0 : index
    %15 = vector.load %arg4[%c0_14, %c0_15] : memref<16x1xf32, #tpu.memory_space<vmem>>, vector<16x1xf32>
    %16 = vector.broadcast %15 : vector<16x1xf32> to vector<16x128xf32>
    %17 = arith.addf %3, %16 : vector<16x128xf32>
    %18 = arith.truncf %17 : vector<16x128xf32> to vector<16x128xbf16>
    %c0_16 = arith.constant 0 : index
    %c0_17 = arith.constant 0 : index
    %c0_18 = arith.constant 0 : index
    %19 = vector.load %arg5[%c0_16, %c0_17, %c0_18] : memref<1x16x128xbf16, #tpu.memory_space<vmem>>, vector<1x16x128xbf16>
    %20 = vector.shape_cast %19 : vector<1x16x128xbf16> to vector<16x128xbf16>
    %21 = vector.shape_cast %18 : vector<16x128xbf16> to vector<1x16x128xbf16>
    tpu.vector_store %arg5[%c0_16, %c0_17, %c0_18], %21 {strides = array<i32>} : memref<1x16x128xbf16, #tpu.memory_space<vmem>>, vector<1x16x128xbf16>,
    return
  }
  func.func @transform_0(%arg0: i32, %arg1: i32) -> (i32, i32) {
    %c0_i32 = arith.constant 0 : i32
    %c0_i32_0 = arith.constant 0 : i32
    %c0_i32_1 = arith.constant 0 : i32
    return %c0_i32, %c0_i32_0 : i32, i32
  }
  func.func @transform_1(%arg0: i32, %arg1: i32) -> (i32, i32, i32) {
    %c0_i32 = arith.constant 0 : i32
    %c0_i32_0 = arith.constant 0 : i32
    return %arg0, %c0_i32, %arg1 : i32, i32, i32
  }
  func.func @transform_2(%arg0: i32, %arg1: i32) -> (i32, i32) {
    %c0_i32 = arith.constant 0 : i32
    %c0_i32_0 = arith.constant 0 : i32
    %c0_i32_1 = arith.constant 0 : i32
    return %c0_i32, %c0_i32_0 : i32, i32
  }
  func.func @transform_3(%arg0: i32, %arg1: i32) -> (i32, i32, i32) {
    %c0_i32 = arith.constant 0 : i32
    %c0_i32_0 = arith.constant 0 : i32
    return %arg0, %c0_i32, %arg1 : i32, i32, i32
  }
  func.func @transform_4(%arg0: i32, %arg1: i32) -> (i32, i32, i32, i32) {
    %c0_i32 = arith.constant 0 : i32
    %c0_i32_0 = arith.constant 0 : i32
    %c0_i32_1 = arith.constant 0 : i32
    return %arg0, %arg1, %c0_i32, %c0_i32_0 : i32, i32, i32, i32
  }
  func.func @transform_5(%arg0: i32, %arg1: i32) -> (i32, i32, i32, i32) {
    %c0_i32 = arith.constant 0 : i32
    %c0_i32_0 = arith.constant 0 : i32
    %c0_i32_1 = arith.constant 0 : i32
    return %arg0, %arg1, %c0_i32, %c0_i32_0 : i32, i32, i32, i32
  }
}

module attributes {stable_mosaic.version = 11 : i64} {
  func.func @_conv_in_stats_kernel(%arg0: i32, %arg1: i32, %arg2: memref<8x144xbf16, #tpu.memory_space<vmem>>, %arg3: memref<1x144x256xbf16, #tpu.memory_space<vmem>>, %arg4: memref<8x1xf32, #tpu.memory_space<vmem>>, %arg5: memref<1x8x256xbf16, #tpu.memory_space<vmem>>, %arg6: memref<1x1x8x1xf32, #tpu.memory_space<vmem>>, %arg7: memref<1x1x8x1xf32, #tpu.memory_space<vmem>>) attributes {dimension_semantics = [#tpu.dimension_semantics<parallel>, #tpu.dimension_semantics<parallel>], iteration_bounds = array<i64: 2, 1>, scalar_prefetch = 0 : i64, scratch_operands = 0 : i64, tpu.core_type = #tpu.core_type<tc>, window_params = [{pipeline_mode = #tpu.pipeline_mode<synchronous>, transform_indices = @transform_0, window_bounds = array<i64: 8, 144>}, {transform_indices = @transform_1, window_bounds = array<i64: 1, 144, 256>}, {pipeline_mode = #tpu.pipeline_mode<synchronous>, transform_indices = @transform_2, window_bounds = array<i64: 8, 1>}, {transform_indices = @transform_3, window_bounds = array<i64: 1, 8, 256>}, {transform_indices = @transform_4, window_bounds = array<i64: 1, 1, 8, 1>}, {transform_indices = @transform_5, window_bounds = array<i64: 1, 1, 8, 1>}]} {
    %c0 = arith.constant 0 : index
    %c0_0 = arith.constant 0 : index
    %0 = vector.load %arg2[%c0, %c0_0] : memref<8x144xbf16, #tpu.memory_space<vmem>>, vector<8x144xbf16>
    %c0_1 = arith.constant 0 : index
    %c0_2 = arith.constant 0 : index
    %c0_3 = arith.constant 0 : index
    %1 = vector.load %arg3[%c0_1, %c0_2, %c0_3] : memref<1x144x256xbf16, #tpu.memory_space<vmem>>, vector<1x144x256xbf16>
    %2 = vector.shape_cast %1 : vector<1x144x256xbf16> to vector<144x256xbf16>
    %cst = arith.constant dense<0.000000e+00> : vector<8x256xf32>
    %3 = tpu.matmul %0, %2, %cst {dimension_numbers = #tpu.dot_dimension_numbers<[1], [0], [0], [1], [0, 0, 1, 1], [], []>} : vector<8x144xbf16>, vector<144x256xbf16>, vector<8x256xf32> -> vector<8x256xf32>
    %cst_4 = arith.constant dense<0.000000e+00> : vector<8xf32>
    %4 = vector.multi_reduction <add>, %3, %cst_4 [1] : vector<8x256xf32> to vector<8xf32>
    %5 = vector.shape_cast %4 : vector<8xf32> to vector<8x1xf32>
    %c0_5 = arith.constant 0 : index
    %c0_6 = arith.constant 0 : index
    %c0_7 = arith.constant 0 : index
    %c0_8 = arith.constant 0 : index
    %6 = vector.load %arg6[%c0_5, %c0_6, %c0_7, %c0_8] : memref<1x1x8x1xf32, #tpu.memory_space<vmem>>, vector<1x1x8x1xf32>
    %7 = vector.shape_cast %6 : vector<1x1x8x1xf32> to vector<8x1xf32>
    %8 = vector.shape_cast %5 : vector<8x1xf32> to vector<1x1x8x1xf32>
    tpu.vector_store %arg6[%c0_5, %c0_6, %c0_7, %c0_8], %8 {strides = array<i32>} : memref<1x1x8x1xf32, #tpu.memory_space<vmem>>, vector<1x1x8x1xf32>,
    %9 = arith.mulf %3, %3 : vector<8x256xf32>
    %cst_9 = arith.constant dense<0.000000e+00> : vector<8xf32>
    %10 = vector.multi_reduction <add>, %9, %cst_9 [1] : vector<8x256xf32> to vector<8xf32>
    %11 = vector.shape_cast %10 : vector<8xf32> to vector<8x1xf32>
    %c0_10 = arith.constant 0 : index
    %c0_11 = arith.constant 0 : index
    %c0_12 = arith.constant 0 : index
    %c0_13 = arith.constant 0 : index
    %12 = vector.load %arg7[%c0_10, %c0_11, %c0_12, %c0_13] : memref<1x1x8x1xf32, #tpu.memory_space<vmem>>, vector<1x1x8x1xf32>
    %13 = vector.shape_cast %12 : vector<1x1x8x1xf32> to vector<8x1xf32>
    %14 = vector.shape_cast %11 : vector<8x1xf32> to vector<1x1x8x1xf32>
    tpu.vector_store %arg7[%c0_10, %c0_11, %c0_12, %c0_13], %14 {strides = array<i32>} : memref<1x1x8x1xf32, #tpu.memory_space<vmem>>, vector<1x1x8x1xf32>,
    %c0_14 = arith.constant 0 : index
    %c0_15 = arith.constant 0 : index
    %15 = vector.load %arg4[%c0_14, %c0_15] : memref<8x1xf32, #tpu.memory_space<vmem>>, vector<8x1xf32>
    %16 = vector.broadcast %15 : vector<8x1xf32> to vector<8x256xf32>
    %17 = arith.addf %3, %16 : vector<8x256xf32>
    %18 = arith.truncf %17 : vector<8x256xf32> to vector<8x256xbf16>
    %c0_16 = arith.constant 0 : index
    %c0_17 = arith.constant 0 : index
    %c0_18 = arith.constant 0 : index
    %19 = vector.load %arg5[%c0_16, %c0_17, %c0_18] : memref<1x8x256xbf16, #tpu.memory_space<vmem>>, vector<1x8x256xbf16>
    %20 = vector.shape_cast %19 : vector<1x8x256xbf16> to vector<8x256xbf16>
    %21 = vector.shape_cast %18 : vector<8x256xbf16> to vector<1x8x256xbf16>
    tpu.vector_store %arg5[%c0_16, %c0_17, %c0_18], %21 {strides = array<i32>} : memref<1x8x256xbf16, #tpu.memory_space<vmem>>, vector<1x8x256xbf16>,
    return
  }
  func.func @transform_0(%arg0: i32, %arg1: i32) -> (i32, i32) {
    %c0_i32 = arith.constant 0 : i32
    %c0_i32_0 = arith.constant 0 : i32
    %c0_i32_1 = arith.constant 0 : i32
    return %c0_i32, %c0_i32_0 : i32, i32
  }
  func.func @transform_1(%arg0: i32, %arg1: i32) -> (i32, i32, i32) {
    %c0_i32 = arith.constant 0 : i32
    %c0_i32_0 = arith.constant 0 : i32
    return %arg0, %c0_i32, %arg1 : i32, i32, i32
  }
  func.func @transform_2(%arg0: i32, %arg1: i32) -> (i32, i32) {
    %c0_i32 = arith.constant 0 : i32
    %c0_i32_0 = arith.constant 0 : i32
    %c0_i32_1 = arith.constant 0 : i32
    return %c0_i32, %c0_i32_0 : i32, i32
  }
  func.func @transform_3(%arg0: i32, %arg1: i32) -> (i32, i32, i32) {
    %c0_i32 = arith.constant 0 : i32
    %c0_i32_0 = arith.constant 0 : i32
    return %arg0, %c0_i32, %arg1 : i32, i32, i32
  }
  func.func @transform_4(%arg0: i32, %arg1: i32) -> (i32, i32, i32, i32) {
    %c0_i32 = arith.constant 0 : i32
    %c0_i32_0 = arith.constant 0 : i32
    %c0_i32_1 = arith.constant 0 : i32
    return %arg0, %arg1, %c0_i32, %c0_i32_0 : i32, i32, i32, i32
  }
  func.func @transform_5(%arg0: i32, %arg1: i32) -> (i32, i32, i32, i32) {
    %c0_i32 = arith.constant 0 : i32
    %c0_i32_0 = arith.constant 0 : i32
    %c0_i32_1 = arith.constant 0 : i32
    return %arg0, %arg1, %c0_i32, %c0_i32_0 : i32, i32, i32, i32
  }
}

module attributes {stable_mosaic.version = 11 : i64} {
  func.func @_conv_in_stats_kernel(%arg0: i32, %arg1: i32, %arg2: memref<3x648xbf16, #tpu.memory_space<vmem>>, %arg3: memref<1x648x256xbf16, #tpu.memory_space<vmem>>, %arg4: memref<3x1xf32, #tpu.memory_space<vmem>>, %arg5: memref<1x3x256xf32, #tpu.memory_space<vmem>>, %arg6: memref<1x1x3x1xf32, #tpu.memory_space<vmem>>, %arg7: memref<1x1x3x1xf32, #tpu.memory_space<vmem>>) attributes {dimension_semantics = [#tpu.dimension_semantics<parallel>, #tpu.dimension_semantics<parallel>], iteration_bounds = array<i64: 2, 1>, scalar_prefetch = 0 : i64, scratch_operands = 0 : i64, tpu.core_type = #tpu.core_type<tc>, window_params = [{pipeline_mode = #tpu.pipeline_mode<synchronous>, transform_indices = @transform_0, window_bounds = array<i64: 3, 648>}, {transform_indices = @transform_1, window_bounds = array<i64: 1, 648, 256>}, {pipeline_mode = #tpu.pipeline_mode<synchronous>, transform_indices = @transform_2, window_bounds = array<i64: 3, 1>}, {transform_indices = @transform_3, window_bounds = array<i64: 1, 3, 256>}, {transform_indices = @transform_4, window_bounds = array<i64: 1, 1, 3, 1>}, {transform_indices = @transform_5, window_bounds = array<i64: 1, 1, 3, 1>}]} {
    %c0 = arith.constant 0 : index
    %c0_0 = arith.constant 0 : index
    %0 = vector.load %arg2[%c0, %c0_0] : memref<3x648xbf16, #tpu.memory_space<vmem>>, vector<3x648xbf16>
    %c0_1 = arith.constant 0 : index
    %c0_2 = arith.constant 0 : index
    %c0_3 = arith.constant 0 : index
    %1 = vector.load %arg3[%c0_1, %c0_2, %c0_3] : memref<1x648x256xbf16, #tpu.memory_space<vmem>>, vector<1x648x256xbf16>
    %2 = vector.shape_cast %1 : vector<1x648x256xbf16> to vector<648x256xbf16>
    %cst = arith.constant dense<0.000000e+00> : vector<3x256xf32>
    %3 = tpu.matmul %0, %2, %cst {dimension_numbers = #tpu.dot_dimension_numbers<[1], [0], [0], [1], [0, 0, 1, 1], [], []>} : vector<3x648xbf16>, vector<648x256xbf16>, vector<3x256xf32> -> vector<3x256xf32>
    %cst_4 = arith.constant dense<0.000000e+00> : vector<3xf32>
    %4 = vector.multi_reduction <add>, %3, %cst_4 [1] : vector<3x256xf32> to vector<3xf32>
    %5 = vector.shape_cast %4 : vector<3xf32> to vector<3x1xf32>
    %c0_5 = arith.constant 0 : index
    %c0_6 = arith.constant 0 : index
    %c0_7 = arith.constant 0 : index
    %c0_8 = arith.constant 0 : index
    %6 = vector.load %arg6[%c0_5, %c0_6, %c0_7, %c0_8] : memref<1x1x3x1xf32, #tpu.memory_space<vmem>>, vector<1x1x3x1xf32>
    %7 = vector.shape_cast %6 : vector<1x1x3x1xf32> to vector<3x1xf32>
    %8 = vector.shape_cast %5 : vector<3x1xf32> to vector<1x1x3x1xf32>
    tpu.vector_store %arg6[%c0_5, %c0_6, %c0_7, %c0_8], %8 {strides = array<i32>} : memref<1x1x3x1xf32, #tpu.memory_space<vmem>>, vector<1x1x3x1xf32>,
    %9 = arith.mulf %3, %3 : vector<3x256xf32>
    %cst_9 = arith.constant dense<0.000000e+00> : vector<3xf32>
    %10 = vector.multi_reduction <add>, %9, %cst_9 [1] : vector<3x256xf32> to vector<3xf32>
    %11 = vector.shape_cast %10 : vector<3xf32> to vector<3x1xf32>
    %c0_10 = arith.constant 0 : index
    %c0_11 = arith.constant 0 : index
    %c0_12 = arith.constant 0 : index
    %c0_13 = arith.constant 0 : index
    %12 = vector.load %arg7[%c0_10, %c0_11, %c0_12, %c0_13] : memref<1x1x3x1xf32, #tpu.memory_space<vmem>>, vector<1x1x3x1xf32>
    %13 = vector.shape_cast %12 : vector<1x1x3x1xf32> to vector<3x1xf32>
    %14 = vector.shape_cast %11 : vector<3x1xf32> to vector<1x1x3x1xf32>
    tpu.vector_store %arg7[%c0_10, %c0_11, %c0_12, %c0_13], %14 {strides = array<i32>} : memref<1x1x3x1xf32, #tpu.memory_space<vmem>>, vector<1x1x3x1xf32>,
    %c0_14 = arith.constant 0 : index
    %c0_15 = arith.constant 0 : index
    %15 = vector.load %arg4[%c0_14, %c0_15] : memref<3x1xf32, #tpu.memory_space<vmem>>, vector<3x1xf32>
    %16 = vector.broadcast %15 : vector<3x1xf32> to vector<3x256xf32>
    %17 = arith.addf %3, %16 : vector<3x256xf32>
    %c0_16 = arith.constant 0 : index
    %c0_17 = arith.constant 0 : index
    %c0_18 = arith.constant 0 : index
    %18 = vector.load %arg5[%c0_16, %c0_17, %c0_18] : memref<1x3x256xf32, #tpu.memory_space<vmem>>, vector<1x3x256xf32>
    %19 = vector.shape_cast %18 : vector<1x3x256xf32> to vector<3x256xf32>
    %20 = vector.shape_cast %17 : vector<3x256xf32> to vector<1x3x256xf32>
    tpu.vector_store %arg5[%c0_16, %c0_17, %c0_18], %20 {strides = array<i32>} : memref<1x3x256xf32, #tpu.memory_space<vmem>>, vector<1x3x256xf32>,
    return
  }
  func.func @transform_0(%arg0: i32, %arg1: i32) -> (i32, i32) {
    %c0_i32 = arith.constant 0 : i32
    %c0_i32_0 = arith.constant 0 : i32
    %c0_i32_1 = arith.constant 0 : i32
    return %c0_i32, %c0_i32_0 : i32, i32
  }
  func.func @transform_1(%arg0: i32, %arg1: i32) -> (i32, i32, i32) {
    %c0_i32 = arith.constant 0 : i32
    %c0_i32_0 = arith.constant 0 : i32
    return %arg0, %c0_i32, %arg1 : i32, i32, i32
  }
  func.func @transform_2(%arg0: i32, %arg1: i32) -> (i32, i32) {
    %c0_i32 = arith.constant 0 : i32
    %c0_i32_0 = arith.constant 0 : i32
    %c0_i32_1 = arith.constant 0 : i32
    return %c0_i32, %c0_i32_0 : i32, i32
  }
  func.func @transform_3(%arg0: i32, %arg1: i32) -> (i32, i32, i32) {
    %c0_i32 = arith.constant 0 : i32
    %c0_i32_0 = arith.constant 0 : i32
    return %arg0, %c0_i32, %arg1 : i32, i32, i32
  }
  func.func @transform_4(%arg0: i32, %arg1: i32) -> (i32, i32, i32, i32) {
    %c0_i32 = arith.constant 0 : i32
    %c0_i32_0 = arith.constant 0 : i32
    %c0_i32_1 = arith.constant 0 : i32
    return %arg0, %arg1, %c0_i32, %c0_i32_0 : i32, i32, i32, i32
  }
  func.func @transform_5(%arg0: i32, %arg1: i32) -> (i32, i32, i32, i32) {
    %c0_i32 = arith.constant 0 : i32
    %c0_i32_0 = arith.constant 0 : i32
    %c0_i32_1 = arith.constant 0 : i32
    return %arg0, %arg1, %c0_i32, %c0_i32_0 : i32, i32, i32, i32
  }
}

</mosaic_0001>

<bundles_post_ra>
// kernel: transform_net_forward.31
= control target key start
LH: loop header
LB: loop body
LE: loop exit
PB: predicated region body
PF: predicated region fallthrough
CT: control target
= control target key end

     0   :  { %s930_s18 = smov 0   ;;  %s932_s19 = smov 0   ;;  %s1018_s0 = inlined_call_operand.vmem [shape: bf16[8,243], index: 0, kind: input, shape index: {}]   ;;  %s1019_s1 = inlined_call_operand.vmem [shape: bf16[2,243,256], index: 1, kind: input, shape index: {}]   ;;  %s1020_s2 = inlined_call_operand.vmem [shape: f32[8,1], index: 2, kind: input, shape index: {}]   ;;  %s1021_s3 = inlined_call_operand.vmem [shape: bf16[2,8,256], index: 3, kind: output, shape index: {0}]   ;;  %s1022_s4 = inlined_call_operand.vmem [shape: f32[2,1,8,1], index: 4, kind: output, shape index: {1}]   ;;  %s1023_s5 = inlined_call_operand.vmem [shape: f32[2,1,8,1], index: 5, kind: output, shape index: {2}]  }
   0x1   :  { %s934_s20 = smov 0  }
   0x2 LB: > { %s28_s21 = sadd.s32 1, %s892_s19  ;;  %p750_p0 = scmp.ge.s32.totalorder %s896_s20, 1  ;;  %s896_s20 = sphi %s934_s20, %s16_s20   ;;  %s892_s19 = sphi %s932_s19, %s1025_s19   ;;  %s888_s18 = sphi %s930_s18, %s1024_s18  }
   0x3   : > { %p30_p1 = scmp.ge.s32.totalorder %s28_s21, 2  ;;  %p217_p2 = scmp.lt.s32.totalorder %s896_s20, 3 }
   0x5   : > { %s1027_s21 = smov (%p30_p1, %s28_s21), 0  ;;  %p218_p3 = pnand %p750_p0, %p217_p2 }
   0x6   : > { %p268_p4 = scmp.lt.s32.totalorder (!%p218_p3), %s888_s18, 1 }
   0x7   : > { %221 = sbr.rel (%p218_p3) target bundleno = 421 (0x1a5), region = 32 }
   0xc   : > { %v951_v0 = vld [vmem:[%s1018_s0] sm:$0xff]  ;;  %vm494_vm0 = vcmask 941056   ;;  %s1029_s18 = smov (!%p268_p4, %s888_s18), 1  ;;  %v898_v3 = vmov 0   ;;  %vm498_vm1 = vcmask 1040384   ;;  %vm499_vm2 = vcmask 1041408  }
   0xd   : > { %v757_v1 = vcombine.high %v951_v0, %v951_v0  ;;  %v560_v2 = vld [vmem:[%s1020_s2] sm:$0xff]  ;;  %823 = vset.pattern.permute.xlu1 %v898_v3  ;;  %824 = vset.pattern.permute.xlu0 %v898_v3  ;;  %s796_s26 = smul.u32 248, %s1029_s18  ;;  %v899_v18 = vmov 65535   ;;  %v756_v42 = vcombine.low %v951_v0, %v951_v0  ;;  %s794_s30 = sshll.u32 %s1029_s18, 3  ;;  %vm552_vm3 = vcmask 7168  }
   0xe   : > { %563 = vperm.xlu1 %823, %v560_v2   ;;  %v500_v19 = vsel %vm498_vm1, 4294967295, %v899_v18  ;;  %s285_s8 = scalar_lea.vmem %s1021_s3, %s794_s30  ;;  %s293_s11 = scalar_lea.vmem %s1022_s4, %s794_s30 }
   0xf   : > { %790 = vmatprep.mubr.msk.bf16.mxu0 %vm494_vm0, %v757_v1  ;;  %s964_s29 = scalar_lea.vmem %s1019_s1, %s796_s26  ;;  %v501_v23 = vsel %vm499_vm2, %v500_v19, 0  ;;  %s300_s14 = scalar_lea.vmem %s1023_s5, %s794_s30 }
  0x10   : > { %v825_v4 = vld [vmem:[%s964_s29 + $0x74] ss:$8 sps:$4 sm:$0xff]   ;;  %v827_v5 = vld [vmem:[%s964_s29 + $0x70] ss:$8 sps:$4 sm:$0xff]   ;;  %v828_v6 = vld [vmem:[%s964_s29 + $0x64] ss:$8 sps:$4 sm:$0xff]  }
  0x11   : > { %508 = vmatprep.subr.bf16.mxu0 %v825_v4  ;;  %v830_v7 = vld [vmem:[%s964_s29 + $0x60] ss:$8 sps:$4 sm:$0xff]   ;;  %v831_v8 = vld [vmem:[%s964_s29 + $0x54] ss:$8 sps:$4 sm:$0xff]   ;;  %v833_v9 = vld [vmem:[%s964_s29 + $0x50] ss:$8 sps:$4 sm:$0xff]  }
  0x12   : > { %509 = vmatpush1.bf16.msra.mxu0 %v827_v5  ;;  %v834_v10 = vld [vmem:[%s964_s29 + $0x44] ss:$8 sps:$4 sm:$0xff]   ;;  %v836_v11 = vld [vmem:[%s964_s29 + $0x40] ss:$8 sps:$4 sm:$0xff]   ;;  %v837_v12 = vld [vmem:[%s964_s29 + $0x34] ss:$8 sps:$4 sm:$0xff]  }
  0x13   : > { %510 = vmatprep.subr.bf16.mxu0 %v828_v6  ;;  %v839_v13 = vld [vmem:[%s964_s29 + $0x30] ss:$8 sps:$4 sm:$0xff]   ;;  %v840_v14 = vld [vmem:[%s964_s29 + $0x24] ss:$8 sps:$4 sm:$0xff]   ;;  %v842_v15 = vld [vmem:[%s964_s29 + $0x20] ss:$8 sps:$4 sm:$0xff]  }
  0x14   : > { %v843_v16 = vld [vmem:[%s964_s29 + $0x14] ss:$8 sps:$4 sm:$0xff]   ;;  %v845_v20 = vld [vmem:[%s964_s29 + $0x10] ss:$8 sps:$4 sm:$0xff]   ;;  %v846_v21 = vld [vmem:[%s964_s29 + $0x4] ss:$8 sps:$4 sm:$0xff]  }
  0x15   : > { %v332_v17 = vld [vmem:[%s964_s29 + $0xf0] sm:$0x33]  ;;  %v848_v24 = vld [vmem:[%s964_s29] ss:$8 sps:$4 sm:$0xff]   ;;  %v851_v28 = vld [vmem:[%s964_s29 + $0xe4] ss:$8 sps:$4 sm:$0xff]  }
  0x16   : > { %511 = vmatpush1.bf16.msra.mxu0 %v830_v7  ;;  %v789_v22 = vcombine.high %v332_v17, %v332_v17  ;;  %v788_v25 = vcombine.low %v332_v17, %v332_v17  ;;  %v853_v29 = vld [vmem:[%s964_s29 + $0xe0] ss:$8 sps:$4 sm:$0xff]   ;;  %v854_v30 = vld [vmem:[%s964_s29 + $0xd4] ss:$8 sps:$4 sm:$0xff]   ;;  %v856_v31 = vld [vmem:[%s964_s29 + $0xd0] ss:$8 sps:$4 sm:$0xff]  }
  0x17   : > { %512 = vmatprep.subr.bf16.mxu0 %v831_v8  ;;  %v857_v32 = vld [vmem:[%s964_s29 + $0xc4] ss:$8 sps:$4 sm:$0xff]   ;;  %v859_v33 = vld [vmem:[%s964_s29 + $0xc0] ss:$8 sps:$4 sm:$0xff]   ;;  %v860_v34 = vld [vmem:[%s964_s29 + $0xb4] ss:$8 sps:$4 sm:$0xff]  }
  0x18   : > { %v506_v26 = vand.u32 %v789_v22, %v501_v23  ;;  %v503_v27 = vand.u32 %v788_v25, %v501_v23  ;;  %v862_v35 = vld [vmem:[%s964_s29 + $0xb0] ss:$8 sps:$4 sm:$0xff]   ;;  %v863_v36 = vld [vmem:[%s964_s29 + $0xa4] ss:$8 sps:$4 sm:$0xff]   ;;  %v865_v37 = vld [vmem:[%s964_s29 + $0xa0] ss:$8 sps:$4 sm:$0xff]  }
  0x19   : > { %v866_v38 = vld [vmem:[%s964_s29 + $0x94] ss:$8 sps:$4 sm:$0xff]   ;;  %v868_v39 = vld [vmem:[%s964_s29 + $0x90] ss:$8 sps:$4 sm:$0xff]   ;;  %v869_v40 = vld [vmem:[%s964_s29 + $0x84] ss:$8 sps:$4 sm:$0xff]  }
  0x1a   : > { %513 = vmatpush1.bf16.msra.mxu0 %v833_v9  ;;  %v871_v41 = vld [vmem:[%s964_s29 + $0x80] ss:$8 sps:$4 sm:$0xff]  }
  0x1b   : > { %514 = vmatprep.subr.bf16.mxu0 %v834_v10 }
  0x1e   : > { %515 = vmatpush1.bf16.msra.mxu0 %v836_v11 }
  0x1f   : > { %516 = vmatprep.subr.bf16.mxu0 %v837_v12 }
  0x22   : > { %517 = vmatpush1.bf16.msra.mxu0 %v839_v13 }
  0x23   : > { %518 = vmatprep.subr.bf16.mxu0 %v840_v14 }
  0x26   : > { %519 = vmatpush1.bf16.msra.mxu0 %v842_v15 }
  0x27   : > { %520 = vmatprep.subr.bf16.mxu0 %v843_v16 }
  0x2a   : > { %521 = vmatpush1.bf16.msra.mxu0 %v845_v20 }
  0x2b   : > { %522 = vmatprep.subr.bf16.mxu0 %v846_v21 }
  0x2e   : > { %523 = vmatpush1.bf16.msra.mxu0 %v848_v24 }
  0x2f   : > { %524 = vmatprep.subr.bf16.mxu0 %v506_v26 }
  0x32   : > { %525 = vmatpush2.bf16.msra.mxu0 %v503_v27 }
  0x33   : > { %526 = vmatprep.subr.bf16.mxu0 %v851_v28 }
  0x36   : > { %527 = vmatpush2.bf16.msra.mxu0 %v853_v29 }
  0x37   : > { %528 = vmatprep.subr.bf16.mxu0 %v854_v30 }
  0x3a   : > { %529 = vmatpush2.bf16.msra.mxu0 %v856_v31 }
  0x3b   : > { %530 = vmatprep.subr.bf16.mxu0 %v857_v32 }
  0x3e   : > { %531 = vmatpush2.bf16.msra.mxu0 %v859_v33 }
  0x3f   : > { %532 = vmatprep.subr.bf16.mxu0 %v860_v34 }
  0x42   : > { %533 = vmatpush2.bf16.msra.mxu0 %v862_v35 }
  0x43   : > { %534 = vmatprep.subr.bf16.mxu0 %v863_v36 }
  0x46   : > { %535 = vmatpush2.bf16.msra.mxu0 %v865_v37 }
  0x47   : > { %536 = vmatprep.subr.bf16.mxu0 %v866_v38 }
  0x4a   : > { %537 = vmatpush2.bf16.msra.mxu0 %v868_v39 }
  0x4b   : > { %538 = vmatprep.subr.bf16.mxu0 %v869_v40 }
  0x4e   : > { %539 = vmatpush2.bf16.msra.mxu0 %v871_v41 }
  0x51   : > { %541 = vmatmul.mubr.bf16.vlgmr.msra.gmra.mxu0 %v756_v42 }
  0x89   : > { %v564_v43 = vpop.permute.xlu1 %563 }
 0x111   : > { %v542_v44 = vpop.f32.mrf.mxu0 }
 0x112   : > { %v566_v46 = vadd.f32 %v564_v43, %v542_v44  ;;  %v554_v52 = vmul.f32 %v542_v44, %v542_v44 }
 0x113   : > { %v544_v45 = vpop.f32.mrf.mxu0 }
 0x114   : > { %v567_v47 = vadd.f32 %v564_v43, %v544_v45  ;;  %v549_v48 = vadd.f32 %v544_v45, %v542_v44  ;;  %v555_v49 = vmul.f32 %v544_v45, %v544_v45 }
 0x115   : > { %v546_v50 = vpop.f32.mrf.mxu0 }
 0x116   : > { %v795_v51 = vpack.c.bf16 %v567_v47, %v566_v46  ;;  %550 = vadd.xlane.f32.xlu0 %v549_v48  ;;  %v556_v54 = vadd.f32 %v555_v49, %v554_v52 }
 0x117   : > { %v547_v53 = vpop.f32.mrf.mxu0 }
 0x118   : > { %576 = vst [vmem:[%s285_s8] sm:$0xff] %v795_v51 }
 0x11a   : > { %557 = vadd.xlane.f32.xlu0 %v556_v54 }
 0x19f   : > { %v551_v55 = vpop.xlane.xlu0 %550 }
 0x1a0   : > { %553 = vst.msk [vmem:[%s293_s11] sm:$0xff] %vm552_vm3, %v551_v55 }
 0x1a3   : > { %v558_v56 = vpop.xlane.xlu0 %557 }
 0x1a4   : > { %559 = vst.msk [vmem:[%s300_s14] sm:$0xff] %vm552_vm3, %v558_v56 }
 0x1a5 PF: > { %s16_s20 = sadd.s32 1, %s896_s20   ;;  %s1024_s18 = smov %s892_s19 }
 0x1a6   : > { %p13_p5 = scmp.ge.s32.totalorder %s16_s20, 4   ;;  %s1025_s19 = smov %s1027_s21 }
 0x1a8   :  { %15 = sbr.rel (!%p13_p5) target bundleno = 2 (0x2), region = 86 }

// kernel: transform_net_forward.32
= control target key start
LH: loop header
LB: loop body
LE: loop exit
PB: predicated region body
PF: predicated region fallthrough
CT: control target
= control target key end

     0   :  { %v81_v0 = vmov 0   ;;  %s126_s2 = inlined_call_operand.vmem [shape: f32[16,1], index: 2, kind: input, shape index: {}]   ;;  %s127_s1 = inlined_call_operand.vmem [shape: f32[16,1], index: 1, kind: input, shape index: {}]   ;;  %s128_s0 = inlined_call_operand.vmem [shape: bf16[16,256], index: 0, kind: input, shape index: {}]   ;;  %s129_s3 = inlined_call_operand.vmem [shape: bf16[16,256], index: 3, kind: output, shape index: {}]  }
   0x1   :  { %80 = vset.pattern.permute.xlu1 %v81_v0  ;;  %79 = vset.pattern.permute.xlu0 %v81_v0  ;;  %v36_v1 = vld [vmem:[%s126_s2] sm:$0xff]  ;;  %v37_v3 = vld [vmem:[%s126_s2 + $0x8] sm:$0xff] }
   0x2   :  { %v20_v2 = vld [vmem:[%s127_s1] sm:$0xff]  ;;  %40 = vperm.xlu1 %80, %v36_v1   ;;  %v21_v4 = vld [vmem:[%s127_s1 + $0x8] sm:$0xff] }
   0x3   :  { %24 = vperm.xlu0 %79, %v20_v2   ;;  %v14_v5 = vld [vmem:[%s128_s0] sm:$0xff]  ;;  %v15_v8 = vld [vmem:[%s128_s0 + $0x8] sm:$0xff] }
   0x4   :  { %v16_v6 = vunpack.c.l.bf16 %v14_v5  ;;  %v17_v7 = vunpack.c.h.bf16 %v14_v5  ;;  %v18_v13 = vunpack.c.l.bf16 %v15_v8  ;;  %v19_v14 = vunpack.c.h.bf16 %v15_v8 }
   0x6   :  { %45 = vperm.xlu1 %80, %v37_v3  }
   0x7   :  { %29 = vperm.xlu0 %79, %v21_v4  }
  0x7d   :  { %v41_v9 = vpop.permute.xlu1 %40 }
  0x7e   :  { %v25_v10 = vpop.permute.xlu0 %24 }
  0x7f   :  { %v32_v11 = vsub.f32 %v16_v6, %v25_v10  ;;  %v33_v12 = vsub.f32 %v17_v7, %v25_v10 }
  0x81   :  { %v48_v15 = vmul.f32 %v41_v9, %v32_v11  ;;  %v49_v16 = vmul.f32 %v41_v9, %v33_v12  ;;  %v46_v22 = vpop.permute.xlu1 %45 }
  0x82   :  { %v30_v17 = vpop.permute.xlu0 %29 }
  0x83   :  { %v52_v18 = vmax.f32 %v48_v15, 0.0  ;;  %v53_v19 = vmax.f32 %v49_v16, 0.0  ;;  %v34_v20 = vsub.f32 %v18_v13, %v30_v17  ;;  %v35_v21 = vsub.f32 %v19_v14, %v30_v17 }
  0x85   :  { %v76_v23 = vpack.c.bf16 %v53_v19, %v52_v18  ;;  %v50_v24 = vmul.f32 %v46_v22, %v34_v20  ;;  %v51_v25 = vmul.f32 %v46_v22, %v35_v21 }
  0x87   :  { %v54_v26 = vmax.f32 %v50_v24, 0.0  ;;  %v55_v27 = vmax.f32 %v51_v25, 0.0  ;;  %68 = vst [vmem:[%s129_s3] sm:$0xff] %v76_v23 }
  0x89   :  { %v77_v28 = vpack.c.bf16 %v55_v27, %v54_v26 }
  0x8b   :  { %69 = vst [vmem:[%s129_s3 + $0x8] sm:$0xff] %v77_v28 }

// kernel: transform_net_forward.34
= control target key start
LH: loop header
LB: loop body
LE: loop exit
PB: predicated region body
PF: predicated region fallthrough
CT: control target
= control target key end

     0   :  { %v137_v0 = vmov 0   ;;  %s194_s1 = inlined_call_operand.vmem [shape: f32[32,1], index: 1, kind: input, shape index: {}]   ;;  %s195_s2 = inlined_call_operand.vmem [shape: f32[32,1], index: 2, kind: input, shape index: {}]   ;;  %s196_s0 = inlined_call_operand.vmem [shape: bf16[32,128], index: 0, kind: input, shape index: {}]   ;;  %s197_s3 = inlined_call_operand.vmem [shape: bf16[32,128], index: 3, kind: output, shape index: {}]  }
   0x1   :  { %136 = vset.pattern.permute.xlu1 %v137_v0  ;;  %135 = vset.pattern.permute.xlu0 %v137_v0  ;;  %v24_v1 = vld [vmem:[%s194_s1 + $0x10] sm:$0xff]  ;;  %v22_v2 = vld [vmem:[%s194_s1] sm:$0xff]  ;;  %v25_v3 = vld [vmem:[%s194_s1 + $0x18] sm:$0xff] }
   0x2   :  { %38 = vperm.xlu1 %136, %v24_v1   ;;  %28 = vperm.xlu0 %135, %v22_v2   ;;  %v23_v4 = vld [vmem:[%s194_s1 + $0x8] sm:$0xff]  ;;  %v50_v6 = vld [vmem:[%s195_s2] sm:$0xff]  ;;  %v53_v7 = vld [vmem:[%s195_s2 + $0x18] sm:$0xff] }
   0x3   :  { %v51_v5 = vld [vmem:[%s195_s2 + $0x8] sm:$0xff]  ;;  %v52_v8 = vld [vmem:[%s195_s2 + $0x10] sm:$0xff]  ;;  %v115_v11 = vld [vmem:[%s196_s0] sm:$0xff]  }
   0x4   :  { %v116_v12 = vunpack.c.l.bf16 %v115_v11  ;;  %v117_v13 = vunpack.c.h.bf16 %v115_v11  ;;  %v132_v14 = vld [vmem:[%s196_s0 + $0x8] sm:$0xff]  }
   0x5   :  { %v120_v17 = vunpack.c.l.bf16 %v132_v14  ;;  %v121_v19 = vunpack.c.h.bf16 %v132_v14 }
   0x6   :  { %43 = vperm.xlu1 %136, %v25_v3   ;;  %33 = vperm.xlu0 %135, %v23_v4  }
   0xa   :  { %61 = vperm.xlu1 %136, %v51_v5   ;;  %56 = vperm.xlu0 %135, %v50_v6  }
   0xe   :  { %71 = vperm.xlu1 %136, %v53_v7   ;;  %66 = vperm.xlu0 %135, %v52_v8  }
  0x7d   :  { %v39_v9 = vpop.permute.xlu1 %38  ;;  %v29_v10 = vpop.permute.xlu0 %28 }
  0x7e   :  { %v46_v18 = vsub.f32 %v116_v12, %v29_v10  ;;  %v48_v25 = vsub.f32 %v120_v17, %v39_v9 }
  0x81   :  { %v44_v15 = vpop.permute.xlu1 %43  ;;  %v34_v16 = vpop.permute.xlu0 %33 }
  0x82   :  { %v47_v20 = vsub.f32 %v117_v13, %v34_v16  ;;  %v49_v26 = vsub.f32 %v121_v19, %v44_v15 }
  0x85   :  { %v62_v21 = vpop.permute.xlu1 %61  ;;  %v57_v22 = vpop.permute.xlu0 %56 }
  0x86   :  { %v75_v23 = vmul.f32 %v62_v21, %v47_v20  ;;  %v74_v24 = vmul.f32 %v57_v22, %v46_v18 }
  0x88   :  { %v79_v27 = vmax.f32 %v75_v23, 0.0  ;;  %v78_v28 = vmax.f32 %v74_v24, 0.0 }
  0x89   :  { %v72_v29 = vpop.permute.xlu1 %71  ;;  %v67_v30 = vpop.permute.xlu0 %66 }
  0x8a   :  { %v125_v31 = vpack.c.bf16 %v79_v27, %v78_v28  ;;  %v77_v32 = vmul.f32 %v72_v29, %v49_v26  ;;  %v76_v33 = vmul.f32 %v67_v30, %v48_v25 }
  0x8c   :  { %126 = vst [vmem:[%s197_s3] sm:$0xff] %v125_v31   ;;  %v81_v34 = vmax.f32 %v77_v32, 0.0  ;;  %v80_v35 = vmax.f32 %v76_v33, 0.0 }
  0x8e   :  { %v130_v36 = vpack.c.bf16 %v81_v34, %v80_v35 }
  0x90   :  { %133 = vst [vmem:[%s197_s3 + $0x8] sm:$0xff] %v130_v36  }

// kernel: transform_net_forward.33
= control target key start
LH: loop header
LB: loop body
LE: loop exit
PB: predicated region body
PF: predicated region fallthrough
CT: control target
= control target key end

     0   :  { %s768_s18 = smov 0   ;;  %s770_s19 = smov 0   ;;  %s821_s0 = inlined_call_operand.vmem [shape: bf16[16,72], index: 0, kind: input, shape index: {}]   ;;  %s822_s1 = inlined_call_operand.vmem [shape: bf16[2,72,128], index: 1, kind: input, shape index: {}]   ;;  %s823_s2 = inlined_call_operand.vmem [shape: f32[16,1], index: 2, kind: input, shape index: {}]   ;;  %s824_s3 = inlined_call_operand.vmem [shape: bf16[2,16,128], index: 3, kind: output, shape index: {0}]   ;;  %s825_s4 = inlined_call_operand.vmem [shape: f32[2,1,16,1], index: 4, kind: output, shape index: {1}]   ;;  %s826_s5 = inlined_call_operand.vmem [shape: f32[2,1,16,1], index: 5, kind: output, shape index: {2}]  }
   0x1   :  { %s772_s20 = smov 0  }
   0x2 LB: > { %s28_s21 = sadd.s32 1, %s729_s19  ;;  %p626_p0 = scmp.ge.s32.totalorder %s733_s20, 1  ;;  %s733_s20 = sphi %s772_s20, %s16_s20   ;;  %s729_s19 = sphi %s770_s19, %s828_s19   ;;  %s725_s18 = sphi %s768_s18, %s827_s18  }
   0x3   : > { %p30_p1 = scmp.ge.s32.totalorder %s28_s21, 2  ;;  %p215_p2 = scmp.lt.s32.totalorder %s733_s20, 3 }
   0x5   : > { %s830_s21 = smov (%p30_p1, %s28_s21), 0  ;;  %p216_p3 = pnand %p626_p0, %p215_p2 }
   0x6   : > { %p267_p4 = scmp.lt.s32.totalorder (!%p216_p3), %s725_s18, 1 }
   0x7   : > { %219 = sbr.rel (%p216_p3) target bundleno = 385 (0x181), region = 32 }
   0xc   : > { %v735_v0 = vmov 0.0   ;;  %vm736_vm0 = vmmov 0   ;;  %s832_s18 = smov (!%p267_p4, %s725_s18), 1  ;;  %vm349_vm1 = vcmask 1043456   ;;  %v710_v7 = vld [vmem:[%s821_s0] sm:$0xff]   ;;  %vm345_vm2 = vcmask 588800  }
   0xd   : > { %661 = vmatprep.subr.bf16.mxu0 %v735_v0  ;;  %671 = vmatprep.mubr.msk.bf16.mxu0 %vm736_vm0, %v735_v0  ;;  %s675_s22 = smul.u32 36, %s832_s18  ;;  %v737_v8 = vmov 0   ;;  %v410_v15 = vld [vmem:[%s823_s2 + $0x8] sm:$0xff]  ;;  %v409_v16 = vld [vmem:[%s823_s2] sm:$0xff]  ;;  %s646_s7 = sshll.u32 %s832_s18, 4  ;;  %vm398_vm3 = vcmask 7168  }
   0xe   : > { %704 = vset.pattern.permute.xlu1 %v737_v8  ;;  %703 = vset.pattern.permute.xlu0 %v737_v8  ;;  %s291_s10 = scalar_lea.vmem %s825_s4, %s646_s7  ;;  %s300_s13 = scalar_lea.vmem %s826_s5, %s646_s7 }
   0xf   : > { %s274_s25 = scalar_lea.vmem %s822_s1, %s675_s22  ;;  %s645_s14 = sshll.u32 %s832_s18, 3 }
  0x10   : > { %v705_v1 = vld [vmem:[%s274_s25 + $0x20] ss:$0 sps:$4 sm:$0xff]   ;;  %v706_v3 = vld [vmem:[%s274_s25 + $0x18] sm:$0xff]   ;;  %v707_v4 = vld [vmem:[%s274_s25 + $0x10] sm:$0xff]   ;;  %s282_s17 = scalar_lea.vmem %s824_s3, %s645_s14 }
  0x11   : > { %v351_v2 = vsel %vm349_vm1, %v705_v1, 0  ;;  %v708_v5 = vld [vmem:[%s274_s25 + $0x8] sm:$0xff]   ;;  %v709_v6 = vld [vmem:[%s274_s25] sm:$0xff]  }
  0x12   : > { %662 = vmatpush3.bf16.msra.mxu0 %v351_v2 }
  0x13   : > { %663 = vmatprep.subr.bf16.mxu0 %v735_v0 }
  0x16   : > { %664 = vmatpush3.bf16.msra.mxu0 %v706_v3 }
  0x17   : > { %665 = vmatprep.subr.bf16.mxu0 %v735_v0 }
  0x1a   : > { %666 = vmatpush3.bf16.msra.mxu0 %v707_v4 }
  0x1b   : > { %667 = vmatprep.subr.bf16.mxu0 %v735_v0 }
  0x1e   : > { %668 = vmatpush3.bf16.msra.mxu0 %v708_v5 }
  0x1f   : > { %669 = vmatprep.subr.bf16.mxu0 %v735_v0 }
  0x22   : > { %670 = vmatpush3.bf16.msra.mxu0 %v709_v6 }
  0x25   : > { %672 = vmatmul.mubr.msk.bf16.vlgmr.msra.gmra.mxu0 %vm345_vm2, %v710_v7 }
  0xe5   : > { %v387_v9 = vpop.f32.mrf.mxu0 }
  0xe6   : > { %394 = vadd.xlane.f32.xlu0 %v387_v9  ;;  %v401_v10 = vmul.f32 %v387_v9, %v387_v9 }
  0xe7   : > { %v673_v11 = vpop.f32.mrf.mxu0 }
  0xe8   : > { %403 = vadd.xlane.f32.xlu1 %v401_v10 }
  0xe9   : > { %v390_v12 = vpop.f32.mrf.mxu0 }
  0xea   : > { %396 = vadd.xlane.f32.xlu0 %v390_v12  ;;  %v402_v13 = vmul.f32 %v390_v12, %v390_v12 }
  0xeb   : > { %v674_v14 = vpop.f32.mrf.mxu0 }
  0xec   : > { %405 = vadd.xlane.f32.xlu1 %v402_v13 }
  0xfd   : > { %418 = vperm.xlu1 %704, %v410_v15  }
 0x100   : > { %413 = vperm.xlu0 %703, %v409_v16  }
 0x16f   : > { %v395_v17 = vpop.xlane.xlu0 %394 }
 0x170   : > { %399 = vst.msk [vmem:[%s291_s10] sm:$0xff] %vm398_vm3, %v395_v17 }
 0x171   : > { %v404_v18 = vpop.xlane.xlu1 %403 }
 0x172   : > { %407 = vst.msk [vmem:[%s300_s13] sm:$0xff] %vm398_vm3, %v404_v18 }
 0x173   : > { %v397_v19 = vpop.xlane.xlu0 %396 }
 0x174   : > { %400 = vst.msk [vmem:[%s291_s10 + $0x8] sm:$0xff] %vm398_vm3, %v397_v19 }
 0x175   : > { %v406_v20 = vpop.xlane.xlu1 %405 }
 0x176   : > { %408 = vst.msk [vmem:[%s300_s13 + $0x8] sm:$0xff] %vm398_vm3, %v406_v20 }
 0x179   : > { %v419_v21 = vpop.permute.xlu1 %418 }
 0x17a   : > { %v422_v23 = vadd.f32 %v419_v21, %v390_v12 }
 0x17b   : > { %v414_v22 = vpop.permute.xlu0 %413 }
 0x17c   : > { %v421_v24 = vadd.f32 %v414_v22, %v387_v9 }
 0x17e   : > { %v653_v25 = vpack.c.bf16 %v422_v23, %v421_v24 }
 0x180   : > { %654 = vst [vmem:[%s282_s17] sm:$0xff] %v653_v25  }
 0x181 PF: > { %s16_s20 = sadd.s32 1, %s733_s20   ;;  %s827_s18 = smov %s729_s19 }
 0x182   : > { %p13_p5 = scmp.ge.s32.totalorder %s16_s20, 4   ;;  %s828_s19 = smov %s830_s21 }
 0x184   :  { %15 = sbr.rel (!%p13_p5) target bundleno = 2 (0x2), region = 86 }

// kernel: transform_net_forward.35
= control target key start
LH: loop header
LB: loop body
LE: loop exit
PB: predicated region body
PF: predicated region fallthrough
CT: control target
= control target key end

     0   :  { %s885_s18 = smov 0   ;;  %s887_s19 = smov 0   ;;  %s972_s0 = inlined_call_operand.vmem [shape: bf16[32,144], index: 0, kind: input, shape index: {}]   ;;  %s973_s1 = inlined_call_operand.vmem [shape: bf16[2,144,128], index: 1, kind: input, shape index: {}]   ;;  %s974_s2 = inlined_call_operand.vmem [shape: f32[32,1], index: 2, kind: input, shape index: {}]   ;;  %s975_s3 = inlined_call_operand.vmem [shape: bf16[2,32,128], index: 3, kind: output, shape index: {0}]   ;;  %s976_s4 = inlined_call_operand.vmem [shape: f32[2,1,32,1], index: 4, kind: output, shape index: {1}]   ;;  %s977_s5 = inlined_call_operand.vmem [shape: f32[2,1,32,1], index: 5, kind: output, shape index: {2}]  }
   0x1   :  { %s889_s20 = smov 0  }
   0x2 LB: > { %s28_s21 = sadd.s32 1, %s848_s19  ;;  %p722_p0 = scmp.ge.s32.totalorder %s852_s20, 1  ;;  %s852_s20 = sphi %s889_s20, %s16_s20   ;;  %s848_s19 = sphi %s887_s19, %s979_s19   ;;  %s844_s18 = sphi %s885_s18, %s978_s18  }
   0x3   : > { %p30_p1 = scmp.ge.s32.totalorder %s28_s21, 2  ;;  %p215_p2 = scmp.lt.s32.totalorder %s852_s20, 3 }
   0x5   : > { %s981_s21 = smov (%p30_p1, %s28_s21), 0  ;;  %p216_p3 = pnand %p722_p0, %p215_p2 }
   0x6   : > { %p267_p4 = scmp.lt.s32.totalorder (!%p216_p3), %s844_s18, 1 }
   0x7   : > { %219 = sbr.rel (%p216_p3) target bundleno = 457 (0x1c9), region = 32 }
   0xc   : > { %v854_v0 = vmov 0   ;;  %v826_v1 = vld [vmem:[%s972_s0 + $0x4] ss:$8 sps:$4 sm:$0xff]   ;;  %vm396_vm0 = vcmask 130048   ;;  %s983_s18 = smov (!%p267_p4, %s844_s18), 1  ;;  %v483_v25 = vld [vmem:[%s974_s2 + $0x10] sm:$0xff] }
   0xd   : > { %403 = vmatprep.subr.bf16.mxu0 %v854_v0  ;;  %769 = vmatprep.subr.bf16.mxu1 %v854_v0  ;;  %v829_v2 = vld [vmem:[%s972_s0 + $0x14] ss:$8 sps:$4 sm:$0xff]   ;;  %s787_s26 = smul.u32 72, %s983_s18  ;;  %v824_v12 = vld [vmem:[%s972_s0] ss:$8 sps:$4 sm:$0xff]   ;;  %s752_s17 = sshll.u32 %s983_s18, 5 }
   0xe   : > { %814 = vset.pattern.permute.xlu1 %v854_v0  ;;  %813 = vset.pattern.permute.xlu0 %v854_v0  ;;  %v827_v13 = vld [vmem:[%s972_s0 + $0x10] ss:$8 sps:$4 sm:$0xff]   ;;  %v482_v24 = vld [vmem:[%s974_s2 + $0x8] sm:$0xff]  ;;  %v481_v26 = vld [vmem:[%s974_s2] sm:$0xff]  ;;  %s291_s24 = scalar_lea.vmem %s976_s4, %s752_s17  ;;  %vm460_vm1 = vcmask 7168   ;;  %s300_s27 = scalar_lea.vmem %s977_s5, %s752_s17 }
   0xf   : > { %743 = vmatprep.mubr.msk.bf16.mxu0 %vm396_vm0, %v826_v1  ;;  %744 = vmatprep.mubr.msk.bf16.mxu1 %vm396_vm0, %v829_v2  ;;  %s915_s29 = scalar_lea.vmem %s973_s1, %s787_s26  ;;  %v484_v29 = vld [vmem:[%s974_s2 + $0x18] sm:$0xff]  ;;  %s751_s28 = sshll.u32 %s983_s18, 4 }
  0x10   : > { %v815_v3 = vld [vmem:[%s915_s29 + $0x38] sm:$0xff]   ;;  %v816_v4 = vld [vmem:[%s915_s29 + $0x30] sm:$0xff]   ;;  %v817_v5 = vld [vmem:[%s915_s29 + $0x28] sm:$0xff]   ;;  %s282_s6 = scalar_lea.vmem %s975_s3, %s751_s28 }
  0x11   : > { %404 = vmatpush1.bf16.msra.mxu0 %v815_v3  ;;  %778 = vmatpush1.bf16.msra.mxu1 %v815_v3  ;;  %v818_v6 = vld [vmem:[%s915_s29 + $0x20] sm:$0xff]   ;;  %v819_v7 = vld [vmem:[%s915_s29 + $0x18] sm:$0xff]   ;;  %v820_v8 = vld [vmem:[%s915_s29 + $0x10] sm:$0xff]  }
  0x12   : > { %405 = vmatprep.subr.bf16.mxu0 %v854_v0  ;;  %770 = vmatprep.subr.bf16.mxu1 %v854_v0  ;;  %v821_v9 = vld [vmem:[%s915_s29 + $0x8] sm:$0xff]   ;;  %v822_v10 = vld [vmem:[%s915_s29] sm:$0xff]  }
  0x13   : > { %v823_v11 = vld [vmem:[%s915_s29 + $0x40] sm:$0xff]  }
  0x15   : > { %406 = vmatpush1.bf16.msra.mxu0 %v816_v4  ;;  %779 = vmatpush1.bf16.msra.mxu1 %v816_v4 }
  0x16   : > { %407 = vmatprep.subr.bf16.mxu0 %v854_v0  ;;  %771 = vmatprep.subr.bf16.mxu1 %v854_v0 }
  0x19   : > { %408 = vmatpush1.bf16.msra.mxu0 %v817_v5  ;;  %780 = vmatpush1.bf16.msra.mxu1 %v817_v5 }
  0x1a   : > { %409 = vmatprep.subr.bf16.mxu0 %v854_v0  ;;  %772 = vmatprep.subr.bf16.mxu1 %v854_v0 }
  0x1d   : > { %410 = vmatpush1.bf16.msra.mxu0 %v818_v6  ;;  %781 = vmatpush1.bf16.msra.mxu1 %v818_v6 }
  0x1e   : > { %411 = vmatprep.subr.bf16.mxu0 %v854_v0  ;;  %773 = vmatprep.subr.bf16.mxu1 %v854_v0 }
  0x21   : > { %412 = vmatpush1.bf16.msra.mxu0 %v819_v7  ;;  %782 = vmatpush1.bf16.msra.mxu1 %v819_v7 }
  0x22   : > { %413 = vmatprep.subr.bf16.mxu0 %v854_v0  ;;  %774 = vmatprep.subr.bf16.mxu1 %v854_v0 }
  0x25   : > { %414 = vmatpush1.bf16.msra.mxu0 %v820_v8  ;;  %783 = vmatpush1.bf16.msra.mxu1 %v820_v8 }
  0x26   : > { %415 = vmatprep.subr.bf16.mxu0 %v854_v0  ;;  %775 = vmatprep.subr.bf16.mxu1 %v854_v0 }
  0x29   : > { %416 = vmatpush1.bf16.msra.mxu0 %v821_v9  ;;  %784 = vmatpush1.bf16.msra.mxu1 %v821_v9 }
  0x2a   : > { %417 = vmatprep.subr.bf16.mxu0 %v854_v0  ;;  %776 = vmatprep.subr.bf16.mxu1 %v854_v0 }
  0x2d   : > { %418 = vmatpush1.bf16.msra.mxu0 %v822_v10  ;;  %785 = vmatpush1.bf16.msra.mxu1 %v822_v10 }
  0x2e   : > { %433 = vmatprep.subr.bf16.mxu0 %v854_v0  ;;  %777 = vmatprep.subr.bf16.mxu1 %v854_v0 }
  0x31   : > { %434 = vmatpush2.bf16.msra.mxu0 %v823_v11  ;;  %786 = vmatpush2.bf16.msra.mxu1 %v823_v11 }
  0x34   : > { %436 = vmatmul.mubr.bf16.vlgmr.msra.gmra.mxu0 %v824_v12  ;;  %444 = vmatmul.mubr.bf16.vlgmr.msra.gmra.mxu1 %v827_v13 }
  0xf4   : > { %v437_v14 = vpop.f32.mrf.mxu0  ;;  %v445_v15 = vpop.f32.mrf.mxu1 }
  0xf5   : > { %456 = vadd.xlane.f32.xlu1 %v445_v15  ;;  %452 = vadd.xlane.f32.xlu0 %v437_v14  ;;  %v465_v16 = vmul.f32 %v437_v14, %v437_v14  ;;  %v467_v23 = vmul.f32 %v445_v15, %v445_v15 }
  0xf6   : > { %v447_v17 = vpop.f32.mrf.mxu1  ;;  %v439_v18 = vpop.f32.mrf.mxu0 }
  0xf8   : > { %v448_v19 = vpop.f32.mrf.mxu1  ;;  %v440_v20 = vpop.f32.mrf.mxu0 }
  0xf9   : > { %469 = vadd.xlane.f32.xlu0 %v465_v16  ;;  %v466_v27 = vmul.f32 %v440_v20, %v440_v20  ;;  %v468_v28 = vmul.f32 %v448_v19, %v448_v19 }
  0xfa   : > { %v450_v21 = vpop.f32.mrf.mxu1  ;;  %v442_v22 = vpop.f32.mrf.mxu0 }
  0xfd   : > { %473 = vadd.xlane.f32.xlu0 %v467_v23 }
 0x101   : > { %454 = vadd.xlane.f32.xlu0 %v440_v20 }
 0x106   : > { %492 = vperm.xlu1 %814, %v482_v24  }
 0x10a   : > { %497 = vperm.xlu1 %814, %v483_v25  }
 0x117   : > { %487 = vperm.xlu0 %813, %v481_v26  }
 0x12e   : > { %458 = vadd.xlane.f32.xlu1 %v448_v19 }
 0x132   : > { %471 = vadd.xlane.f32.xlu1 %v466_v27 }
 0x136   : > { %475 = vadd.xlane.f32.xlu1 %v468_v28 }
 0x147   : > { %502 = vperm.xlu1 %814, %v484_v29  }
 0x17e   : > { %v457_v30 = vpop.xlane.xlu1 %456  ;;  %v453_v31 = vpop.xlane.xlu0 %452 }
 0x17f   : > { %463 = vst.msk [vmem:[%s291_s24 + $0x10] sm:$0xff] %vm460_vm1, %v457_v30  ;;  %461 = vst.msk [vmem:[%s291_s24] sm:$0xff] %vm460_vm1, %v453_v31 }
 0x182   : > { %v470_v32 = vpop.xlane.xlu0 %469  ;;  %v493_v35 = vpop.permute.xlu1 %492 }
 0x183   : > { %477 = vst.msk [vmem:[%s300_s27] sm:$0xff] %vm460_vm1, %v470_v32  ;;  %v506_v37 = vadd.f32 %v493_v35, %v440_v20 }
 0x186   : > { %v474_v33 = vpop.xlane.xlu0 %473  ;;  %v498_v40 = vpop.permute.xlu1 %497 }
 0x187   : > { %479 = vst.msk [vmem:[%s300_s27 + $0x10] sm:$0xff] %vm460_vm1, %v474_v33  ;;  %v507_v45 = vadd.f32 %v498_v40, %v445_v15 }
 0x18a   : > { %v455_v34 = vpop.xlane.xlu0 %454 }
 0x18b   : > { %462 = vst.msk [vmem:[%s291_s24 + $0x8] sm:$0xff] %vm460_vm1, %v455_v34 }
 0x192   : > { %v488_v36 = vpop.permute.xlu0 %487 }
 0x193   : > { %v505_v38 = vadd.f32 %v488_v36, %v437_v14 }
 0x195   : > { %v761_v39 = vpack.c.bf16 %v506_v37, %v505_v38 }
 0x197   : > { %762 = vst [vmem:[%s282_s6] sm:$0xff] %v761_v39  }
 0x1b7   : > { %v459_v41 = vpop.xlane.xlu1 %458 }
 0x1b8   : > { %464 = vst.msk [vmem:[%s291_s24 + $0x18] sm:$0xff] %vm460_vm1, %v459_v41 }
 0x1bb   : > { %v472_v42 = vpop.xlane.xlu1 %471 }
 0x1bc   : > { %478 = vst.msk [vmem:[%s300_s27 + $0x8] sm:$0xff] %vm460_vm1, %v472_v42 }
 0x1bf   : > { %v476_v43 = vpop.xlane.xlu1 %475 }
 0x1c0   : > { %480 = vst.msk [vmem:[%s300_s27 + $0x18] sm:$0xff] %vm460_vm1, %v476_v43 }
 0x1c3   : > { %v503_v44 = vpop.permute.xlu1 %502 }
 0x1c4   : > { %v508_v46 = vadd.f32 %v503_v44, %v448_v19 }
 0x1c6   : > { %v766_v47 = vpack.c.bf16 %v508_v46, %v507_v45 }
 0x1c8   : > { %768 = vst [vmem:[%s282_s6 + $0x8] sm:$0xff] %v766_v47  }
 0x1c9 PF: > { %s16_s20 = sadd.s32 1, %s852_s20   ;;  %s978_s18 = smov %s848_s19 }
 0x1ca   : > { %p13_p5 = scmp.ge.s32.totalorder %s16_s20, 4   ;;  %s979_s19 = smov %s981_s21 }
 0x1cc   :  { %15 = sbr.rel (!%p13_p5) target bundleno = 2 (0x2), region = 86 }

// kernel: transform_net_forward.36
= control target key start
LH: loop header
LB: loop body
LE: loop exit
PB: predicated region body
PF: predicated region fallthrough
CT: control target
= control target key end

     0   :  { %v255_v0 = vmov 0   ;;  %s348_s1 = inlined_call_operand.vmem [shape: f32[64,1], index: 1, kind: input, shape index: {}]   ;;  %s349_s2 = inlined_call_operand.vmem [shape: f32[64,1], index: 2, kind: input, shape index: {}]   ;;  %s350_s0 = inlined_call_operand.vmem [shape: bf16[64,128], index: 0, kind: input, shape index: {}]   ;;  %s351_s3 = inlined_call_operand.vmem [shape: bf16[64,128], index: 3, kind: output, shape index: {}]  }
   0x1   :  { %254 = vset.pattern.permute.xlu1 %v255_v0  ;;  %253 = vset.pattern.permute.xlu0 %v255_v0  ;;  %v32_v1 = vld [vmem:[%s348_s1 + $0x10] sm:$0xff]  ;;  %v30_v2 = vld [vmem:[%s348_s1] sm:$0xff]  ;;  %v33_v3 = vld [vmem:[%s348_s1 + $0x18] sm:$0xff] }
   0x2   :  { %50 = vperm.xlu1 %254, %v32_v1   ;;  %40 = vperm.xlu0 %253, %v30_v2   ;;  %v31_v4 = vld [vmem:[%s348_s1 + $0x8] sm:$0xff]  ;;  %v34_v6 = vld [vmem:[%s348_s1 + $0x20] sm:$0xff]  ;;  %v37_v7 = vld [vmem:[%s348_s1 + $0x38] sm:$0xff] }
   0x3   :  { %v35_v5 = vld [vmem:[%s348_s1 + $0x28] sm:$0xff]  ;;  %v36_v8 = vld [vmem:[%s348_s1 + $0x30] sm:$0xff]  ;;  %v86_v10 = vld [vmem:[%s349_s2] sm:$0xff] }
   0x4   :  { %v87_v9 = vld [vmem:[%s349_s2 + $0x8] sm:$0xff]  ;;  %v89_v11 = vld [vmem:[%s349_s2 + $0x18] sm:$0xff]  ;;  %v88_v12 = vld [vmem:[%s349_s2 + $0x10] sm:$0xff] }
   0x5   :  { %v91_v13 = vld [vmem:[%s349_s2 + $0x28] sm:$0xff]  ;;  %v90_v14 = vld [vmem:[%s349_s2 + $0x20] sm:$0xff]  ;;  %v93_v15 = vld [vmem:[%s349_s2 + $0x38] sm:$0xff] }
   0x6   :  { %55 = vperm.xlu1 %254, %v33_v3   ;;  %45 = vperm.xlu0 %253, %v31_v4   ;;  %v92_v16 = vld [vmem:[%s349_s2 + $0x30] sm:$0xff]  ;;  %v211_v21 = vld [vmem:[%s350_s0] sm:$0xff]   ;;  %v246_v26 = vld [vmem:[%s350_s0 + $0x8] sm:$0xff]  }
   0x7   :  { %v212_v24 = vunpack.c.l.bf16 %v211_v21  ;;  %v213_v25 = vunpack.c.h.bf16 %v211_v21  ;;  %v216_v29 = vunpack.c.l.bf16 %v246_v26  ;;  %v217_v31 = vunpack.c.h.bf16 %v246_v26  ;;  %v247_v33 = vld [vmem:[%s350_s0 + $0x10] sm:$0xff]   ;;  %v248_v42 = vld [vmem:[%s350_s0 + $0x18] sm:$0xff]  }
   0x8   :  { %v221_v38 = vunpack.c.h.bf16 %v247_v33  ;;  %v220_v39 = vunpack.c.l.bf16 %v247_v33  ;;  %v225_v50 = vunpack.c.h.bf16 %v248_v42  ;;  %v224_v51 = vunpack.c.l.bf16 %v248_v42 }
   0xa   :  { %65 = vperm.xlu1 %254, %v35_v5   ;;  %60 = vperm.xlu0 %253, %v34_v6  }
   0xe   :  { %75 = vperm.xlu1 %254, %v37_v7   ;;  %70 = vperm.xlu0 %253, %v36_v8  }
  0x12   :  { %101 = vperm.xlu1 %254, %v87_v9   ;;  %96 = vperm.xlu0 %253, %v86_v10  }
  0x16   :  { %111 = vperm.xlu1 %254, %v89_v11   ;;  %106 = vperm.xlu0 %253, %v88_v12  }
  0x1a   :  { %121 = vperm.xlu1 %254, %v91_v13   ;;  %116 = vperm.xlu0 %253, %v90_v14  }
  0x1e   :  { %131 = vperm.xlu1 %254, %v93_v15   ;;  %126 = vperm.xlu0 %253, %v92_v16  }
  0x7d   :  { %v51_v17 = vpop.permute.xlu1 %50  ;;  %v41_v18 = vpop.permute.xlu0 %40 }
  0x7e   :  { %v78_v30 = vsub.f32 %v212_v24, %v41_v18  ;;  %v80_v40 = vsub.f32 %v216_v29, %v51_v17 }
  0x81   :  { %v56_v19 = vpop.permute.xlu1 %55  ;;  %v46_v20 = vpop.permute.xlu0 %45 }
  0x82   :  { %v79_v32 = vsub.f32 %v213_v25, %v46_v20  ;;  %v81_v41 = vsub.f32 %v217_v31, %v56_v19 }
  0x85   :  { %v66_v22 = vpop.permute.xlu1 %65  ;;  %v61_v23 = vpop.permute.xlu0 %60 }
  0x86   :  { %v83_v52 = vsub.f32 %v221_v38, %v66_v22  ;;  %v82_v53 = vsub.f32 %v220_v39, %v61_v23 }
  0x89   :  { %v76_v27 = vpop.permute.xlu1 %75  ;;  %v71_v28 = vpop.permute.xlu0 %70 }
  0x8a   :  { %v85_v61 = vsub.f32 %v225_v50, %v76_v27  ;;  %v84_v62 = vsub.f32 %v224_v51, %v71_v28 }
  0x8d   :  { %v102_v34 = vpop.permute.xlu1 %101  ;;  %v97_v35 = vpop.permute.xlu0 %96 }
  0x8e   :  { %v135_v36 = vmul.f32 %v102_v34, %v79_v32  ;;  %v134_v37 = vmul.f32 %v97_v35, %v78_v30 }
  0x90   :  { %v143_v43 = vmax.f32 %v135_v36, 0.0  ;;  %v142_v44 = vmax.f32 %v134_v37, 0.0 }
  0x91   :  { %v112_v45 = vpop.permute.xlu1 %111  ;;  %v107_v46 = vpop.permute.xlu0 %106 }
  0x92   :  { %v229_v47 = vpack.c.bf16 %v143_v43, %v142_v44  ;;  %v137_v48 = vmul.f32 %v112_v45, %v81_v41  ;;  %v136_v49 = vmul.f32 %v107_v46, %v80_v40 }
  0x94   :  { %230 = vst [vmem:[%s351_s3] sm:$0xff] %v229_v47   ;;  %v145_v54 = vmax.f32 %v137_v48, 0.0  ;;  %v144_v55 = vmax.f32 %v136_v49, 0.0 }
  0x95   :  { %v122_v56 = vpop.permute.xlu1 %121  ;;  %v117_v57 = vpop.permute.xlu0 %116 }
  0x96   :  { %v234_v58 = vpack.c.bf16 %v145_v54, %v144_v55  ;;  %v139_v59 = vmul.f32 %v122_v56, %v83_v52  ;;  %v138_v60 = vmul.f32 %v117_v57, %v82_v53 }
  0x98   :  { %249 = vst [vmem:[%s351_s3 + $0x8] sm:$0xff] %v234_v58   ;;  %v147_v63 = vmax.f32 %v139_v59, 0.0  ;;  %v146_v0 = vmax.f32 %v138_v60, 0.0 }
  0x99   :  { %v132_v1 = vpop.permute.xlu1 %131  ;;  %v127_v2 = vpop.permute.xlu0 %126 }
  0x9a   :  { %v239_v3 = vpack.c.bf16 %v147_v63, %v146_v0  ;;  %v141_v4 = vmul.f32 %v132_v1, %v85_v61  ;;  %v140_v5 = vmul.f32 %v127_v2, %v84_v62 }
  0x9c   :  { %250 = vst [vmem:[%s351_s3 + $0x10] sm:$0xff] %v239_v3   ;;  %v149_v6 = vmax.f32 %v141_v4, 0.0  ;;  %v148_v7 = vmax.f32 %v140_v5, 0.0 }
  0x9e   :  { %v244_v8 = vpack.c.bf16 %v149_v6, %v148_v7 }
  0xa0   :  { %251 = vst [vmem:[%s351_s3 + $0x18] sm:$0xff] %v244_v8  }

// kernel: transform_net_forward.37
= control target key start
LH: loop header
LB: loop body
LE: loop exit
PB: predicated region body
PF: predicated region fallthrough
CT: control target
= control target key end

     0   :  { %s1066_s18 = smov 0   ;;  %s1068_s19 = smov 0   ;;  %s1170_s0 = inlined_call_operand.vmem [shape: bf16[32,288], index: 0, kind: input, shape index: {}]   ;;  %s1171_s1 = inlined_call_operand.vmem [shape: bf16[2,288,128], index: 1, kind: input, shape index: {}]   ;;  %s1172_s2 = inlined_call_operand.vmem [shape: f32[32,1], index: 2, kind: input, shape index: {}]   ;;  %s1173_s3 = inlined_call_operand.vmem [shape: bf16[2,32,128], index: 3, kind: output, shape index: {0}]   ;;  %s1174_s4 = inlined_call_operand.vmem [shape: f32[2,1,32,1], index: 4, kind: output, shape index: {1}]   ;;  %s1175_s5 = inlined_call_operand.vmem [shape: f32[2,1,32,1], index: 5, kind: output, shape index: {2}]  }
   0x1   :  { %s1070_s20 = smov 0  }
   0x2 LB: > { %s28_s21 = sadd.s32 1, %s1029_s19  ;;  %p859_p0 = scmp.ge.s32.totalorder %s1033_s20, 1  ;;  %s1033_s20 = sphi %s1070_s20, %s16_s20   ;;  %s1029_s19 = sphi %s1068_s19, %s1177_s19   ;;  %s1025_s18 = sphi %s1066_s18, %s1176_s18  }
   0x3   : > { %p30_p1 = scmp.ge.s32.totalorder %s28_s21, 2  ;;  %p215_p2 = scmp.lt.s32.totalorder %s1033_s20, 3 }
   0x5   : > { %s1179_s21 = smov (%p30_p1, %s28_s21), 0  ;;  %p216_p3 = pnand %p859_p0, %p215_p2 }
   0x6   : > { %p267_p4 = scmp.lt.s32.totalorder (!%p216_p3), %s1025_s18, 1 }
   0x7   : > { %219 = sbr.rel (%p216_p3) target bundleno = 466 (0x1d2), region = 32 }
   0xc   : > { %vm484_vm0 = vcmask 261120   ;;  %v1001_v0 = vld [vmem:[%s1170_s0 + $0x8] ss:$12 sps:$4 sm:$0xff]   ;;  %s1181_s18 = smov (!%p267_p4, %s1025_s18), 1  ;;  %v1007_v1 = vld [vmem:[%s1170_s0 + $0x4] ss:$12 sps:$4 sm:$0xff]  }
   0xd   : > { %953 = vmatprep.mubr.msk.bf16.mxu1 %vm484_vm0, %v1001_v0  ;;  %s957_s26 = smul.u32 144, %s1181_s18  ;;  %523 = vmatprep.mubr.bf16.mxu0 %v1007_v1  ;;  %v1003_v15 = vld [vmem:[%s1170_s0 + $0x20] ss:$12 sps:$4 sm:$0xff]   ;;  %v1008_v22 = vld [vmem:[%s1170_s0 + $0x1c] ss:$12 sps:$4 sm:$0xff]   ;;  %v1035_v24 = vmov 0  }
   0xe   : > { %v1005_v21 = vld [vmem:[%s1170_s0] ss:$12 sps:$4 sm:$0xff]   ;;  %v1010_v23 = vld [vmem:[%s1170_s0 + $0x18] ss:$12 sps:$4 sm:$0xff]   ;;  %984 = vset.pattern.permute.xlu1 %v1035_v24  ;;  %983 = vset.pattern.permute.xlu0 %v1035_v24  ;;  %v620_v45 = vld [vmem:[%s1172_s2 + $0x10] sm:$0xff]  ;;  %s900_s25 = sshll.u32 %s1181_s18, 5 }
   0xf   : > { %s1097_s29 = scalar_lea.vmem %s1171_s1, %s957_s26  ;;  %v619_v44 = vld [vmem:[%s1172_s2 + $0x8] sm:$0xff]  ;;  %v618_v46 = vld [vmem:[%s1172_s2] sm:$0xff]  ;;  %v621_v52 = vld [vmem:[%s1172_s2 + $0x18] sm:$0xff]  ;;  %s291_s28 = scalar_lea.vmem %s1174_s4, %s900_s25  ;;  %vm597_vm1 = vcmask 7168  }
  0x10   : > { %v985_v2 = vld [vmem:[%s1097_s29 + $0x78] sm:$0xff]   ;;  %v987_v4 = vld [vmem:[%s1097_s29 + $0x70] sm:$0xff]   ;;  %v989_v6 = vld [vmem:[%s1097_s29 + $0x68] sm:$0xff]   ;;  %s300_s6 = scalar_lea.vmem %s1175_s5, %s900_s25  ;;  %s899_s7 = sshll.u32 %s1181_s18, 4 }
  0x11   : > { %v986_v3 = vld [vmem:[%s1097_s29 + $0x38] sm:$0xff]   ;;  %917 = vmatprep.subr.bf16.mxu0 %v985_v2  ;;  %v988_v5 = vld [vmem:[%s1097_s29 + $0x30] sm:$0xff]   ;;  %v990_v7 = vld [vmem:[%s1097_s29 + $0x28] sm:$0xff]   ;;  %s282_s10 = scalar_lea.vmem %s1173_s3, %s899_s7 }
  0x12   : > { %918 = vmatpush3.bf16.msra.mxu0 %v986_v3  ;;  %v991_v8 = vld [vmem:[%s1097_s29 + $0x60] sm:$0xff]   ;;  %v996_v10 = vld [vmem:[%s1097_s29 + $0x88] sm:$0xff]   ;;  %v993_v11 = vld [vmem:[%s1097_s29 + $0x58] sm:$0xff]  }
  0x13   : > { %919 = vmatprep.subr.bf16.mxu0 %v987_v4  ;;  %v992_v9 = vld [vmem:[%s1097_s29 + $0x20] sm:$0xff]   ;;  %949 = vmatprep.subr.bf16.mxu1 %v996_v10  ;;  %v994_v13 = vld [vmem:[%s1097_s29 + $0x18] sm:$0xff]   ;;  %v995_v14 = vld [vmem:[%s1097_s29 + $0x50] sm:$0xff]  }
  0x14   : > { %950 = vmatpush3.bf16.msra.mxu1 %v996_v10  ;;  %v999_v12 = vld [vmem:[%s1097_s29 + $0x80] sm:$0xff]   ;;  %v997_v16 = vld [vmem:[%s1097_s29 + $0x10] sm:$0xff]   ;;  %v998_v17 = vld [vmem:[%s1097_s29 + $0x48] sm:$0xff]  }
  0x15   : > { %951 = vmatprep.subr.bf16.mxu1 %v999_v12  ;;  %v1000_v18 = vld [vmem:[%s1097_s29 + $0x8] sm:$0xff]   ;;  %v1002_v19 = vld [vmem:[%s1097_s29 + $0x40] sm:$0xff]  }
  0x16   : > { %920 = vmatpush3.bf16.msra.mxu0 %v988_v5  ;;  %v1004_v20 = vld [vmem:[%s1097_s29] sm:$0xff]  }
  0x17   : > { %921 = vmatprep.subr.bf16.mxu0 %v989_v6 }
  0x18   : > { %952 = vmatpush3.bf16.msra.mxu1 %v999_v12 }
  0x1a   : > { %922 = vmatpush3.bf16.msra.mxu0 %v990_v7 }
  0x1b   : > { %923 = vmatprep.subr.bf16.mxu0 %v991_v8  ;;  %954 = vmatmul.mubr.msk.bf16.vlgmr.msra.gmra.mxu1 %vm484_vm0, %v1003_v15 }
  0x1e   : > { %924 = vmatpush3.bf16.msra.mxu0 %v992_v9 }
  0x1f   : > { %925 = vmatprep.subr.bf16.mxu0 %v993_v11 }
  0x22   : > { %926 = vmatpush3.bf16.msra.mxu0 %v994_v13 }
  0x23   : > { %927 = vmatprep.subr.bf16.mxu0 %v995_v14 }
  0x26   : > { %928 = vmatpush3.bf16.msra.mxu0 %v997_v16 }
  0x27   : > { %929 = vmatprep.subr.bf16.mxu0 %v998_v17 }
  0x2a   : > { %930 = vmatpush3.bf16.msra.mxu0 %v1000_v18 }
  0x2b   : > { %931 = vmatprep.subr.bf16.mxu0 %v1002_v19 }
  0x2e   : > { %932 = vmatpush3.bf16.msra.mxu0 %v1004_v20 }
  0x31   : > { %524 = vmatmul.mubr.bf16.vlgmr.msra.gmra.mxu0 %v1005_v21 }
  0x32   : > { %531 = vmatprep.mubr.bf16.mxu0 %v1008_v22 }
  0x39   : > { %532 = vmatmul.mubr.bf16.gmra.mxu0 %v1010_v23 }
  0xdb   : > { %v955_v25 = vpop.f32.mrf.mxu1 }
  0xdd   : > { %v574_v26 = vpop.f32.mrf.mxu1 }
  0xdf   : > { %v956_v30 = vpop.f32.mrf.mxu1 }
  0xe1   : > { %v577_v35 = vpop.f32.mrf.mxu1 }
  0xf1   : > { %v933_v27 = vpop.f32.mrf.mxu0 }
  0xf3   : > { %v934_v28 = vpop.f32.mrf.mxu0 }
  0xf4   : > { %v935_v29 = vadd.f32 %v934_v28, %v933_v27 }
  0xf5   : > { %v936_v31 = vpop.f32.mrf.mxu0 }
  0xf6   : > { %v575_v32 = vadd.f32 %v935_v29, %v574_v26 }
  0xf7   : > { %v937_v33 = vpop.f32.mrf.mxu0 }
  0xf8   : > { %v938_v34 = vadd.f32 %v937_v33, %v936_v31  ;;  %589 = vadd.xlane.f32.xlu0 %v575_v32  ;;  %v602_v38 = vmul.f32 %v575_v32, %v575_v32 }
  0xf9   : > { %v939_v36 = vpop.f32.mrf.mxu0 }
  0xfa   : > { %v578_v37 = vadd.f32 %v938_v34, %v577_v35 }
  0xfb   : > { %v940_v39 = vpop.f32.mrf.mxu0 }
  0xfc   : > { %v941_v40 = vadd.f32 %v940_v39, %v939_v36  ;;  %606 = vadd.xlane.f32.xlu0 %v602_v38  ;;  %v603_v41 = vmul.f32 %v578_v37, %v578_v37 }
  0xfd   : > { %v942_v47 = vpop.f32.mrf.mxu0 }
  0xfe   : > { %v583_v42 = vadd.f32 %v955_v25, %v941_v40  ;;  %608 = vadd.xlane.f32.xlu1 %v603_v41 }
  0xff   : > { %v943_v48 = vpop.f32.mrf.mxu0 }
 0x100   : > { %591 = vadd.xlane.f32.xlu0 %v578_v37  ;;  %v604_v43 = vmul.f32 %v583_v42, %v583_v42  ;;  %v944_v49 = vadd.f32 %v943_v48, %v942_v47 }
 0x102   : > { %593 = vadd.xlane.f32.xlu1 %v583_v42  ;;  %v586_v50 = vadd.f32 %v956_v30, %v944_v49 }
 0x104   : > { %610 = vadd.xlane.f32.xlu0 %v604_v43  ;;  %v605_v51 = vmul.f32 %v586_v50, %v586_v50 }
 0x113   : > { %629 = vperm.xlu1 %984, %v619_v44  }
 0x117   : > { %634 = vperm.xlu1 %984, %v620_v45  }
 0x11a   : > { %624 = vperm.xlu0 %983, %v618_v46  }
 0x13b   : > { %595 = vadd.xlane.f32.xlu1 %v586_v50 }
 0x13f   : > { %612 = vadd.xlane.f32.xlu1 %v605_v51 }
 0x150   : > { %639 = vperm.xlu1 %984, %v621_v52  }
 0x181   : > { %v590_v53 = vpop.xlane.xlu0 %589 }
 0x182   : > { %598 = vst.msk [vmem:[%s291_s28] sm:$0xff] %vm597_vm1, %v590_v53 }
 0x185   : > { %v607_v54 = vpop.xlane.xlu0 %606 }
 0x186   : > { %614 = vst.msk [vmem:[%s300_s6] sm:$0xff] %vm597_vm1, %v607_v54 }
 0x187   : > { %v609_v55 = vpop.xlane.xlu1 %608 }
 0x188   : > { %615 = vst.msk [vmem:[%s300_s6 + $0x8] sm:$0xff] %vm597_vm1, %v609_v55 }
 0x189   : > { %v592_v56 = vpop.xlane.xlu0 %591 }
 0x18a   : > { %599 = vst.msk [vmem:[%s291_s28 + $0x8] sm:$0xff] %vm597_vm1, %v592_v56 }
 0x18b   : > { %v594_v57 = vpop.xlane.xlu1 %593 }
 0x18c   : > { %600 = vst.msk [vmem:[%s291_s28 + $0x10] sm:$0xff] %vm597_vm1, %v594_v57 }
 0x18d   : > { %v611_v58 = vpop.xlane.xlu0 %610 }
 0x18e   : > { %616 = vst.msk [vmem:[%s300_s6 + $0x10] sm:$0xff] %vm597_vm1, %v611_v58 }
 0x18f   : > { %v630_v59 = vpop.permute.xlu1 %629 }
 0x190   : > { %v643_v61 = vadd.f32 %v630_v59, %v578_v37 }
 0x193   : > { %v635_v0 = vpop.permute.xlu1 %634 }
 0x194   : > { %v644_v4 = vadd.f32 %v635_v0, %v583_v42 }
 0x195   : > { %v625_v60 = vpop.permute.xlu0 %624 }
 0x196   : > { %v642_v62 = vadd.f32 %v625_v60, %v575_v32 }
 0x198   : > { %v909_v63 = vpack.c.bf16 %v643_v61, %v642_v62 }
 0x19a   : > { %910 = vst [vmem:[%s282_s10] sm:$0xff] %v909_v63  }
 0x1c4   : > { %v596_v1 = vpop.xlane.xlu1 %595 }
 0x1c5   : > { %601 = vst.msk [vmem:[%s291_s28 + $0x18] sm:$0xff] %vm597_vm1, %v596_v1 }
 0x1c8   : > { %v613_v2 = vpop.xlane.xlu1 %612 }
 0x1c9   : > { %617 = vst.msk [vmem:[%s300_s6 + $0x18] sm:$0xff] %vm597_vm1, %v613_v2 }
 0x1cc   : > { %v640_v3 = vpop.permute.xlu1 %639 }
 0x1cd   : > { %v645_v5 = vadd.f32 %v640_v3, %v586_v50 }
 0x1cf   : > { %v914_v6 = vpack.c.bf16 %v645_v5, %v644_v4 }
 0x1d1   : > { %916 = vst [vmem:[%s282_s10 + $0x8] sm:$0xff] %v914_v6  }
 0x1d2 PF: > { %s16_s20 = sadd.s32 1, %s1033_s20   ;;  %s1176_s18 = smov %s1029_s19 }
 0x1d3   : > { %p13_p5 = scmp.ge.s32.totalorder %s16_s20, 4   ;;  %s1177_s19 = smov %s1179_s21 }
 0x1d5   :  { %15 = sbr.rel (!%p13_p5) target bundleno = 2 (0x2), region = 86 }

// kernel: transform_net_forward.40
= control target key start
LH: loop header
LB: loop body
LE: loop exit
PB: predicated region body
PF: predicated region fallthrough
CT: control target
= control target key end

     0   :  { %v293_v0 = vmov 0   ;;  %s403_s1 = inlined_call_operand.vmem [shape: f32[64,1], index: 1, kind: input, shape index: {}]   ;;  %s404_s2 = inlined_call_operand.vmem [shape: f32[64,1], index: 2, kind: input, shape index: {}]   ;;  %s405_s0 = inlined_call_operand.vmem [shape: bf16[64,128], index: 0, kind: input, shape index: {}]   ;;  %s406_s3 = inlined_call_operand.vmem [shape: bf16[64,128], index: 3, kind: input, shape index: {}]   ;;  %s407_s4 = inlined_call_operand.vmem [shape: bf16[64,128], index: 4, kind: output, shape index: {}]  }
   0x1   :  { %292 = vset.pattern.permute.xlu1 %v293_v0  ;;  %291 = vset.pattern.permute.xlu0 %v293_v0  ;;  %v35_v1 = vld [vmem:[%s403_s1 + $0x10] sm:$0xff]  ;;  %v33_v2 = vld [vmem:[%s403_s1] sm:$0xff]  ;;  %v36_v3 = vld [vmem:[%s403_s1 + $0x18] sm:$0xff] }
   0x2   :  { %53 = vperm.xlu1 %292, %v35_v1   ;;  %43 = vperm.xlu0 %291, %v33_v2   ;;  %v34_v4 = vld [vmem:[%s403_s1 + $0x8] sm:$0xff]  ;;  %v37_v6 = vld [vmem:[%s403_s1 + $0x20] sm:$0xff]  ;;  %v40_v7 = vld [vmem:[%s403_s1 + $0x38] sm:$0xff] }
   0x3   :  { %v38_v5 = vld [vmem:[%s403_s1 + $0x28] sm:$0xff]  ;;  %v39_v8 = vld [vmem:[%s403_s1 + $0x30] sm:$0xff]  ;;  %v89_v10 = vld [vmem:[%s404_s2] sm:$0xff] }
   0x4   :  { %v90_v9 = vld [vmem:[%s404_s2 + $0x8] sm:$0xff]  ;;  %v92_v11 = vld [vmem:[%s404_s2 + $0x18] sm:$0xff]  ;;  %v91_v12 = vld [vmem:[%s404_s2 + $0x10] sm:$0xff] }
   0x5   :  { %v94_v13 = vld [vmem:[%s404_s2 + $0x28] sm:$0xff]  ;;  %v93_v14 = vld [vmem:[%s404_s2 + $0x20] sm:$0xff]  ;;  %v96_v15 = vld [vmem:[%s404_s2 + $0x38] sm:$0xff] }
   0x6   :  { %58 = vperm.xlu1 %292, %v36_v3   ;;  %48 = vperm.xlu0 %291, %v34_v4   ;;  %v95_v16 = vld [vmem:[%s404_s2 + $0x30] sm:$0xff]  ;;  %v230_v21 = vld [vmem:[%s405_s0] sm:$0xff]   ;;  %v281_v24 = vld [vmem:[%s405_s0 + $0x8] sm:$0xff]  }
   0x7   :  { %v231_v25 = vunpack.c.l.bf16 %v230_v21  ;;  %v232_v26 = vunpack.c.h.bf16 %v230_v21  ;;  %v246_v29 = vld [vmem:[%s406_s3] sm:$0xff]   ;;  %v235_v30 = vunpack.c.l.bf16 %v281_v24  ;;  %v236_v31 = vunpack.c.h.bf16 %v281_v24  ;;  %v282_v34 = vld [vmem:[%s405_s0 + $0x10] sm:$0xff]   ;;  %v284_v37 = vld [vmem:[%s406_s3 + $0x8] sm:$0xff]  }
   0x8   :  { %v248_v35 = vunpack.c.h.bf16 %v246_v29  ;;  %v247_v36 = vunpack.c.l.bf16 %v246_v29  ;;  %v240_v42 = vunpack.c.h.bf16 %v282_v34  ;;  %v239_v43 = vunpack.c.l.bf16 %v282_v34  ;;  %v283_v48 = vld [vmem:[%s405_s0 + $0x18] sm:$0xff]   ;;  %v285_v51 = vld [vmem:[%s406_s3 + $0x10] sm:$0xff]  }
   0x9   :  { %v252_v44 = vunpack.c.h.bf16 %v284_v37  ;;  %v251_v45 = vunpack.c.l.bf16 %v284_v37  ;;  %v244_v57 = vunpack.c.h.bf16 %v283_v48  ;;  %v243_v58 = vunpack.c.l.bf16 %v283_v48  ;;  %v286_v1 = vld [vmem:[%s406_s3 + $0x18] sm:$0xff]  }
   0xa   :  { %68 = vperm.xlu1 %292, %v38_v5   ;;  %63 = vperm.xlu0 %291, %v37_v6   ;;  %v256_v59 = vunpack.c.h.bf16 %v285_v51  ;;  %v255_v60 = vunpack.c.l.bf16 %v285_v51 }
   0xe   :  { %78 = vperm.xlu1 %292, %v40_v7   ;;  %73 = vperm.xlu0 %291, %v39_v8   ;;  %v260_v7 = vunpack.c.h.bf16 %v286_v1  ;;  %v259_v8 = vunpack.c.l.bf16 %v286_v1 }
  0x12   :  { %104 = vperm.xlu1 %292, %v90_v9   ;;  %99 = vperm.xlu0 %291, %v89_v10  }
  0x16   :  { %114 = vperm.xlu1 %292, %v92_v11   ;;  %109 = vperm.xlu0 %291, %v91_v12  }
  0x1a   :  { %124 = vperm.xlu1 %292, %v94_v13   ;;  %119 = vperm.xlu0 %291, %v93_v14  }
  0x1e   :  { %134 = vperm.xlu1 %292, %v96_v15   ;;  %129 = vperm.xlu0 %291, %v95_v16  }
  0x7d   :  { %v54_v17 = vpop.permute.xlu1 %53  ;;  %v44_v18 = vpop.permute.xlu0 %43 }
  0x7e   :  { %v81_v32 = vsub.f32 %v231_v25, %v44_v18  ;;  %v83_v46 = vsub.f32 %v235_v30, %v54_v17 }
  0x81   :  { %v59_v19 = vpop.permute.xlu1 %58  ;;  %v49_v20 = vpop.permute.xlu0 %48 }
  0x82   :  { %v82_v33 = vsub.f32 %v232_v26, %v49_v20  ;;  %v84_v47 = vsub.f32 %v236_v31, %v59_v19 }
  0x85   :  { %v69_v22 = vpop.permute.xlu1 %68  ;;  %v64_v23 = vpop.permute.xlu0 %63 }
  0x86   :  { %v86_v61 = vsub.f32 %v240_v42, %v69_v22  ;;  %v85_v62 = vsub.f32 %v239_v43, %v64_v23 }
  0x89   :  { %v79_v27 = vpop.permute.xlu1 %78  ;;  %v74_v28 = vpop.permute.xlu0 %73 }
  0x8a   :  { %v88_v9 = vsub.f32 %v244_v57, %v79_v27  ;;  %v87_v10 = vsub.f32 %v243_v58, %v74_v28 }
  0x8d   :  { %v105_v38 = vpop.permute.xlu1 %104  ;;  %v100_v39 = vpop.permute.xlu0 %99 }
  0x8e   :  { %v138_v40 = vmul.f32 %v105_v38, %v82_v33  ;;  %v137_v41 = vmul.f32 %v100_v39, %v81_v32 }
  0x90   :  { %v162_v49 = vadd.f32 %v248_v35, %v138_v40  ;;  %v161_v50 = vadd.f32 %v247_v36, %v137_v41 }
  0x91   :  { %v115_v52 = vpop.permute.xlu1 %114  ;;  %v110_v53 = vpop.permute.xlu0 %109 }
  0x92   :  { %v264_v54 = vpack.c.bf16 %v162_v49, %v161_v50  ;;  %v140_v55 = vmul.f32 %v115_v52, %v84_v47  ;;  %v139_v56 = vmul.f32 %v110_v53, %v83_v46 }
  0x94   :  { %265 = vst [vmem:[%s407_s4] sm:$0xff] %v264_v54   ;;  %v164_v63 = vadd.f32 %v252_v44, %v140_v55  ;;  %v163_v0 = vadd.f32 %v251_v45, %v139_v56 }
  0x95   :  { %v125_v2 = vpop.permute.xlu1 %124  ;;  %v120_v3 = vpop.permute.xlu0 %119 }
  0x96   :  { %v269_v4 = vpack.c.bf16 %v164_v63, %v163_v0  ;;  %v142_v5 = vmul.f32 %v125_v2, %v86_v61  ;;  %v141_v6 = vmul.f32 %v120_v3, %v85_v62 }
  0x98   :  { %287 = vst [vmem:[%s407_s4 + $0x8] sm:$0xff] %v269_v4   ;;  %v166_v11 = vadd.f32 %v256_v59, %v142_v5  ;;  %v165_v12 = vadd.f32 %v255_v60, %v141_v6 }
  0x99   :  { %v135_v13 = vpop.permute.xlu1 %134  ;;  %v130_v14 = vpop.permute.xlu0 %129 }
  0x9a   :  { %v274_v15 = vpack.c.bf16 %v166_v11, %v165_v12  ;;  %v144_v16 = vmul.f32 %v135_v13, %v88_v9  ;;  %v143_v17 = vmul.f32 %v130_v14, %v87_v10 }
  0x9c   :  { %288 = vst [vmem:[%s407_s4 + $0x10] sm:$0xff] %v274_v15   ;;  %v168_v18 = vadd.f32 %v260_v7, %v144_v16  ;;  %v167_v19 = vadd.f32 %v259_v8, %v143_v17 }
  0x9e   :  { %v279_v20 = vpack.c.bf16 %v168_v18, %v167_v19 }
  0xa0   :  { %289 = vst [vmem:[%s407_s4 + $0x18] sm:$0xff] %v279_v20  }

// kernel: transform_net_forward.57
= control target key start
LH: loop header
LB: loop body
LE: loop exit
PB: predicated region body
PF: predicated region fallthrough
CT: control target
= control target key end

     0   :  { %s969_s18 = smov 0   ;;  %s971_s19 = smov 0   ;;  %s1048_s0 = inlined_call_operand.vmem [shape: bf16[16,288], index: 0, kind: input, shape index: {}]   ;;  %s1049_s1 = inlined_call_operand.vmem [shape: bf16[2,288,128], index: 1, kind: input, shape index: {}]   ;;  %s1050_s2 = inlined_call_operand.vmem [shape: f32[16,1], index: 2, kind: input, shape index: {}]   ;;  %s1051_s3 = inlined_call_operand.vmem [shape: bf16[2,16,128], index: 3, kind: output, shape index: {0}]   ;;  %s1052_s4 = inlined_call_operand.vmem [shape: f32[2,1,16,1], index: 4, kind: output, shape index: {1}]   ;;  %s1053_s5 = inlined_call_operand.vmem [shape: f32[2,1,16,1], index: 5, kind: output, shape index: {2}]  }
   0x1   :  { %s973_s20 = smov 0  }
   0x2 LB: > { %s28_s21 = sadd.s32 1, %s930_s19  ;;  %p783_p0 = scmp.ge.s32.totalorder %s934_s20, 1  ;;  %s934_s20 = sphi %s973_s20, %s16_s20   ;;  %s930_s19 = sphi %s971_s19, %s1055_s19   ;;  %s926_s18 = sphi %s969_s18, %s1054_s18  }
   0x3   : > { %p30_p1 = scmp.ge.s32.totalorder %s28_s21, 2  ;;  %p215_p2 = scmp.lt.s32.totalorder %s934_s20, 3 }
   0x5   : > { %s1057_s21 = smov (%p30_p1, %s28_s21), 0  ;;  %p216_p3 = pnand %p783_p0, %p215_p2 }
   0x6   : > { %p267_p4 = scmp.lt.s32.totalorder (!%p216_p3), %s926_s18, 1 }
   0x7   : > { %219 = sbr.rel (%p216_p3) target bundleno = 403 (0x193), region = 32 }
   0xc   : > { %v936_v0 = vmov 0.0   ;;  %vm937_vm0 = vmmov 0   ;;  %s1059_s18 = smov (!%p267_p4, %s926_s18), 1  ;;  %v911_v1 = vld [vmem:[%s1048_s0 + $0x4] ss:$12 sps:$4 sm:$0xff]   ;;  %vm465_vm1 = vcmask 261120  }
   0xd   : > { %852 = vmatprep.subr.bf16.mxu1 %v936_v0  ;;  %856 = vmatprep.mubr.msk.bf16.mxu1 %vm937_vm0, %v936_v0  ;;  %s860_s24 = smul.u32 144, %s1059_s18  ;;  %v908_v15 = vld [vmem:[%s1048_s0 + $0x8] ss:$12 sps:$4 sm:$0xff]   ;;  %v909_v21 = vld [vmem:[%s1048_s0] ss:$12 sps:$4 sm:$0xff]   ;;  %v938_v22 = vmov 0  }
   0xe   : > { %501 = vmatprep.mubr.bf16.mxu0 %v911_v1  ;;  %889 = vset.pattern.permute.xlu1 %v938_v22  ;;  %v567_v37 = vld [vmem:[%s1050_s2 + $0x8] sm:$0xff]  ;;  %v566_v38 = vld [vmem:[%s1050_s2] sm:$0xff]  ;;  %s818_s11 = sshll.u32 %s1059_s18, 4  ;;  %vm555_vm2 = vcmask 7168   ;;  %s817_s22 = sshll.u32 %s1059_s18, 3 }
   0xf   : > { %s996_s27 = scalar_lea.vmem %s1049_s1, %s860_s24  ;;  %888 = vset.pattern.permute.xlu0 %v938_v22  ;;  %s291_s14 = scalar_lea.vmem %s1052_s4, %s818_s11 }
  0x10   : > { %v890_v2 = vld [vmem:[%s996_s27 + $0x78] sm:$0xff]   ;;  %v892_v4 = vld [vmem:[%s996_s27 + $0x70] sm:$0xff]   ;;  %v894_v6 = vld [vmem:[%s996_s27 + $0x68] sm:$0xff]   ;;  %s300_s17 = scalar_lea.vmem %s1053_s5, %s818_s11  ;;  %s282_s25 = scalar_lea.vmem %s1051_s3, %s817_s22 }
  0x11   : > { %v891_v3 = vld [vmem:[%s996_s27 + $0x38] sm:$0xff]   ;;  %827 = vmatprep.subr.bf16.mxu0 %v890_v2  ;;  %v893_v5 = vld [vmem:[%s996_s27 + $0x30] sm:$0xff]   ;;  %v895_v7 = vld [vmem:[%s996_s27 + $0x28] sm:$0xff]  }
  0x12   : > { %828 = vmatpush3.bf16.msra.mxu0 %v891_v3  ;;  %v896_v8 = vld [vmem:[%s996_s27 + $0x60] sm:$0xff]   ;;  %v898_v10 = vld [vmem:[%s996_s27 + $0x58] sm:$0xff]   ;;  %v902_v11 = vld [vmem:[%s996_s27 + $0x88] sm:$0xff]  }
  0x13   : > { %829 = vmatprep.subr.bf16.mxu0 %v892_v4  ;;  %v897_v9 = vld [vmem:[%s996_s27 + $0x20] sm:$0xff]   ;;  %v899_v12 = vld [vmem:[%s996_s27 + $0x18] sm:$0xff]   ;;  %853 = vmatpush3.bf16.msra.mxu1 %v902_v11  ;;  %v900_v14 = vld [vmem:[%s996_s27 + $0x50] sm:$0xff]  }
  0x14   : > { %854 = vmatprep.subr.bf16.mxu1 %v936_v0  ;;  %v905_v13 = vld [vmem:[%s996_s27 + $0x80] sm:$0xff]   ;;  %v901_v16 = vld [vmem:[%s996_s27 + $0x10] sm:$0xff]   ;;  %v903_v17 = vld [vmem:[%s996_s27 + $0x48] sm:$0xff]  }
  0x15   : > { %v904_v18 = vld [vmem:[%s996_s27 + $0x8] sm:$0xff]   ;;  %v906_v19 = vld [vmem:[%s996_s27 + $0x40] sm:$0xff]  }
  0x16   : > { %830 = vmatpush3.bf16.msra.mxu0 %v893_v5  ;;  %v907_v20 = vld [vmem:[%s996_s27] sm:$0xff]  }
  0x17   : > { %831 = vmatprep.subr.bf16.mxu0 %v894_v6  ;;  %855 = vmatpush3.bf16.msra.mxu1 %v905_v13 }
  0x1a   : > { %832 = vmatpush3.bf16.msra.mxu0 %v895_v7  ;;  %857 = vmatmul.mubr.msk.bf16.vlgmr.msra.gmra.mxu1 %vm465_vm1, %v908_v15 }
  0x1b   : > { %833 = vmatprep.subr.bf16.mxu0 %v896_v8 }
  0x1e   : > { %834 = vmatpush3.bf16.msra.mxu0 %v897_v9 }
  0x1f   : > { %835 = vmatprep.subr.bf16.mxu0 %v898_v10 }
  0x22   : > { %836 = vmatpush3.bf16.msra.mxu0 %v899_v12 }
  0x23   : > { %837 = vmatprep.subr.bf16.mxu0 %v900_v14 }
  0x26   : > { %838 = vmatpush3.bf16.msra.mxu0 %v901_v16 }
  0x27   : > { %839 = vmatprep.subr.bf16.mxu0 %v903_v17 }
  0x2a   : > { %840 = vmatpush3.bf16.msra.mxu0 %v904_v18 }
  0x2b   : > { %841 = vmatprep.subr.bf16.mxu0 %v906_v19 }
  0x2e   : > { %842 = vmatpush3.bf16.msra.mxu0 %v907_v20 }
  0x31   : > { %502 = vmatmul.mubr.bf16.vlgmr.msra.gmra.mxu0 %v909_v21 }
  0xda   : > { %v544_v23 = vpop.f32.mrf.mxu1 }
  0xdc   : > { %v858_v24 = vpop.f32.mrf.mxu1 }
  0xde   : > { %v547_v25 = vpop.f32.mrf.mxu1 }
  0xe0   : > { %v859_v26 = vpop.f32.mrf.mxu1 }
  0xf1   : > { %v843_v27 = vpop.f32.mrf.mxu0 }
  0xf3   : > { %v844_v28 = vpop.f32.mrf.mxu0 }
  0xf4   : > { %v845_v29 = vadd.f32 %v844_v28, %v843_v27 }
  0xf5   : > { %v846_v30 = vpop.f32.mrf.mxu0 }
  0xf6   : > { %v545_v31 = vadd.f32 %v845_v29, %v544_v23 }
  0xf7   : > { %v847_v32 = vpop.f32.mrf.mxu0 }
  0xf8   : > { %v848_v33 = vadd.f32 %v847_v32, %v846_v30  ;;  %551 = vadd.xlane.f32.xlu0 %v545_v31  ;;  %v558_v34 = vmul.f32 %v545_v31, %v545_v31 }
  0xfa   : > { %v548_v35 = vadd.f32 %v848_v33, %v547_v25  ;;  %560 = vadd.xlane.f32.xlu1 %v558_v34 }
  0xfc   : > { %553 = vadd.xlane.f32.xlu0 %v548_v35  ;;  %v559_v36 = vmul.f32 %v548_v35, %v548_v35 }
  0xfe   : > { %562 = vadd.xlane.f32.xlu1 %v559_v36 }
 0x10f   : > { %575 = vperm.xlu1 %889, %v567_v37  }
 0x112   : > { %570 = vperm.xlu0 %888, %v566_v38  }
 0x181   : > { %v552_v39 = vpop.xlane.xlu0 %551 }
 0x182   : > { %556 = vst.msk [vmem:[%s291_s14] sm:$0xff] %vm555_vm2, %v552_v39 }
 0x183   : > { %v561_v40 = vpop.xlane.xlu1 %560 }
 0x184   : > { %564 = vst.msk [vmem:[%s300_s17] sm:$0xff] %vm555_vm2, %v561_v40 }
 0x185   : > { %v554_v41 = vpop.xlane.xlu0 %553 }
 0x186   : > { %557 = vst.msk [vmem:[%s291_s14 + $0x8] sm:$0xff] %vm555_vm2, %v554_v41 }
 0x187   : > { %v563_v42 = vpop.xlane.xlu1 %562 }
 0x188   : > { %565 = vst.msk [vmem:[%s300_s17 + $0x8] sm:$0xff] %vm555_vm2, %v563_v42 }
 0x18b   : > { %v576_v43 = vpop.permute.xlu1 %575 }
 0x18c   : > { %v579_v45 = vadd.f32 %v576_v43, %v548_v35 }
 0x18d   : > { %v571_v44 = vpop.permute.xlu0 %570 }
 0x18e   : > { %v578_v46 = vadd.f32 %v571_v44, %v545_v31 }
 0x190   : > { %v825_v47 = vpack.c.bf16 %v579_v45, %v578_v46 }
 0x192   : > { %826 = vst [vmem:[%s282_s25] sm:$0xff] %v825_v47  }
 0x193 PF: > { %s16_s20 = sadd.s32 1, %s934_s20   ;;  %s1054_s18 = smov %s930_s19 }
 0x194   : > { %p13_p5 = scmp.ge.s32.totalorder %s16_s20, 4   ;;  %s1055_s19 = smov %s1057_s21 }
 0x196   :  { %15 = sbr.rel (!%p13_p5) target bundleno = 2 (0x2), region = 86 }

// kernel: transform_net_forward.59
= control target key start
LH: loop header
LB: loop body
LE: loop exit
PB: predicated region body
PF: predicated region fallthrough
CT: control target
= control target key end

     0   :  { %s807_s18 = smov 0   ;;  %s809_s19 = smov 0   ;;  %s876_s0 = inlined_call_operand.vmem [shape: bf16[8,144], index: 0, kind: input, shape index: {}]   ;;  %s877_s1 = inlined_call_operand.vmem [shape: bf16[2,144,256], index: 1, kind: input, shape index: {}]   ;;  %s878_s2 = inlined_call_operand.vmem [shape: f32[8,1], index: 2, kind: input, shape index: {}]   ;;  %s879_s3 = inlined_call_operand.vmem [shape: bf16[2,8,256], index: 3, kind: output, shape index: {0}]   ;;  %s880_s4 = inlined_call_operand.vmem [shape: f32[2,1,8,1], index: 4, kind: output, shape index: {1}]   ;;  %s881_s5 = inlined_call_operand.vmem [shape: f32[2,1,8,1], index: 5, kind: output, shape index: {2}]  }
   0x1   :  { %s811_s20 = smov 0  }
   0x2 LB: > { %s28_s21 = sadd.s32 1, %s770_s19  ;;  %p663_p0 = scmp.ge.s32.totalorder %s774_s20, 1  ;;  %s774_s20 = sphi %s811_s20, %s16_s20   ;;  %s770_s19 = sphi %s809_s19, %s883_s19   ;;  %s766_s18 = sphi %s807_s18, %s882_s18  }
   0x3   : > { %p30_p1 = scmp.ge.s32.totalorder %s28_s21, 2  ;;  %p217_p2 = scmp.lt.s32.totalorder %s774_s20, 3 }
   0x5   : > { %s885_s21 = smov (%p30_p1, %s28_s21), 0  ;;  %p218_p3 = pnand %p663_p0, %p217_p2 }
   0x6   : > { %p268_p4 = scmp.lt.s32.totalorder (!%p218_p3), %s766_s18, 1 }
   0x7   : > { %221 = sbr.rel (%p218_p3) target bundleno = 393 (0x189), region = 32 }
   0xc   : > { %v302_v0 = vld [vmem:[%s876_s0] sm:$0xff]  ;;  %vm417_vm0 = vcmask 130048   ;;  %v776_v3 = vmov 0   ;;  %s887_s18 = smov (!%p268_p4, %s766_s18), 1  ;;  %vm465_vm1 = vcmask 7168  }
   0xd   : > { %v473_v1 = vld [vmem:[%s878_s2] sm:$0xff]  ;;  %v670_v2 = vcombine.high %v302_v0, %v302_v0  ;;  %721 = vset.pattern.permute.xlu1 %v776_v3  ;;  %722 = vset.pattern.permute.xlu0 %v776_v3  ;;  %s695_s26 = smul.u32 144, %s887_s18  ;;  %v669_v22 = vcombine.low %v302_v0, %v302_v0  ;;  %s693_s30 = sshll.u32 %s887_s18, 3 }
   0xe   : > { %476 = vperm.xlu1 %721, %v473_v1   ;;  %s285_s8 = scalar_lea.vmem %s879_s3, %s693_s30  ;;  %s293_s11 = scalar_lea.vmem %s880_s4, %s693_s30 }
   0xf   : > { %689 = vmatprep.mubr.msk.bf16.mxu0 %vm417_vm0, %v670_v2  ;;  %s837_s29 = scalar_lea.vmem %s877_s1, %s695_s26  ;;  %s300_s14 = scalar_lea.vmem %s881_s5, %s693_s30 }
  0x10   : > { %v723_v4 = vld [vmem:[%s837_s29 + $0x74] ss:$8 sps:$4 sm:$0xff]   ;;  %v725_v5 = vld [vmem:[%s837_s29 + $0x70] ss:$8 sps:$4 sm:$0xff]   ;;  %v726_v6 = vld [vmem:[%s837_s29 + $0x64] ss:$8 sps:$4 sm:$0xff]  }
  0x11   : > { %421 = vmatprep.subr.bf16.mxu0 %v723_v4  ;;  %v728_v7 = vld [vmem:[%s837_s29 + $0x60] ss:$8 sps:$4 sm:$0xff]   ;;  %v729_v8 = vld [vmem:[%s837_s29 + $0x54] ss:$8 sps:$4 sm:$0xff]   ;;  %v731_v9 = vld [vmem:[%s837_s29 + $0x50] ss:$8 sps:$4 sm:$0xff]  }
  0x12   : > { %422 = vmatpush1.bf16.msra.mxu0 %v725_v5  ;;  %v732_v10 = vld [vmem:[%s837_s29 + $0x44] ss:$8 sps:$4 sm:$0xff]   ;;  %v734_v11 = vld [vmem:[%s837_s29 + $0x40] ss:$8 sps:$4 sm:$0xff]   ;;  %v735_v12 = vld [vmem:[%s837_s29 + $0x34] ss:$8 sps:$4 sm:$0xff]  }
  0x13   : > { %423 = vmatprep.subr.bf16.mxu0 %v726_v6  ;;  %v737_v13 = vld [vmem:[%s837_s29 + $0x30] ss:$8 sps:$4 sm:$0xff]   ;;  %v738_v14 = vld [vmem:[%s837_s29 + $0x24] ss:$8 sps:$4 sm:$0xff]   ;;  %v740_v15 = vld [vmem:[%s837_s29 + $0x20] ss:$8 sps:$4 sm:$0xff]  }
  0x14   : > { %v741_v16 = vld [vmem:[%s837_s29 + $0x14] ss:$8 sps:$4 sm:$0xff]   ;;  %v743_v17 = vld [vmem:[%s837_s29 + $0x10] ss:$8 sps:$4 sm:$0xff]   ;;  %v744_v18 = vld [vmem:[%s837_s29 + $0x4] ss:$8 sps:$4 sm:$0xff]  }
  0x15   : > { %v746_v19 = vld [vmem:[%s837_s29] ss:$8 sps:$4 sm:$0xff]   ;;  %v747_v20 = vld [vmem:[%s837_s29 + $0x84] ss:$8 sps:$4 sm:$0xff]  }
  0x16   : > { %424 = vmatpush1.bf16.msra.mxu0 %v728_v7  ;;  %v749_v21 = vld [vmem:[%s837_s29 + $0x80] ss:$8 sps:$4 sm:$0xff]  }
  0x17   : > { %425 = vmatprep.subr.bf16.mxu0 %v729_v8 }
  0x1a   : > { %426 = vmatpush1.bf16.msra.mxu0 %v731_v9 }
  0x1b   : > { %427 = vmatprep.subr.bf16.mxu0 %v732_v10 }
  0x1e   : > { %428 = vmatpush1.bf16.msra.mxu0 %v734_v11 }
  0x1f   : > { %429 = vmatprep.subr.bf16.mxu0 %v735_v12 }
  0x22   : > { %430 = vmatpush1.bf16.msra.mxu0 %v737_v13 }
  0x23   : > { %431 = vmatprep.subr.bf16.mxu0 %v738_v14 }
  0x26   : > { %432 = vmatpush1.bf16.msra.mxu0 %v740_v15 }
  0x27   : > { %433 = vmatprep.subr.bf16.mxu0 %v741_v16 }
  0x2a   : > { %434 = vmatpush1.bf16.msra.mxu0 %v743_v17 }
  0x2b   : > { %435 = vmatprep.subr.bf16.mxu0 %v744_v18 }
  0x2e   : > { %436 = vmatpush1.bf16.msra.mxu0 %v746_v19 }
  0x2f   : > { %451 = vmatprep.subr.bf16.mxu0 %v747_v20 }
  0x32   : > { %452 = vmatpush2.bf16.msra.mxu0 %v749_v21 }
  0x35   : > { %454 = vmatmul.mubr.bf16.vlgmr.msra.gmra.mxu0 %v669_v22 }
  0x89   : > { %v477_v23 = vpop.permute.xlu1 %476 }
  0xf5   : > { %v455_v24 = vpop.f32.mrf.mxu0 }
  0xf6   : > { %v479_v26 = vadd.f32 %v477_v23, %v455_v24  ;;  %v467_v32 = vmul.f32 %v455_v24, %v455_v24 }
  0xf7   : > { %v457_v25 = vpop.f32.mrf.mxu0 }
  0xf8   : > { %v480_v27 = vadd.f32 %v477_v23, %v457_v25  ;;  %v462_v28 = vadd.f32 %v457_v25, %v455_v24  ;;  %v468_v29 = vmul.f32 %v457_v25, %v457_v25 }
  0xf9   : > { %v459_v30 = vpop.f32.mrf.mxu0 }
  0xfa   : > { %v694_v31 = vpack.c.bf16 %v480_v27, %v479_v26  ;;  %463 = vadd.xlane.f32.xlu0 %v462_v28  ;;  %v469_v34 = vadd.f32 %v468_v29, %v467_v32 }
  0xfb   : > { %v460_v33 = vpop.f32.mrf.mxu0 }
  0xfc   : > { %489 = vst [vmem:[%s285_s8] sm:$0xff] %v694_v31 }
  0xfe   : > { %470 = vadd.xlane.f32.xlu0 %v469_v34 }
 0x183   : > { %v464_v35 = vpop.xlane.xlu0 %463 }
 0x184   : > { %466 = vst.msk [vmem:[%s293_s11] sm:$0xff] %vm465_vm1, %v464_v35 }
 0x187   : > { %v471_v36 = vpop.xlane.xlu0 %470 }
 0x188   : > { %472 = vst.msk [vmem:[%s300_s14] sm:$0xff] %vm465_vm1, %v471_v36 }
 0x189 PF: > { %s16_s20 = sadd.s32 1, %s774_s20   ;;  %s882_s18 = smov %s770_s19 }
 0x18a   : > { %p13_p5 = scmp.ge.s32.totalorder %s16_s20, 4   ;;  %s883_s19 = smov %s885_s21 }
 0x18c   :  { %15 = sbr.rel (!%p13_p5) target bundleno = 2 (0x2), region = 86 }

// kernel: transform_net_forward.61
= control target key start
LH: loop header
LB: loop body
LE: loop exit
PB: predicated region body
PF: predicated region fallthrough
CT: control target
= control target key end

     0   :  { %11 = vsyncpa [#allocation3], 0  ;;  %s1856_s0 = inlined_call_operand.vmem [shape: bf16[3,648], index: 0, kind: input, shape index: {}]   ;;  %s1857_s1 = inlined_call_operand.vmem [shape: bf16[2,648,256], index: 1, kind: input, shape index: {}]   ;;  %s1858_s2 = inlined_call_operand.vmem [shape: f32[3,1], index: 2, kind: input, shape index: {}]   ;;  %s1859_s3 = inlined_call_operand.vmem [shape: f32[2,3,256], index: 3, kind: output, shape index: {0}]   ;;  %s1860_s4 = inlined_call_operand.hbm [shape: f32[2,1,3,1], index: 4, kind: output, shape index: {1}]   ;;  %s1861_s5 = inlined_call_operand.hbm [shape: f32[2,1,3,1], index: 5, kind: output, shape index: {2}]  }
   0x1   :  { %13 = vsyncpa [#allocation3 + $0x1], 0 }
   0x2   :  { %14 = vsyncpa [#allocation5], 0 }
   0x3   :  { %16 = vsyncpa [#allocation5 + $0x1], 0  ;;  %s1596_s18 = smov 0   ;;  %s1598_s19 = smov 0  }
   0x4   :  { %s1600_s20 = smov 0   ;;  %s1602_s21 = smov 0  }
   0x5   :  { %s1604_s22 = smov 0   ;;  %s1606_s23 = smov 0  }
   0x6 LB: > { %s1164_s24 = sadd.s32 4294967295, %s1560_s23   ;;  %s1165_s25 = sadd.s32 4294967294, %s1560_s23   ;;  %s1560_s23 = sphi %s1606_s23, %s22_s23   ;;  %s1556_s22 = sphi %s1604_s22, %s1870_s22   ;;  %s1552_s21 = sphi %s1602_s21, %s1869_s21   ;;  %s1548_s20 = sphi %s1600_s20, %s1868_s20   ;;  %s1544_s19 = sphi %s1598_s19, %s1867_s19   ;;  %s1540_s18 = sphi %s1596_s18, %s1866_s18  }
   0x7   : > { %s34_s26 = sadd.s32 1, %s1556_s22  ;;  %s141_s27 = sadd.s32 1, %s1548_s20 }
   0x8   : > { %p36_p0 = scmp.ge.s32.totalorder %s34_s26, 2  ;;  %p151_p1 = scmp.ne.s32.totalorder %s1548_s20, %s1544_s19 }
   0x9   : > { %p152_p2 = scmp.eq.s32.totalorder %s1164_s24, 1  ;;  %p157_p3 = scmp.ne.s32.totalorder %s1544_s19, %s1540_s18 }
   0xa   : > { %s1872_s26 = smov (%p36_p0, %s34_s26), 0  ;;  %p158_p5 = scmp.eq.s32.totalorder %s1165_s25, 1 }
   0xb   : > { %p1636_p4 = por %p152_p2, %p151_p1  ;;  %s136_s29 = ssub.s32 %s1556_s22, %s1872_s26 }
   0xc   : > { %p1168_p6 = scmp.ge.s32.totalorder %s1560_s23, 1  ;;  %p139_p7 = scmp.eq.s32.totalorder %s136_s29, 0 }
   0xd   : > { %p1643_p8 = por %p158_p5, %p157_p3  ;;  %p223_p9 = scmp.lt.s32.totalorder %s1560_s23, 3 }
   0xe   : > { %s1649_s6 = scalar_select %p139_p7, %s1548_s20, %s141_s27  }
   0xf   : > { %p224_p10 = pnand %p1168_p6, %p223_p9 }
  0x10   : > { %p270_p11 = scmp.lt.s32.totalorder (!%p224_p10), %s1552_s21, 1  ;;  %s1770_s7 = sand.u32 (!%p224_p10), 1, %s1544_s19  }
  0x11   : > { %227 = sbr.rel (%p224_p10) target bundleno = 503 (0x1f7), region = 32  ;;  %s1169_s8 = sshll.u32 (!%p224_p10), %s1770_s7, 2 }
  0x12   : > { %s261_s10 = scalar_lea.vmem (!%p224_p10), [#allocation2], %s1169_s8  ;;  %s983_s17 = scalar_lea.sflag (!%p224_p10), [#allocation3], %s1770_s7 }
  0x13   : > { %s1006_s11 = sshll.u32 (!%p224_p10), %s261_s10, 4  ;;  %s1564_s25 = smov (!%p224_p10), [#allocation2]   ;;  %s1781_s11 = int_to_ptr.vmem [resolvable:$true] %s1006_s11 }
  0x14   : > { %s1458_s27 = sshll.u32 (!%p224_p10), %s1564_s25, 4  ;;  %s1459_s27 = int_to_ptr.vmem [resolvable:$false] %s1458_s27 }
  0x15   : > { %p1461_p1 = scmp.lt.s32.totalorder (!%p224_p10), %s1781_s11, %s1459_s27 }
  0x16   : > { %v290_v0 = vld [vmem:[%s1856_s0] sm:$0xff]  ;;  %v379_v1 = vlaneseq  ;;  %v1562_v2 = vmov 1983009808   ;;  %s1656_s9 = scalar_select %p270_p11, %s1552_s21, 1  ;;  %v1563_v5 = vmov 0   ;;  %vm810_vm0 = vcmask 64512  }
  0x17   : > { %v377_v3 = vunpack.c.l.s4 %v1562_v2  ;;  %1329 = vset.pattern.permute.xlu1 %v1563_v5  ;;  %v960_v6 = vld [vmem:[%s1858_s2] sm:$0x7]  ;;  %1330 = vset.pattern.permute.xlu0 %v1563_v5  ;;  %v375_v8 = vcombine.high %v290_v0, %v290_v0  ;;  %vm814_vm1 = vcmask 1043456   ;;  %vm944_vm2 = vcmask 1042432  }
  0x18   : > { %v380_v4 = vshrl.u32 %v379_v1, 7  ;;  %963 = vperm.xlu1 %1329, %v960_v6   ;;  %s1266_s12 = smul.u32 648, %s1656_s9  ;;  %s1265_s24 = sshll.u32 %s1656_s9, 3  ;;  %vm950_vm3 = vcmask 2048  }
  0x19   : > { %v378_v7 = vunpack.c.0.s8 %v377_v3  ;;  %s287_s29 = scalar_lea.vmem %s1859_s3, %s1265_s24  ;;  %s1862_s9 = sshll.u32 %s1552_s21, 6 }
  0x1a   : > { %s1665_s15 = scalar_lea.vmem %s1857_s1, %s1266_s12  ;;  %s1779_s14 = scalar_lea.hbm %s1860_s4, %s1862_s9 }
  0x1b   : > { %v381_v9 = vsub.s32 %v378_v7, %v380_v4  ;;  %v1331_v10 = vld [vmem:[%s1665_s15 + $0x74] ss:$8 sps:$4 sm:$0xff]   ;;  %v1335_v14 = vld [vmem:[%s1665_s15 + $0x70] ss:$8 sps:$4 sm:$0xff]   ;;  %v1337_v18 = vld [vmem:[%s1665_s15 + $0x64] ss:$8 sps:$4 sm:$0xff]  }
  0x1c   : > { %v1333_v13 = vld [vmem:[%s1665_s15 + $0x174] ss:$8 sps:$4 sm:$0xff]   ;;  %821 = vmatprep.subr.bf16.mxu0 %v1331_v10  ;;  %v1336_v15 = vld [vmem:[%s1665_s15 + $0x170] ss:$8 sps:$4 sm:$0xff]   ;;  %v1339_v19 = vld [vmem:[%s1665_s15 + $0x164] ss:$8 sps:$4 sm:$0xff]  }
  0x1d   : > { %v1668_v11 = vrot.slane %v290_v0, %v381_v9  ;;  %v1670_v12 = vrot.slane %v375_v8, %v381_v9  ;;  %862 = vmatprep.subr.bf16.mxu1 %v1333_v13  ;;  %822 = vmatpush1.bf16.msra.mxu0 %v1335_v14  ;;  %v1341_v20 = vld [vmem:[%s1665_s15 + $0x60] ss:$8 sps:$4 sm:$0xff]   ;;  %v1343_v22 = vld [vmem:[%s1665_s15 + $0x54] ss:$8 sps:$4 sm:$0xff]   ;;  %v1347_v24 = vld [vmem:[%s1665_s15 + $0x50] ss:$8 sps:$4 sm:$0xff]  }
  0x1e   : > { %863 = vmatpush1.bf16.msra.mxu1 %v1336_v15  ;;  %823 = vmatprep.subr.bf16.mxu0 %v1337_v18  ;;  %v1342_v21 = vld [vmem:[%s1665_s15 + $0x160] ss:$8 sps:$4 sm:$0xff]   ;;  %v1345_v23 = vld [vmem:[%s1665_s15 + $0x154] ss:$8 sps:$4 sm:$0xff]   ;;  %v1348_v25 = vld [vmem:[%s1665_s15 + $0x150] ss:$8 sps:$4 sm:$0xff]  }
  0x1f   : > { %v390_v16 = vcombine.high %v1668_v11, %v1668_v11  ;;  %v391_v17 = vcombine.high %v1670_v12, %v1670_v12  ;;  %864 = vmatprep.subr.bf16.mxu1 %v1339_v19  ;;  %v1349_v26 = vld [vmem:[%s1665_s15 + $0x44] ss:$8 sps:$4 sm:$0xff]   ;;  %v1353_v28 = vld [vmem:[%s1665_s15 + $0x40] ss:$8 sps:$4 sm:$0xff]   ;;  %v1355_v30 = vld [vmem:[%s1665_s15 + $0x34] ss:$8 sps:$4 sm:$0xff]  }
  0x20   : > { %v1351_v27 = vld [vmem:[%s1665_s15 + $0x144] ss:$8 sps:$4 sm:$0xff]   ;;  %v1354_v29 = vld [vmem:[%s1665_s15 + $0x140] ss:$8 sps:$4 sm:$0xff]   ;;  %v1357_v31 = vld [vmem:[%s1665_s15 + $0x134] ss:$8 sps:$4 sm:$0xff]  }
  0x21   : > { %853 = vmatprep.mubr.bf16.mxu0 %v390_v16  ;;  %894 = vmatprep.mubr.bf16.mxu1 %v391_v17  ;;  %v1359_v32 = vld [vmem:[%s1665_s15 + $0x30] ss:$8 sps:$4 sm:$0xff]   ;;  %v1361_v34 = vld [vmem:[%s1665_s15 + $0x24] ss:$8 sps:$4 sm:$0xff]   ;;  %v1365_v36 = vld [vmem:[%s1665_s15 + $0x20] ss:$8 sps:$4 sm:$0xff]  }
  0x22   : > { %824 = vmatpush1.bf16.msra.mxu0 %v1341_v20  ;;  %865 = vmatpush1.bf16.msra.mxu1 %v1342_v21  ;;  %v1360_v33 = vld [vmem:[%s1665_s15 + $0x130] ss:$8 sps:$4 sm:$0xff]   ;;  %v1363_v35 = vld [vmem:[%s1665_s15 + $0x124] ss:$8 sps:$4 sm:$0xff]   ;;  %v1366_v37 = vld [vmem:[%s1665_s15 + $0x120] ss:$8 sps:$4 sm:$0xff]  }
  0x23   : > { %825 = vmatprep.subr.bf16.mxu0 %v1343_v22  ;;  %866 = vmatprep.subr.bf16.mxu1 %v1345_v23  ;;  %v1367_v38 = vld [vmem:[%s1665_s15 + $0x14] ss:$8 sps:$4 sm:$0xff]   ;;  %v1371_v40 = vld [vmem:[%s1665_s15 + $0x10] ss:$8 sps:$4 sm:$0xff]   ;;  %v1373_v42 = vld [vmem:[%s1665_s15 + $0x4] ss:$8 sps:$4 sm:$0xff]  }
  0x24   : > { %v1369_v39 = vld [vmem:[%s1665_s15 + $0x114] ss:$8 sps:$4 sm:$0xff]   ;;  %v1372_v41 = vld [vmem:[%s1665_s15 + $0x110] ss:$8 sps:$4 sm:$0xff]   ;;  %v1375_v43 = vld [vmem:[%s1665_s15 + $0x104] ss:$8 sps:$4 sm:$0xff]  }
  0x25   : > { %v1377_v44 = vld [vmem:[%s1665_s15] ss:$8 sps:$4 sm:$0xff]   ;;  %v1379_v46 = vld [vmem:[%s1665_s15 + $0xf4] ss:$8 sps:$4 sm:$0xff]   ;;  %v1383_v48 = vld [vmem:[%s1665_s15 + $0xf0] ss:$8 sps:$4 sm:$0xff]  }
  0x26   : > { %826 = vmatpush1.bf16.msra.mxu0 %v1347_v24  ;;  %867 = vmatpush1.bf16.msra.mxu1 %v1348_v25  ;;  %v1378_v45 = vld [vmem:[%s1665_s15 + $0x100] ss:$8 sps:$4 sm:$0xff]   ;;  %v1381_v47 = vld [vmem:[%s1665_s15 + $0x1f4] ss:$8 sps:$4 sm:$0xff]   ;;  %v1384_v49 = vld [vmem:[%s1665_s15 + $0x1f0] ss:$8 sps:$4 sm:$0xff]  }
  0x27   : > { %827 = vmatprep.subr.bf16.mxu0 %v1349_v26  ;;  %868 = vmatprep.subr.bf16.mxu1 %v1351_v27  ;;  %v1385_v50 = vld [vmem:[%s1665_s15 + $0xe4] ss:$8 sps:$4 sm:$0xff]   ;;  %v1389_v52 = vld [vmem:[%s1665_s15 + $0xe0] ss:$8 sps:$4 sm:$0xff]   ;;  %v1391_v54 = vld [vmem:[%s1665_s15 + $0xd4] ss:$8 sps:$4 sm:$0xff]  }
  0x28   : > { %v1387_v51 = vld [vmem:[%s1665_s15 + $0x1e4] ss:$8 sps:$4 sm:$0xff]   ;;  %v1390_v53 = vld [vmem:[%s1665_s15 + $0x1e0] ss:$8 sps:$4 sm:$0xff]   ;;  %v1393_v55 = vld [vmem:[%s1665_s15 + $0x1d4] ss:$8 sps:$4 sm:$0xff]  }
  0x29   : > { %v1395_v56 = vld [vmem:[%s1665_s15 + $0xd0] ss:$8 sps:$4 sm:$0xff]   ;;  %v1397_v58 = vld [vmem:[%s1665_s15 + $0xc4] ss:$8 sps:$4 sm:$0xff]   ;;  %v1401_v60 = vld [vmem:[%s1665_s15 + $0xc0] ss:$8 sps:$4 sm:$0xff]  }
  0x2a   : > { %828 = vmatpush1.bf16.msra.mxu0 %v1353_v28  ;;  %869 = vmatpush1.bf16.msra.mxu1 %v1354_v29  ;;  %v1396_v57 = vld [vmem:[%s1665_s15 + $0x1d0] ss:$8 sps:$4 sm:$0xff]   ;;  %v1399_v59 = vld [vmem:[%s1665_s15 + $0x1c4] ss:$8 sps:$4 sm:$0xff]   ;;  %v1402_v61 = vld [vmem:[%s1665_s15 + $0x1c0] ss:$8 sps:$4 sm:$0xff]  }
  0x2b   : > { %829 = vmatprep.subr.bf16.mxu0 %v1355_v30  ;;  %870 = vmatprep.subr.bf16.mxu1 %v1357_v31  ;;  %v1403_v62 = vld [vmem:[%s1665_s15 + $0xb4] ss:$8 sps:$4 sm:$0xff]   ;;  %v1407_v0 = vld [vmem:[%s1665_s15 + $0xb0] ss:$8 sps:$4 sm:$0xff]   ;;  %v1409_v2 = vld [vmem:[%s1665_s15 + $0xa4] ss:$8 sps:$4 sm:$0xff]  }
  0x2c   : > { %v1405_v63 = vld [vmem:[%s1665_s15 + $0x1b4] ss:$8 sps:$4 sm:$0xff]   ;;  %v1408_v1 = vld [vmem:[%s1665_s15 + $0x1b0] ss:$8 sps:$4 sm:$0xff]   ;;  %v1411_v3 = vld [vmem:[%s1665_s15 + $0x1a4] ss:$8 sps:$4 sm:$0xff]  }
  0x2d   : > { %v1413_v4 = vld [vmem:[%s1665_s15 + $0xa0] ss:$8 sps:$4 sm:$0xff]   ;;  %v1415_v6 = vld [vmem:[%s1665_s15 + $0x94] ss:$8 sps:$4 sm:$0xff]   ;;  %v1419_v8 = vld [vmem:[%s1665_s15 + $0x90] ss:$8 sps:$4 sm:$0xff]  }
  0x2e   : > { %830 = vmatpush1.bf16.msra.mxu0 %v1359_v32  ;;  %871 = vmatpush1.bf16.msra.mxu1 %v1360_v33  ;;  %v1414_v5 = vld [vmem:[%s1665_s15 + $0x1a0] ss:$8 sps:$4 sm:$0xff]   ;;  %v1417_v7 = vld [vmem:[%s1665_s15 + $0x194] ss:$8 sps:$4 sm:$0xff]   ;;  %v1420_v9 = vld [vmem:[%s1665_s15 + $0x190] ss:$8 sps:$4 sm:$0xff]  }
  0x2f   : > { %831 = vmatprep.subr.bf16.mxu0 %v1361_v34  ;;  %872 = vmatprep.subr.bf16.mxu1 %v1363_v35  ;;  %v1421_v10 = vld [vmem:[%s1665_s15 + $0x84] ss:$8 sps:$4 sm:$0xff]   ;;  %v1425_v14 = vld [vmem:[%s1665_s15 + $0x80] ss:$8 sps:$4 sm:$0xff]   ;;  %v1430_v16 = vld [vmem:[%s1665_s15 + $0x274] ss:$8 sps:$4 sm:$0xff]  }
  0x30   : > { %v1423_v13 = vld [vmem:[%s1665_s15 + $0x184] ss:$8 sps:$4 sm:$0xff]   ;;  %v1426_v15 = vld [vmem:[%s1665_s15 + $0x180] ss:$8 sps:$4 sm:$0xff]   ;;  %v1428_v18 = vld [vmem:[%s1665_s15 + $0x270] ss:$8 sps:$4 sm:$0xff]  }
  0x31   : > { %v1174_v17 = vld.sshfl [vmem:[%s1856_s0 + $0x8] sm:$0x33 pattern:$0x76325410]  ;;  %v1433_v20 = vld [vmem:[%s1665_s15 + $0x264] ss:$8 sps:$4 sm:$0xff]  }
  0x32   : > { %832 = vmatpush1.bf16.msra.mxu0 %v1365_v36  ;;  %873 = vmatpush1.bf16.msra.mxu1 %v1366_v37  ;;  %v399_v19 = vcombine.high %v1174_v17, %v1174_v17  ;;  %v1431_v21 = vld [vmem:[%s1665_s15 + $0x260] ss:$8 sps:$4 sm:$0xff]   ;;  %v1436_v22 = vld [vmem:[%s1665_s15 + $0x254] ss:$8 sps:$4 sm:$0xff]   ;;  %v1434_v23 = vld [vmem:[%s1665_s15 + $0x250] ss:$8 sps:$4 sm:$0xff]  }
  0x33   : > { %833 = vmatprep.subr.bf16.mxu0 %v1367_v38  ;;  %874 = vmatprep.subr.bf16.mxu1 %v1369_v39  ;;  %v1439_v24 = vld [vmem:[%s1665_s15 + $0x244] ss:$8 sps:$4 sm:$0xff]   ;;  %v1440_v25 = vld [vmem:[%s1665_s15 + $0x230] ss:$8 sps:$4 sm:$0xff]   ;;  %v1443_v27 = vld [vmem:[%s1665_s15 + $0x220] ss:$8 sps:$4 sm:$0xff]  }
  0x34   : > { %v1445_v26 = vld [vmem:[%s1665_s15 + $0x224] ss:$8 sps:$4 sm:$0xff]   ;;  %v1448_v28 = vld [vmem:[%s1665_s15 + $0x214] ss:$8 sps:$4 sm:$0xff]   ;;  %v1446_v29 = vld [vmem:[%s1665_s15 + $0x210] ss:$8 sps:$4 sm:$0xff]  }
  0x35   : > { %v1451_v30 = vld [vmem:[%s1665_s15 + $0x204] ss:$8 sps:$4 sm:$0xff]   ;;  %v1449_v32 = vld [vmem:[%s1665_s15 + $0x200] ss:$8 sps:$4 sm:$0xff]   ;;  %s1454_s24 = scalar_lea.vmem %s1781_s11, 64 }
  0x36   : > { %834 = vmatpush1.bf16.msra.mxu0 %v1371_v40  ;;  %875 = vmatpush1.bf16.msra.mxu1 %v1372_v41  ;;  %v372_v31 = vld [vmem:[%s1665_s15 + $0x280] sm:$0xff]  ;;  %p1455_p12 = scmp.ne.s32.totalorder %s1781_s11, %s1454_s24 }
  0x37   : > { %835 = vmatprep.subr.bf16.mxu0 %v1373_v42  ;;  %876 = vmatprep.subr.bf16.mxu1 %v1375_v43  ;;  %v1256_v33 = vcombine.high %v372_v31, %v372_v31  ;;  %v1255_v34 = vcombine.low %v372_v31, %v372_v31 }
  0x38   : > { %p1456_p13 = pnand %p1455_p12, %p1636_p4 }
  0x39   : > { %v816_v35 = vsel %vm814_vm1, %v1255_v34, 0 }
  0x3a   : > { %836 = vmatpush1.bf16.msra.mxu0 %v1377_v44  ;;  %877 = vmatpush1.bf16.msra.mxu1 %v1378_v45  ;;  %p1457_p0 = pneg %p1456_p13 }
  0x3b   : > { %837 = vmatprep.subr.bf16.mxu0 %v1379_v46  ;;  %878 = vmatprep.subr.bf16.mxu1 %v1381_v47 }
  0x3e   : > { %838 = vmatpush2.bf16.msra.mxu0 %v1383_v48  ;;  %879 = vmatpush2.bf16.msra.mxu1 %v1384_v49 }
  0x3f   : > { %839 = vmatprep.subr.bf16.mxu0 %v1385_v50  ;;  %880 = vmatprep.subr.bf16.mxu1 %v1387_v51 }
  0x42   : > { %840 = vmatpush2.bf16.msra.mxu0 %v1389_v52  ;;  %881 = vmatpush2.bf16.msra.mxu1 %v1390_v53 }
  0x43   : > { %841 = vmatprep.subr.bf16.mxu0 %v1391_v54  ;;  %882 = vmatprep.subr.bf16.mxu1 %v1393_v55 }
  0x46   : > { %842 = vmatpush2.bf16.msra.mxu0 %v1395_v56  ;;  %883 = vmatpush2.bf16.msra.mxu1 %v1396_v57 }
  0x47   : > { %843 = vmatprep.subr.bf16.mxu0 %v1397_v58  ;;  %884 = vmatprep.subr.bf16.mxu1 %v1399_v59 }
  0x4a   : > { %844 = vmatpush2.bf16.msra.mxu0 %v1401_v60  ;;  %885 = vmatpush2.bf16.msra.mxu1 %v1402_v61 }
  0x4b   : > { %845 = vmatprep.subr.bf16.mxu0 %v1403_v62  ;;  %886 = vmatprep.subr.bf16.mxu1 %v1405_v63 }
  0x4e   : > { %846 = vmatpush2.bf16.msra.mxu0 %v1407_v0  ;;  %887 = vmatpush2.bf16.msra.mxu1 %v1408_v1 }
  0x4f   : > { %847 = vmatprep.subr.bf16.mxu0 %v1409_v2  ;;  %888 = vmatprep.subr.bf16.mxu1 %v1411_v3 }
  0x52   : > { %848 = vmatpush2.bf16.msra.mxu0 %v1413_v4  ;;  %889 = vmatpush2.bf16.msra.mxu1 %v1414_v5 }
  0x53   : > { %849 = vmatprep.subr.bf16.mxu0 %v1415_v6  ;;  %890 = vmatprep.subr.bf16.mxu1 %v1417_v7 }
  0x56   : > { %850 = vmatpush2.bf16.msra.mxu0 %v1419_v8  ;;  %891 = vmatpush2.bf16.msra.mxu1 %v1420_v9 }
  0x57   : > { %851 = vmatprep.subr.bf16.mxu0 %v1421_v10  ;;  %892 = vmatprep.subr.bf16.mxu1 %v1423_v13 }
  0x5a   : > { %852 = vmatpush2.bf16.msra.mxu0 %v1425_v14  ;;  %893 = vmatpush2.bf16.msra.mxu1 %v1426_v15 }
  0x5b   : > { %903 = vmatprep.subr.bf16.mxu0 %v1430_v16 }
  0x5d   : > { %854 = vmatmul.mubr.bf16.vlgmr.msra.gmra.mxu0 %v1668_v11  ;;  %895 = vmatmul.mubr.bf16.vlgmr.msra.gmra.mxu1 %v1670_v12  ;;  %v1437_v11 = vld [vmem:[%s1665_s15 + $0x240] ss:$8 sps:$4 sm:$0xff]   ;;  %v1442_v12 = vld [vmem:[%s1665_s15 + $0x234] ss:$8 sps:$4 sm:$0xff]   ;;  %s1783_s15 = scalar_lea.vmem [#allocation4], %s1169_s8 }
  0x5e   : > { %904 = vmatpush1.bf16.msra.mxu0 %v1428_v18  ;;  %1258 = vmatprep.mubr.msk.bf16.mxu0 %vm810_vm0, %v399_v19  ;;  %s1020_s16 = sshll.u32 %s1783_s15, 4  ;;  %s1021_s16 = int_to_ptr.vmem [resolvable:$true] %s1020_s16 }
  0x5f   : > { %905 = vmatprep.subr.bf16.mxu0 %v1433_v20 }
  0x62   : > { %906 = vmatpush1.bf16.msra.mxu0 %v1431_v21 }
  0x63   : > { %907 = vmatprep.subr.bf16.mxu0 %v1436_v22 }
  0x66   : > { %908 = vmatpush1.bf16.msra.mxu0 %v1434_v23 }
  0x67   : > { %909 = vmatprep.subr.bf16.mxu0 %v1439_v24 }
  0x6a   : > { %910 = vmatpush1.bf16.msra.mxu0 %v1437_v11 }
  0x6b   : > { %911 = vmatprep.subr.bf16.mxu0 %v1442_v12 }
  0x6e   : > { %912 = vmatpush1.bf16.msra.mxu0 %v1440_v25 }
  0x6f   : > { %913 = vmatprep.subr.bf16.mxu0 %v1445_v26 }
  0x72   : > { %914 = vmatpush1.bf16.msra.mxu0 %v1443_v27 }
  0x73   : > { %915 = vmatprep.subr.bf16.mxu0 %v1448_v28 }
  0x76   : > { %916 = vmatpush1.bf16.msra.mxu0 %v1446_v29 }
  0x77   : > { %917 = vmatprep.subr.bf16.mxu0 %v1451_v30 }
  0x7a   : > { %918 = vmatpush1.bf16.msra.mxu0 %v1449_v32 }
  0x7b   : > { %1257 = vmatprep.subr.msk.bf16.mxu0 %vm814_vm1, %v1256_v33 }
  0x7e   : > { %934 = vmatpush2.bf16.msra.mxu0 %v816_v35 }
  0x81   : > { %936 = vmatmul.mubr.bf16.vlgmr.msra.gmra.mxu0 %v1174_v17 }
  0x93   : > { %v964_v48 = vpop.permute.xlu1 %963 }
 0x11d   : > { %v855_v36 = vpop.f32.mrf.mxu0  ;;  %v896_v37 = vpop.f32.mrf.mxu1 }
 0x11e   : > { %v897_v44 = vadd.f32 %v896_v37, %v855_v36 }
 0x11f   : > { %v857_v38 = vpop.f32.mrf.mxu0  ;;  %v898_v39 = vpop.f32.mrf.mxu1 }
 0x120   : > { %v899_v46 = vadd.f32 %v898_v39, %v857_v38 }
 0x121   : > { %v859_v40 = vpop.f32.mrf.mxu0  ;;  %v900_v41 = vpop.f32.mrf.mxu1 }
 0x123   : > { %v860_v42 = vpop.f32.mrf.mxu0  ;;  %v901_v43 = vpop.f32.mrf.mxu1 }
 0x141   : > { %v937_v45 = vpop.f32.mrf.mxu0 }
 0x142   : > { %v938_v47 = vadd.f32 %v937_v45, %v897_v44 }
 0x143   : > { %v939_v49 = vpop.f32.mrf.mxu0 }
 0x144   : > { %v940_v50 = vadd.f32 %v939_v49, %v899_v46  ;;  %v966_v51 = vadd.f32 %v964_v48, %v938_v47  ;;  %v945_v53 = vsel %vm944_vm2, %v938_v47, 0.0  ;;  %v952_v56 = vmul.f32 %v938_v47, %v938_v47 }
 0x145   : > { %v941_v52 = vpop.f32.mrf.mxu0 }
 0x146   : > { %v967_v54 = vadd.f32 %v964_v48, %v940_v50  ;;  %v946_v55 = vsel %vm944_vm2, %v940_v50, 0.0  ;;  %v953_v57 = vmul.f32 %v940_v50, %v940_v50  ;;  %v954_v62 = vsel %vm944_vm2, %v952_v56, 0.0 }
 0x147   : > { %v942_v58 = vpop.f32.mrf.mxu0  ;;  %v947_v59 = vadd.f32 %v946_v55, %v945_v53 }
 0x148   : > { %v970_v60 = vcombine.low %v966_v51, %v967_v54  ;;  %v955_v61 = vsel %vm944_vm2, %v953_v57, 0.0 }
 0x149   : > { %948 = vadd.xlane.f32.xlu0 %v947_v59  ;;  %v956_v63 = vadd.f32 %v955_v61, %v954_v62 }
 0x14a   : > { %972 = vst [vmem:[%s287_s29] sm:$0x77] %v970_v60  ;;  %s1460_s29 = scalar_lea.vmem %s1459_s27, 128 }
 0x14b   : > { %p1462_p2 = scmp.lt.s32.totalorder %s1460_s29, %s1454_s24 }
 0x14d   : > { %957 = vadd.xlane.f32.xlu0 %v956_v63  ;;  %p1463_p3 = por %p1462_p2, %p1461_p1 }
 0x14f   : > { %p1464_p5 = pnand %p1463_p3, %p1457_p0 }
 0x1d2   : > { %v949_v0 = vpop.xlane.xlu0 %948 }
 0x1d3   : > { %951 = vst.msk [vmem:[%s261_s10] sm:$0x7] %vm950_vm3, %v949_v0 }
 0x1d4   : > { %1467 = shalt.err (!%p1464_p5)
}
 0x1d5   : > { %s1468_s8 = scalar_lea.hbm %s1779_s14, 64  ;;  %s1472_s13 = scalar_lea.hbm %s1860_s4, 128 }
 0x1d6   : > { %p1469_p6 = scmp.ne.s32.totalorder %s1779_s14, %s1468_s8  ;;  %p1473_p10 = scmp.lt.s32.totalorder %s1779_s14, %s1860_s4 }
 0x1d7   : > { %p1474_p11 = scmp.lt.s32.totalorder %s1472_s13, %s1468_s8 }
 0x1d8   : > { %p1470_p7 = pnand %p1469_p6, %p1636_p4 }
 0x1d9   : > { %p1475_p12 = por %p1474_p11, %p1473_p10 }
 0x1da   : > { %p1471_p9 = pneg %p1470_p7 }
 0x1dc   : > { %p1476_p13 = pnand %p1475_p12, %p1471_p9 }
 0x1de   : > { %1479 = shalt.err (!%p1476_p13)
}
 0x1df   : > { %1267 = dma.vmem_to_hbm [thread:$0]  (%p1636_p4), %s1781_s11, 64, %s1779_s14, %s983_s17   ;;  %v958_v1 = vpop.xlane.xlu0 %957 }
 0x1e0   : > { %s1865_s24 = sshll.u32 %s1552_s21, 6  ;;  %959 = vst.msk [vmem:[%s1783_s15] sm:$0x7] %vm950_vm3, %v958_v1  ;;  %s988_s9 = scalar_lea.sflag [#allocation5], %s1770_s7 }
 0x1e1   : > { %s1813_s10 = scalar_lea.hbm %s1861_s5, %s1865_s24  ;;  %s1480_s8 = scalar_lea.vmem %s1021_s16, 64 }
 0x1e2   : > { %p1481_p0 = scmp.ne.s32.totalorder %s1021_s16, %s1480_s8  ;;  %s1565_s12 = smov [#allocation4]  }
 0x1e3   : > { %s1484_s13 = sshll.u32 %s1565_s12, 4  ;;  %s1485_s13 = int_to_ptr.vmem [resolvable:$false] %s1484_s13 }
 0x1e4   : > { %p1482_p1 = pnand %p1481_p0, %p1636_p4  ;;  %s1486_s11 = scalar_lea.vmem %s1485_s13, 128 }
 0x1e5   : > { %p1487_p3 = scmp.lt.s32.totalorder %s1021_s16, %s1485_s13  ;;  %p1488_p5 = scmp.lt.s32.totalorder %s1486_s11, %s1480_s8 }
 0x1e6   : > { %p1483_p2 = pneg %p1482_p1 }
 0x1e7   : > { %p1489_p6 = por %p1488_p5, %p1487_p3 }
 0x1e9   : > { %p1490_p7 = pnand %p1489_p6, %p1483_p2 }
 0x1eb   : > { %1493 = shalt.err (!%p1490_p7)
}
 0x1ec   : > { %s1494_s21 = scalar_lea.hbm %s1813_s10, 64  ;;  %s1498_s15 = scalar_lea.hbm %s1861_s5, 128 }
 0x1ed   : > { %p1495_p9 = scmp.ne.s32.totalorder %s1813_s10, %s1494_s21  ;;  %p1499_p12 = scmp.lt.s32.totalorder %s1813_s10, %s1861_s5 }
 0x1ee   : > { %p1500_p13 = scmp.lt.s32.totalorder %s1498_s15, %s1494_s21 }
 0x1ef   : > { %p1496_p10 = pnand %p1495_p9, %p1636_p4 }
 0x1f0   : > { %p1501_p0 = por %p1500_p13, %p1499_p12 }
 0x1f1   : > { %p1497_p11 = pneg %p1496_p10 }
 0x1f3   : > { %p1502_p1 = pnand %p1501_p0, %p1497_p11 }
 0x1f5   : > { %1505 = shalt.err (!%p1502_p1)
}
 0x1f6   : > { %1268 = dma.vmem_to_hbm [thread:$0]  (%p1636_p4), %s1021_s16, 64, %s1813_s10, %s988_s9  }
 0x1f7 PF: > { %p1278_p2 = scmp.ge.s32.totalorder %s1560_s23, 2  ;;  %s1044_s24 = sand.u32 1, %s1540_s18  }
 0x1f8   : > { %s1045_s27 = scalar_lea.sflag [#allocation3], %s1044_s24 }
 0x1f9   : > { %p1272_p3 = pnand %p1278_p2, %p1643_p8 }
 0x1fb   : > { %p1273_p5 = pneg %p1272_p3 }
 0x1fd   : > { %1531 = dma.done.wait (%p1273_p5), %s1045_s27, 64  }
 0x1fe   : > { %1533 = vsyncadd (%p1273_p5), %s1045_s27, 4294967232  ;;  %s1054_s29 = scalar_lea.sflag [#allocation5], %s1044_s24 }
 0x1ff   : > { %1535 = dma.done.wait (%p1273_p5), %s1054_s29, 64  }
 0x200   : > { %1537 = vsyncadd (%p1273_p5), %s1054_s29, 4294967232  ;;  %s22_s23 = sadd.s32 1, %s1560_s23   ;;  %s1866_s18 = smov %s1544_s19 }
 0x201   : > { %p19_p6 = scmp.ge.s32.totalorder %s22_s23, 4   ;;  %s1867_s19 = smov %s1548_s20 }
 0x202   : > { %s1868_s20 = smov %s1649_s6  ;;  %s1869_s21 = smov %s1556_s22 }
 0x203   : > { %s1870_s22 = smov %s1872_s26  ;;  %21 = sbr.rel (!%p19_p6) target bundleno = 6 (0x6), region = 96 }
 0x208   :  { %1059 = vsyncpa [#allocation3], 1 }
 0x209   :  { %1061 = vsyncpa [#allocation3 + $0x1], 1 }
 0x20a   :  { %1062 = vsyncpa [#allocation5], 1 }
 0x20b   :  { %1064 = vsyncpa [#allocation5 + $0x1], 1 }

</bundles_post_ra>
